<compile_context>
chip_gen: v7x
topology: tpu7x:2x2x1
jax: 0.10.0
libtpu: 0.0.40
codegen_flags: <defaults>
</compile_context>

<pallas_src>
import functools

import jax
import jax.numpy as jnp
from jax.experimental import pallas as pl
from jax.experimental.pallas import tpu as pltpu

IN_DIM = 128 * 3   # 384
HID = 128
EPS = 1e-5
NEG_SLOPE = 0.01
INV_HID = 1.0 / HID


def _leaky_relu(h):
    # max-form: identical to where(h>0, h, a*h) for 0 < a < 1, fewer VALU ops.
    return jnp.maximum(h, NEG_SLOPE * h)


def edge_mlp_kernel(x_ref,
                    w0_ref, b0_ref,
                    w1_ref, b1_ref,
                    w2_ref, b2_ref,
                    w3_ref, b3_ref,
                    gamma_ref, beta_ref,
                    o_ref):
    # x tile: (tm, 384). Weights are bf16; accumulate in f32 on the MXU.
    # NOTE: in the ragged last block, rows past N hold undefined data; their
    # results are computed but never stored (Pallas masks the partial store),
    # and the clamped-variance LayerNorm below cannot NaN on them.
    x = x_ref[...]

    h = jnp.dot(x.astype(jnp.bfloat16), w0_ref[...],
                preferred_element_type=jnp.float32) + b0_ref[...]
    h = _leaky_relu(h)
    h = jnp.dot(h.astype(jnp.bfloat16), w1_ref[...],
                preferred_element_type=jnp.float32) + b1_ref[...]
    h = _leaky_relu(h)
    h = jnp.dot(h.astype(jnp.bfloat16), w2_ref[...],
                preferred_element_type=jnp.float32) + b2_ref[...]
    h = _leaky_relu(h)
    h = jnp.dot(h.astype(jnp.bfloat16), w3_ref[...],
                preferred_element_type=jnp.float32) + b3_ref[...]

    # LayerNorm(128), eps=1e-5, elementwise affine. Fused statistics:
    # the two lane reductions are independent, mean via a 1/128 constant
    # multiply, variance clamped >= 0 (f32 cancellation guard), rsqrt on EUP.
    s1 = jnp.sum(h, axis=-1, keepdims=True)
    s2 = jnp.sum(h * h, axis=-1, keepdims=True)
    mu = s1 * INV_HID
    var = jnp.maximum(s2 * INV_HID - mu * mu, 0.0)
    r = jax.lax.rsqrt(var + EPS)
    out = (h - mu) * r * gamma_ref[...] + beta_ref[...]

    o_ref[...] = out.astype(o_ref.dtype)


def _round_up(v, m):
    return ((v + m - 1) // m) * m


@functools.partial(jax.jit, static_argnames=("desired_tm", "single_buffer_params"))
def processor_edge_mlp(x, params, *, desired_tm=1024, single_buffer_params=True):
    """x: [N, 384] (f32 or bf16). Returns [N, 128] in x.dtype.

    Row tile tm is chosen so that (a) it is a multiple of 8 (sublane), and
    (b) the grid has at least 2 iterations whenever N > 8, so both v7x
    TensorCores get work under dimension_semantics=("parallel",).
    """
    N, D = x.shape
    assert D == IN_DIM

    # tm selection (all static under jit: shapes are trace-time constants).
    tm = max(8, min(desired_tm, _round_up(pl.cdiv(N, 2), 8)))
    grid = (pl.cdiv(N, tm),)

    # Weights as bf16 (cast once, outside the kernel); biases / LN affine in f32.
    w0 = params["w0"].astype(jnp.bfloat16)
    w1 = params["w1"].astype(jnp.bfloat16)
    w2 = params["w2"].astype(jnp.bfloat16)
    w3 = params["w3"].astype(jnp.bfloat16)
    b0, b1, b2, b3 = params["b0"], params["b1"], params["b2"], params["b3"]
    gamma, beta = params["gamma"], params["beta"]

    # Parameters have a constant index_map -> single-buffer them (no prefetch
    # needed; halves their VMEM footprint and drops per-step no-op DMAs).
    param_kwargs = (
        {"pipeline_mode": pl.Buffered(1)} if single_buffer_params else {}
    )

    def param_spec(shape):
        return pl.BlockSpec(shape, lambda i: tuple(0 for _ in shape),
                            **param_kwargs)

    args = (x, w0, b0, w1, b1, w2, b2, w3, b3, gamma, beta)
    in_specs = [pl.BlockSpec((tm, IN_DIM), lambda i: (i, 0))] + [
        param_spec(a.shape) for a in args[1:]
    ]

    # Only set a VMEM limit if the estimate actually approaches the scoped
    # default (~32 MiB); at tm<=2048 usage is well under 10 MiB.
    params_bytes = 256 * 1024
    vmem_est = (2 * tm * IN_DIM * x.dtype.itemsize
                + 2 * tm * HID * x.dtype.itemsize
                + params_bytes)
    cp_kwargs = {"dimension_semantics": ("parallel",)}
    if vmem_est > 24 * 1024 * 1024:
        cp_kwargs["vmem_limit_bytes"] = int(vmem_est * 3 // 2)

    out = pl.pallas_call(
        edge_mlp_kernel,
        out_shape=jax.ShapeDtypeStruct((N, HID), x.dtype),
        grid_spec=pltpu.PrefetchScalarGridSpec(
            num_scalar_prefetch=0,
            grid=grid,
            in_specs=in_specs,
            out_specs=pl.BlockSpec((tm, HID), lambda i: (i, 0)),
        ),
        compiler_params=pltpu.CompilerParams(**cp_kwargs),
    )(*args)

    return out


def init_params(key):
    """Deterministic init mimicking PyTorch Linear default (uniform +-1/sqrt(fan_in)).
    Weights stored as (in, out); kept in f32, cast to bf16 in the wrapper."""
    ks = jax.random.split(key, 8)
    params = {}
    dims = [(IN_DIM, HID), (HID, HID), (HID, HID), (HID, HID)]
    for li, (fan_in, fan_out) in enumerate(dims):
        bound = 1.0 / jnp.sqrt(float(fan_in))
        params[f"w{li}"] = jax.random.uniform(
            ks[2 * li], (fan_in, fan_out), minval=-bound, maxval=bound,
            dtype=jnp.float32)
        params[f"b{li}"] = jax.random.uniform(
            ks[2 * li + 1], (1, fan_out), minval=-bound, maxval=bound,
            dtype=jnp.float32)
    params["gamma"] = jnp.ones((1, HID), dtype=jnp.float32)
    params["beta"] = jnp.zeros((1, HID), dtype=jnp.float32)
    return params


def reference_forward_f32(x, params):
    """Pure-f32 reference matching PyTorch semantics."""
    h = x
    for li in range(4):
        h = h @ params[f"w{li}"] + params[f"b{li}"]
        if li < 3:
            h = _leaky_relu(h)
    mu = jnp.mean(h, axis=-1, keepdims=True)
    var = jnp.mean((h - mu) ** 2, axis=-1, keepdims=True)
    return (h - mu) / jnp.sqrt(var + EPS) * params["gamma"] + params["beta"]


def reference_forward_mixed(x, params):
    """Reference with the same bf16-operand / f32-accumulate matmuls as the kernel."""
    h = x
    for li in range(4):
        w = params[f"w{li}"].astype(jnp.bfloat16)
        h = jnp.dot(h.astype(jnp.bfloat16), w,
                    preferred_element_type=jnp.float32) + params[f"b{li}"]
        if li < 3:
            h = _leaky_relu(h)
    mu = jnp.mean(h, axis=-1, keepdims=True)
    var = jnp.mean((h - mu) ** 2, axis=-1, keepdims=True)
    return (h - mu) / jnp.sqrt(var + EPS) * params["gamma"] + params["beta"]


if __name__ == "__main__":
    key = jax.random.PRNGKey(0)
    kx, kp = jax.random.split(key)

    # Small deterministic example: 300 edges (not a multiple of the tile ->
    # exercises the ragged last block) x 384 input features.
    N = 300
    x = jax.random.normal(kx, (N, IN_DIM), dtype=jnp.float32)
    params = init_params(kp)

    try:
        out = processor_edge_mlp(x, params, desired_tm=1024,
                                 single_buffer_params=True)
        out = jax.block_until_ready(out)
    except Exception:
        # Fallback if pl.Buffered(1) single-buffering is unsupported on this
        # jax build; identical numerics, default double-buffered params.
        out = processor_edge_mlp(x, params, desired_tm=1024,
                                 single_buffer_params=False)
        out = jax.block_until_ready(out)

    assert out.shape == (N, HID)
    assert bool(jnp.all(jnp.isfinite(out))), "non-finite output"

    # Tight check vs a reference using the same bf16 matmul precision.
    ref_mixed = reference_forward_mixed(x, params)
    assert jnp.allclose(out, ref_mixed, atol=2e-2, rtol=2e-2), \
        "mismatch vs mixed-precision reference"

    # Loose sanity check vs the pure-f32 (PyTorch-semantics) reference:
    # bf16 matmul operands move the result by ~1e-2 after LayerNorm.
    ref_f32 = reference_forward_f32(x, params)
    assert jnp.allclose(out, ref_f32, atol=1e-1, rtol=1e-1), \
        "mismatch vs f32 reference"

    print("KERNEL_OK")
</pallas_src>

<mosaic_0001>
module attributes {stable_mosaic.version = 11 : i64} {
  func.func @edge_mlp_kernel(%arg0: i32, %arg1: memref<152x384xf32, #tpu.memory_space<vmem>>, %arg2: memref<384x128xbf16, #tpu.memory_space<vmem>>, %arg3: memref<1x128xf32, #tpu.memory_space<vmem>>, %arg4: memref<128x128xbf16, #tpu.memory_space<vmem>>, %arg5: memref<1x128xf32, #tpu.memory_space<vmem>>, %arg6: memref<128x128xbf16, #tpu.memory_space<vmem>>, %arg7: memref<1x128xf32, #tpu.memory_space<vmem>>, %arg8: memref<128x128xbf16, #tpu.memory_space<vmem>>, %arg9: memref<1x128xf32, #tpu.memory_space<vmem>>, %arg10: memref<1x128xf32, #tpu.memory_space<vmem>>, %arg11: memref<1x128xf32, #tpu.memory_space<vmem>>, %arg12: memref<152x128xf32, #tpu.memory_space<vmem>>) attributes {dimension_semantics = [#tpu.dimension_semantics<parallel>], iteration_bounds = array<i64: 2>, scalar_prefetch = 0 : i64, scratch_operands = 0 : i64, tpu.core_type = #tpu.core_type<tc>, window_params = [{transform_indices = @transform_0, window_bounds = array<i64: 152, 384>}, {pipeline_mode = #tpu.pipeline_mode<synchronous>, transform_indices = @transform_1, window_bounds = array<i64: 384, 128>}, {pipeline_mode = #tpu.pipeline_mode<synchronous>, transform_indices = @transform_2, window_bounds = array<i64: 1, 128>}, {pipeline_mode = #tpu.pipeline_mode<synchronous>, transform_indices = @transform_3, window_bounds = array<i64: 128, 128>}, {pipeline_mode = #tpu.pipeline_mode<synchronous>, transform_indices = @transform_4, window_bounds = array<i64: 1, 128>}, {pipeline_mode = #tpu.pipeline_mode<synchronous>, transform_indices = @transform_5, window_bounds = array<i64: 128, 128>}, {pipeline_mode = #tpu.pipeline_mode<synchronous>, transform_indices = @transform_6, window_bounds = array<i64: 1, 128>}, {pipeline_mode = #tpu.pipeline_mode<synchronous>, transform_indices = @transform_7, window_bounds = array<i64: 128, 128>}, {pipeline_mode = #tpu.pipeline_mode<synchronous>, transform_indices = @transform_8, window_bounds = array<i64: 1, 128>}, {pipeline_mode = #tpu.pipeline_mode<synchronous>, transform_indices = @transform_9, window_bounds = array<i64: 1, 128>}, {pipeline_mode = #tpu.pipeline_mode<synchronous>, transform_indices = @transform_10, window_bounds = array<i64: 1, 128>}, {transform_indices = @transform_11, window_bounds = array<i64: 152, 128>}]} {
    %c0 = arith.constant 0 : index
    %c0_0 = arith.constant 0 : index
    %0 = vector.load %arg1[%c0, %c0_0] : memref<152x384xf32, #tpu.memory_space<vmem>>, vector<152x384xf32>
    %1 = arith.truncf %0 : vector<152x384xf32> to vector<152x384xbf16>
    %c0_1 = arith.constant 0 : index
    %c0_2 = arith.constant 0 : index
    %2 = vector.load %arg2[%c0_1, %c0_2] : memref<384x128xbf16, #tpu.memory_space<vmem>>, vector<384x128xbf16>
    %cst = arith.constant dense<0.000000e+00> : vector<152x128xf32>
    %3 = tpu.matmul %1, %2, %cst {dimension_numbers = #tpu.dot_dimension_numbers<[1], [0], [0], [1], [0, 0, 1, 1], [], []>} : vector<152x384xbf16>, vector<384x128xbf16>, vector<152x128xf32> -> vector<152x128xf32>
    %c0_3 = arith.constant 0 : index
    %c0_4 = arith.constant 0 : index
    %4 = vector.load %arg3[%c0_3, %c0_4] : memref<1x128xf32, #tpu.memory_space<vmem>>, vector<1x128xf32>
    %5 = vector.broadcast %4 : vector<1x128xf32> to vector<152x128xf32>
    %6 = arith.addf %3, %5 : vector<152x128xf32>
    %cst_5 = arith.constant 0.00999999977 : f32
    %7 = vector.broadcast %cst_5 : f32 to vector<152x128xf32>
    %8 = arith.mulf %7, %6 : vector<152x128xf32>
    %9 = arith.maximumf %6, %8 : vector<152x128xf32>
    %10 = arith.truncf %9 : vector<152x128xf32> to vector<152x128xbf16>
    %c0_6 = arith.constant 0 : index
    %c0_7 = arith.constant 0 : index
    %11 = vector.load %arg4[%c0_6, %c0_7] : memref<128x128xbf16, #tpu.memory_space<vmem>>, vector<128x128xbf16>
    %cst_8 = arith.constant dense<0.000000e+00> : vector<152x128xf32>
    %12 = tpu.matmul %10, %11, %cst_8 {dimension_numbers = #tpu.dot_dimension_numbers<[1], [0], [0], [1], [0, 0, 1, 1], [], []>} : vector<152x128xbf16>, vector<128x128xbf16>, vector<152x128xf32> -> vector<152x128xf32>
    %c0_9 = arith.constant 0 : index
    %c0_10 = arith.constant 0 : index
    %13 = vector.load %arg5[%c0_9, %c0_10] : memref<1x128xf32, #tpu.memory_space<vmem>>, vector<1x128xf32>
    %14 = vector.broadcast %13 : vector<1x128xf32> to vector<152x128xf32>
    %15 = arith.addf %12, %14 : vector<152x128xf32>
    %cst_11 = arith.constant 0.00999999977 : f32
    %16 = vector.broadcast %cst_11 : f32 to vector<152x128xf32>
    %17 = arith.mulf %16, %15 : vector<152x128xf32>
    %18 = arith.maximumf %15, %17 : vector<152x128xf32>
    %19 = arith.truncf %18 : vector<152x128xf32> to vector<152x128xbf16>
    %c0_12 = arith.constant 0 : index
    %c0_13 = arith.constant 0 : index
    %20 = vector.load %arg6[%c0_12, %c0_13] : memref<128x128xbf16, #tpu.memory_space<vmem>>, vector<128x128xbf16>
    %cst_14 = arith.constant dense<0.000000e+00> : vector<152x128xf32>
    %21 = tpu.matmul %19, %20, %cst_14 {dimension_numbers = #tpu.dot_dimension_numbers<[1], [0], [0], [1], [0, 0, 1, 1], [], []>} : vector<152x128xbf16>, vector<128x128xbf16>, vector<152x128xf32> -> vector<152x128xf32>
    %c0_15 = arith.constant 0 : index
    %c0_16 = arith.constant 0 : index
    %22 = vector.load %arg7[%c0_15, %c0_16] : memref<1x128xf32, #tpu.memory_space<vmem>>, vector<1x128xf32>
    %23 = vector.broadcast %22 : vector<1x128xf32> to vector<152x128xf32>
    %24 = arith.addf %21, %23 : vector<152x128xf32>
    %cst_17 = arith.constant 0.00999999977 : f32
    %25 = vector.broadcast %cst_17 : f32 to vector<152x128xf32>
    %26 = arith.mulf %25, %24 : vector<152x128xf32>
    %27 = arith.maximumf %24, %26 : vector<152x128xf32>
    %28 = arith.truncf %27 : vector<152x128xf32> to vector<152x128xbf16>
    %c0_18 = arith.constant 0 : index
    %c0_19 = arith.constant 0 : index
    %29 = vector.load %arg8[%c0_18, %c0_19] : memref<128x128xbf16, #tpu.memory_space<vmem>>, vector<128x128xbf16>
    %cst_20 = arith.constant dense<0.000000e+00> : vector<152x128xf32>
    %30 = tpu.matmul %28, %29, %cst_20 {dimension_numbers = #tpu.dot_dimension_numbers<[1], [0], [0], [1], [0, 0, 1, 1], [], []>} : vector<152x128xbf16>, vector<128x128xbf16>, vector<152x128xf32> -> vector<152x128xf32>
    %c0_21 = arith.constant 0 : index
    %c0_22 = arith.constant 0 : index
    %31 = vector.load %arg9[%c0_21, %c0_22] : memref<1x128xf32, #tpu.memory_space<vmem>>, vector<1x128xf32>
    %32 = vector.broadcast %31 : vector<1x128xf32> to vector<152x128xf32>
    %33 = arith.addf %30, %32 : vector<152x128xf32>
    %cst_23 = arith.constant dense<0.000000e+00> : vector<152xf32>
    %34 = vector.multi_reduction <add>, %33, %cst_23 [1] : vector<152x128xf32> to vector<152xf32>
    %35 = vector.shape_cast %34 : vector<152xf32> to vector<152x1xf32>
    %36 = arith.mulf %33, %33 : vector<152x128xf32>
    %cst_24 = arith.constant dense<0.000000e+00> : vector<152xf32>
    %37 = vector.multi_reduction <add>, %36, %cst_24 [1] : vector<152x128xf32> to vector<152xf32>
    %38 = vector.shape_cast %37 : vector<152xf32> to vector<152x1xf32>
    %cst_25 = arith.constant 7.812500e-03 : f32
    %39 = vector.broadcast %cst_25 : f32 to vector<152x1xf32>
    %40 = arith.mulf %35, %39 : vector<152x1xf32>
    %cst_26 = arith.constant 7.812500e-03 : f32
    %41 = vector.broadcast %cst_26 : f32 to vector<152x1xf32>
    %42 = arith.mulf %38, %41 : vector<152x1xf32>
    %43 = arith.mulf %40, %40 : vector<152x1xf32>
    %44 = arith.subf %42, %43 : vector<152x1xf32>
    %cst_27 = arith.constant 0.000000e+00 : f32
    %45 = vector.broadcast %cst_27 : f32 to vector<152x1xf32>
    %46 = arith.maximumf %44, %45 : vector<152x1xf32>
    %cst_28 = arith.constant 9.99999974E-6 : f32
    %47 = vector.broadcast %cst_28 : f32 to vector<152x1xf32>
    %48 = arith.addf %46, %47 : vector<152x1xf32>
    %49 = math.rsqrt %48 : vector<152x1xf32>
    %50 = vector.broadcast %40 : vector<152x1xf32> to vector<152x128xf32>
    %51 = arith.subf %33, %50 : vector<152x128xf32>
    %52 = vector.broadcast %49 : vector<152x1xf32> to vector<152x128xf32>
    %53 = arith.mulf %51, %52 : vector<152x128xf32>
    %c0_29 = arith.constant 0 : index
    %c0_30 = arith.constant 0 : index
    %54 = vector.load %arg10[%c0_29, %c0_30] : memref<1x128xf32, #tpu.memory_space<vmem>>, vector<1x128xf32>
    %55 = vector.broadcast %54 : vector<1x128xf32> to vector<152x128xf32>
    %56 = arith.mulf %53, %55 : vector<152x128xf32>
    %c0_31 = arith.constant 0 : index
    %c0_32 = arith.constant 0 : index
    %57 = vector.load %arg11[%c0_31, %c0_32] : memref<1x128xf32, #tpu.memory_space<vmem>>, vector<1x128xf32>
    %58 = vector.broadcast %57 : vector<1x128xf32> to vector<152x128xf32>
    %59 = arith.addf %56, %58 : vector<152x128xf32>
    %c0_33 = arith.constant 0 : index
    %c0_34 = arith.constant 0 : index
    %60 = vector.load %arg12[%c0_33, %c0_34] : memref<152x128xf32, #tpu.memory_space<vmem>>, vector<152x128xf32>
    tpu.vector_store %arg12[%c0_33, %c0_34], %59 {strides = array<i32>} : memref<152x128xf32, #tpu.memory_space<vmem>>, vector<152x128xf32>,
    return
  }
  func.func @transform_0(%arg0: i32) -> (i32, i32) {
    %c0_i32 = arith.constant 0 : i32
    %c0_i32_0 = arith.constant 0 : i32
    return %arg0, %c0_i32 : i32, i32
  }
  func.func @transform_1(%arg0: i32) -> (i32, i32) {
    %c0_i32 = arith.constant 0 : i32
    %c0_i32_0 = arith.constant 0 : i32
    %c0_i32_1 = arith.constant 0 : i32
    return %c0_i32, %c0_i32_0 : i32, i32
  }
  func.func @transform_2(%arg0: i32) -> (i32, i32) {
    %c0_i32 = arith.constant 0 : i32
    %c0_i32_0 = arith.constant 0 : i32
    %c0_i32_1 = arith.constant 0 : i32
    return %c0_i32, %c0_i32_0 : i32, i32
  }
  func.func @transform_3(%arg0: i32) -> (i32, i32) {
    %c0_i32 = arith.constant 0 : i32
    %c0_i32_0 = arith.constant 0 : i32
    %c0_i32_1 = arith.constant 0 : i32
    return %c0_i32, %c0_i32_0 : i32, i32
  }
  func.func @transform_4(%arg0: i32) -> (i32, i32) {
    %c0_i32 = arith.constant 0 : i32
    %c0_i32_0 = arith.constant 0 : i32
    %c0_i32_1 = arith.constant 0 : i32
    return %c0_i32, %c0_i32_0 : i32, i32
  }
  func.func @transform_5(%arg0: i32) -> (i32, i32) {
    %c0_i32 = arith.constant 0 : i32
    %c0_i32_0 = arith.constant 0 : i32
    %c0_i32_1 = arith.constant 0 : i32
    return %c0_i32, %c0_i32_0 : i32, i32
  }
  func.func @transform_6(%arg0: i32) -> (i32, i32) {
    %c0_i32 = arith.constant 0 : i32
    %c0_i32_0 = arith.constant 0 : i32
    %c0_i32_1 = arith.constant 0 : i32
    return %c0_i32, %c0_i32_0 : i32, i32
  }
  func.func @transform_7(%arg0: i32) -> (i32, i32) {
    %c0_i32 = arith.constant 0 : i32
    %c0_i32_0 = arith.constant 0 : i32
    %c0_i32_1 = arith.constant 0 : i32
    return %c0_i32, %c0_i32_0 : i32, i32
  }
  func.func @transform_8(%arg0: i32) -> (i32, i32) {
    %c0_i32 = arith.constant 0 : i32
    %c0_i32_0 = arith.constant 0 : i32
    %c0_i32_1 = arith.constant 0 : i32
    return %c0_i32, %c0_i32_0 : i32, i32
  }
  func.func @transform_9(%arg0: i32) -> (i32, i32) {
    %c0_i32 = arith.constant 0 : i32
    %c0_i32_0 = arith.constant 0 : i32
    %c0_i32_1 = arith.constant 0 : i32
    return %c0_i32, %c0_i32_0 : i32, i32
  }
  func.func @transform_10(%arg0: i32) -> (i32, i32) {
    %c0_i32 = arith.constant 0 : i32
    %c0_i32_0 = arith.constant 0 : i32
    %c0_i32_1 = arith.constant 0 : i32
    return %c0_i32, %c0_i32_0 : i32, i32
  }
  func.func @transform_11(%arg0: i32) -> (i32, i32) {
    %c0_i32 = arith.constant 0 : i32
    %c0_i32_0 = arith.constant 0 : i32
    return %arg0, %c0_i32 : i32, i32
  }
}

module attributes {stable_mosaic.version = 11 : i64} {
  func.func @edge_mlp_kernel(%arg0: i32, %arg1: memref<152x384xf32, #tpu.memory_space<vmem>>, %arg2: memref<384x128xbf16, #tpu.memory_space<vmem>>, %arg3: memref<1x128xf32, #tpu.memory_space<vmem>>, %arg4: memref<128x128xbf16, #tpu.memory_space<vmem>>, %arg5: memref<1x128xf32, #tpu.memory_space<vmem>>, %arg6: memref<128x128xbf16, #tpu.memory_space<vmem>>, %arg7: memref<1x128xf32, #tpu.memory_space<vmem>>, %arg8: memref<128x128xbf16, #tpu.memory_space<vmem>>, %arg9: memref<1x128xf32, #tpu.memory_space<vmem>>, %arg10: memref<1x128xf32, #tpu.memory_space<vmem>>, %arg11: memref<1x128xf32, #tpu.memory_space<vmem>>, %arg12: memref<152x128xf32, #tpu.memory_space<vmem>>) attributes {dimension_semantics = [#tpu.dimension_semantics<parallel>], iteration_bounds = array<i64: 2>, scalar_prefetch = 0 : i64, scratch_operands = 0 : i64, tpu.core_type = #tpu.core_type<tc>, window_params = [{transform_indices = @transform_0, window_bounds = array<i64: 152, 384>}, {pipeline_mode = #tpu.pipeline_mode<synchronous>, transform_indices = @transform_1, window_bounds = array<i64: 384, 128>}, {pipeline_mode = #tpu.pipeline_mode<synchronous>, transform_indices = @transform_2, window_bounds = array<i64: 1, 128>}, {pipeline_mode = #tpu.pipeline_mode<synchronous>, transform_indices = @transform_3, window_bounds = array<i64: 128, 128>}, {pipeline_mode = #tpu.pipeline_mode<synchronous>, transform_indices = @transform_4, window_bounds = array<i64: 1, 128>}, {pipeline_mode = #tpu.pipeline_mode<synchronous>, transform_indices = @transform_5, window_bounds = array<i64: 128, 128>}, {pipeline_mode = #tpu.pipeline_mode<synchronous>, transform_indices = @transform_6, window_bounds = array<i64: 1, 128>}, {pipeline_mode = #tpu.pipeline_mode<synchronous>, transform_indices = @transform_7, window_bounds = array<i64: 128, 128>}, {pipeline_mode = #tpu.pipeline_mode<synchronous>, transform_indices = @transform_8, window_bounds = array<i64: 1, 128>}, {pipeline_mode = #tpu.pipeline_mode<synchronous>, transform_indices = @transform_9, window_bounds = array<i64: 1, 128>}, {pipeline_mode = #tpu.pipeline_mode<synchronous>, transform_indices = @transform_10, window_bounds = array<i64: 1, 128>}, {transform_indices = @transform_11, window_bounds = array<i64: 152, 128>}]} {
    %c0 = arith.constant 0 : index
    %c0_0 = arith.constant 0 : index
    %0 = vector.load %arg1[%c0, %c0_0] : memref<152x384xf32, #tpu.memory_space<vmem>>, vector<152x384xf32>
    %1 = arith.truncf %0 : vector<152x384xf32> to vector<152x384xbf16>
    %c0_1 = arith.constant 0 : index
    %c0_2 = arith.constant 0 : index
    %2 = vector.load %arg2[%c0_1, %c0_2] : memref<384x128xbf16, #tpu.memory_space<vmem>>, vector<384x128xbf16>
    %cst = arith.constant dense<0.000000e+00> : vector<152x128xf32>
    %3 = tpu.matmul %1, %2, %cst {dimension_numbers = #tpu.dot_dimension_numbers<[1], [0], [0], [1], [0, 0, 1, 1], [], []>} : vector<152x384xbf16>, vector<384x128xbf16>, vector<152x128xf32> -> vector<152x128xf32>
    %c0_3 = arith.constant 0 : index
    %c0_4 = arith.constant 0 : index
    %4 = vector.load %arg3[%c0_3, %c0_4] : memref<1x128xf32, #tpu.memory_space<vmem>>, vector<1x128xf32>
    %5 = vector.broadcast %4 : vector<1x128xf32> to vector<152x128xf32>
    %6 = arith.addf %3, %5 : vector<152x128xf32>
    %cst_5 = arith.constant 0.00999999977 : f32
    %7 = vector.broadcast %cst_5 : f32 to vector<152x128xf32>
    %8 = arith.mulf %7, %6 : vector<152x128xf32>
    %9 = arith.maximumf %6, %8 : vector<152x128xf32>
    %10 = arith.truncf %9 : vector<152x128xf32> to vector<152x128xbf16>
    %c0_6 = arith.constant 0 : index
    %c0_7 = arith.constant 0 : index
    %11 = vector.load %arg4[%c0_6, %c0_7] : memref<128x128xbf16, #tpu.memory_space<vmem>>, vector<128x128xbf16>
    %cst_8 = arith.constant dense<0.000000e+00> : vector<152x128xf32>
    %12 = tpu.matmul %10, %11, %cst_8 {dimension_numbers = #tpu.dot_dimension_numbers<[1], [0], [0], [1], [0, 0, 1, 1], [], []>} : vector<152x128xbf16>, vector<128x128xbf16>, vector<152x128xf32> -> vector<152x128xf32>
    %c0_9 = arith.constant 0 : index
    %c0_10 = arith.constant 0 : index
    %13 = vector.load %arg5[%c0_9, %c0_10] : memref<1x128xf32, #tpu.memory_space<vmem>>, vector<1x128xf32>
    %14 = vector.broadcast %13 : vector<1x128xf32> to vector<152x128xf32>
    %15 = arith.addf %12, %14 : vector<152x128xf32>
    %cst_11 = arith.constant 0.00999999977 : f32
    %16 = vector.broadcast %cst_11 : f32 to vector<152x128xf32>
    %17 = arith.mulf %16, %15 : vector<152x128xf32>
    %18 = arith.maximumf %15, %17 : vector<152x128xf32>
    %19 = arith.truncf %18 : vector<152x128xf32> to vector<152x128xbf16>
    %c0_12 = arith.constant 0 : index
    %c0_13 = arith.constant 0 : index
    %20 = vector.load %arg6[%c0_12, %c0_13] : memref<128x128xbf16, #tpu.memory_space<vmem>>, vector<128x128xbf16>
    %cst_14 = arith.constant dense<0.000000e+00> : vector<152x128xf32>
    %21 = tpu.matmul %19, %20, %cst_14 {dimension_numbers = #tpu.dot_dimension_numbers<[1], [0], [0], [1], [0, 0, 1, 1], [], []>} : vector<152x128xbf16>, vector<128x128xbf16>, vector<152x128xf32> -> vector<152x128xf32>
    %c0_15 = arith.constant 0 : index
    %c0_16 = arith.constant 0 : index
    %22 = vector.load %arg7[%c0_15, %c0_16] : memref<1x128xf32, #tpu.memory_space<vmem>>, vector<1x128xf32>
    %23 = vector.broadcast %22 : vector<1x128xf32> to vector<152x128xf32>
    %24 = arith.addf %21, %23 : vector<152x128xf32>
    %cst_17 = arith.constant 0.00999999977 : f32
    %25 = vector.broadcast %cst_17 : f32 to vector<152x128xf32>
    %26 = arith.mulf %25, %24 : vector<152x128xf32>
    %27 = arith.maximumf %24, %26 : vector<152x128xf32>
    %28 = arith.truncf %27 : vector<152x128xf32> to vector<152x128xbf16>
    %c0_18 = arith.constant 0 : index
    %c0_19 = arith.constant 0 : index
    %29 = vector.load %arg8[%c0_18, %c0_19] : memref<128x128xbf16, #tpu.memory_space<vmem>>, vector<128x128xbf16>
    %cst_20 = arith.constant dense<0.000000e+00> : vector<152x128xf32>
    %30 = tpu.matmul %28, %29, %cst_20 {dimension_numbers = #tpu.dot_dimension_numbers<[1], [0], [0], [1], [0, 0, 1, 1], [], []>} : vector<152x128xbf16>, vector<128x128xbf16>, vector<152x128xf32> -> vector<152x128xf32>
    %c0_21 = arith.constant 0 : index
    %c0_22 = arith.constant 0 : index
    %31 = vector.load %arg9[%c0_21, %c0_22] : memref<1x128xf32, #tpu.memory_space<vmem>>, vector<1x128xf32>
    %32 = vector.broadcast %31 : vector<1x128xf32> to vector<152x128xf32>
    %33 = arith.addf %30, %32 : vector<152x128xf32>
    %cst_23 = arith.constant dense<0.000000e+00> : vector<152xf32>
    %34 = vector.multi_reduction <add>, %33, %cst_23 [1] : vector<152x128xf32> to vector<152xf32>
    %35 = vector.shape_cast %34 : vector<152xf32> to vector<152x1xf32>
    %36 = arith.mulf %33, %33 : vector<152x128xf32>
    %cst_24 = arith.constant dense<0.000000e+00> : vector<152xf32>
    %37 = vector.multi_reduction <add>, %36, %cst_24 [1] : vector<152x128xf32> to vector<152xf32>
    %38 = vector.shape_cast %37 : vector<152xf32> to vector<152x1xf32>
    %cst_25 = arith.constant 7.812500e-03 : f32
    %39 = vector.broadcast %cst_25 : f32 to vector<152x1xf32>
    %40 = arith.mulf %35, %39 : vector<152x1xf32>
    %cst_26 = arith.constant 7.812500e-03 : f32
    %41 = vector.broadcast %cst_26 : f32 to vector<152x1xf32>
    %42 = arith.mulf %38, %41 : vector<152x1xf32>
    %43 = arith.mulf %40, %40 : vector<152x1xf32>
    %44 = arith.subf %42, %43 : vector<152x1xf32>
    %cst_27 = arith.constant 0.000000e+00 : f32
    %45 = vector.broadcast %cst_27 : f32 to vector<152x1xf32>
    %46 = arith.maximumf %44, %45 : vector<152x1xf32>
    %cst_28 = arith.constant 9.99999974E-6 : f32
    %47 = vector.broadcast %cst_28 : f32 to vector<152x1xf32>
    %48 = arith.addf %46, %47 : vector<152x1xf32>
    %49 = math.rsqrt %48 : vector<152x1xf32>
    %50 = vector.broadcast %40 : vector<152x1xf32> to vector<152x128xf32>
    %51 = arith.subf %33, %50 : vector<152x128xf32>
    %52 = vector.broadcast %49 : vector<152x1xf32> to vector<152x128xf32>
    %53 = arith.mulf %51, %52 : vector<152x128xf32>
    %c0_29 = arith.constant 0 : index
    %c0_30 = arith.constant 0 : index
    %54 = vector.load %arg10[%c0_29, %c0_30] : memref<1x128xf32, #tpu.memory_space<vmem>>, vector<1x128xf32>
    %55 = vector.broadcast %54 : vector<1x128xf32> to vector<152x128xf32>
    %56 = arith.mulf %53, %55 : vector<152x128xf32>
    %c0_31 = arith.constant 0 : index
    %c0_32 = arith.constant 0 : index
    %57 = vector.load %arg11[%c0_31, %c0_32] : memref<1x128xf32, #tpu.memory_space<vmem>>, vector<1x128xf32>
    %58 = vector.broadcast %57 : vector<1x128xf32> to vector<152x128xf32>
    %59 = arith.addf %56, %58 : vector<152x128xf32>
    %c0_33 = arith.constant 0 : index
    %c0_34 = arith.constant 0 : index
    %60 = vector.load %arg12[%c0_33, %c0_34] : memref<152x128xf32, #tpu.memory_space<vmem>>, vector<152x128xf32>
    tpu.vector_store %arg12[%c0_33, %c0_34], %59 {strides = array<i32>} : memref<152x128xf32, #tpu.memory_space<vmem>>, vector<152x128xf32>,
    return
  }
  func.func @transform_0(%arg0: i32) -> (i32, i32) {
    %c0_i32 = arith.constant 0 : i32
    %c0_i32_0 = arith.constant 0 : i32
    return %arg0, %c0_i32 : i32, i32
  }
  func.func @transform_1(%arg0: i32) -> (i32, i32) {
    %c0_i32 = arith.constant 0 : i32
    %c0_i32_0 = arith.constant 0 : i32
    %c0_i32_1 = arith.constant 0 : i32
    return %c0_i32, %c0_i32_0 : i32, i32
  }
  func.func @transform_2(%arg0: i32) -> (i32, i32) {
    %c0_i32 = arith.constant 0 : i32
    %c0_i32_0 = arith.constant 0 : i32
    %c0_i32_1 = arith.constant 0 : i32
    return %c0_i32, %c0_i32_0 : i32, i32
  }
  func.func @transform_3(%arg0: i32) -> (i32, i32) {
    %c0_i32 = arith.constant 0 : i32
    %c0_i32_0 = arith.constant 0 : i32
    %c0_i32_1 = arith.constant 0 : i32
    return %c0_i32, %c0_i32_0 : i32, i32
  }
  func.func @transform_4(%arg0: i32) -> (i32, i32) {
    %c0_i32 = arith.constant 0 : i32
    %c0_i32_0 = arith.constant 0 : i32
    %c0_i32_1 = arith.constant 0 : i32
    return %c0_i32, %c0_i32_0 : i32, i32
  }
  func.func @transform_5(%arg0: i32) -> (i32, i32) {
    %c0_i32 = arith.constant 0 : i32
    %c0_i32_0 = arith.constant 0 : i32
    %c0_i32_1 = arith.constant 0 : i32
    return %c0_i32, %c0_i32_0 : i32, i32
  }
  func.func @transform_6(%arg0: i32) -> (i32, i32) {
    %c0_i32 = arith.constant 0 : i32
    %c0_i32_0 = arith.constant 0 : i32
    %c0_i32_1 = arith.constant 0 : i32
    return %c0_i32, %c0_i32_0 : i32, i32
  }
  func.func @transform_7(%arg0: i32) -> (i32, i32) {
    %c0_i32 = arith.constant 0 : i32
    %c0_i32_0 = arith.constant 0 : i32
    %c0_i32_1 = arith.constant 0 : i32
    return %c0_i32, %c0_i32_0 : i32, i32
  }
  func.func @transform_8(%arg0: i32) -> (i32, i32) {
    %c0_i32 = arith.constant 0 : i32
    %c0_i32_0 = arith.constant 0 : i32
    %c0_i32_1 = arith.constant 0 : i32
    return %c0_i32, %c0_i32_0 : i32, i32
  }
  func.func @transform_9(%arg0: i32) -> (i32, i32) {
    %c0_i32 = arith.constant 0 : i32
    %c0_i32_0 = arith.constant 0 : i32
    %c0_i32_1 = arith.constant 0 : i32
    return %c0_i32, %c0_i32_0 : i32, i32
  }
  func.func @transform_10(%arg0: i32) -> (i32, i32) {
    %c0_i32 = arith.constant 0 : i32
    %c0_i32_0 = arith.constant 0 : i32
    %c0_i32_1 = arith.constant 0 : i32
    return %c0_i32, %c0_i32_0 : i32, i32
  }
  func.func @transform_11(%arg0: i32) -> (i32, i32) {
    %c0_i32 = arith.constant 0 : i32
    %c0_i32_0 = arith.constant 0 : i32
    return %arg0, %c0_i32 : i32, i32
  }
}

</mosaic_0001>

<bundles_post_ra>
// kernel: processor_edge_mlp.1
= control target key start
LH: loop header
LB: loop body
LE: loop exit
PB: predicated region body
PF: predicated region fallthrough
CT: control target
= control target key end

     0   :  { %16 = vsyncpa [#allocation3], 0  ;;  %s3299_s0 = inlined_call_operand.vmem [shape: f32[300,384], index: 0, kind: input, shape index: {}]   ;;  %s3300_s1 = inlined_call_operand.vmem [shape: bf16[384,128], index: 1, kind: input, shape index: {}]   ;;  %s3301_s2 = inlined_call_operand.vmem [shape: f32[1,128], index: 2, kind: input, shape index: {}]   ;;  %s3302_s3 = inlined_call_operand.vmem [shape: bf16[128,128], index: 3, kind: input, shape index: {}]   ;;  %s3303_s4 = inlined_call_operand.vmem [shape: f32[1,128], index: 4, kind: input, shape index: {}]   ;;  %s3304_s5 = inlined_call_operand.vmem [shape: bf16[128,128], index: 5, kind: input, shape index: {}]   ;;  %s3305_s6 = inlined_call_operand.vmem [shape: f32[1,128], index: 6, kind: input, shape index: {}]   ;;  %s3306_s7 = inlined_call_operand.vmem [shape: bf16[128,128], index: 7, kind: input, shape index: {}]   ;;  %s3307_s8 = inlined_call_operand.vmem [shape: f32[1,128], index: 8, kind: input, shape index: {}]   ;;  %s3308_s9 = inlined_call_operand.vmem [shape: f32[1,128], index: 9, kind: input, shape index: {}]   ;;  %s3309_s10 = inlined_call_operand.vmem [shape: f32[1,128], index: 10, kind: input, shape index: {}]   ;;  %s3310_s11 = inlined_call_operand.hbm [shape: f32[300,128], index: 11, kind: output, shape index: {}]  }
   0x1   :  { %18 = vsyncpa [#allocation3 + $0x1], 0  ;;  %s2619_s17 = smov 0   ;;  %s2621_s18 = smov 0  }
   0x2   :  { %s2623_s19 = smov 0   ;;  %s2625_s20 = smov 0  }
   0x3 LB: > { %s2640_s21 = sadd.s32 4294967295, %s2554_s20   ;;  %s2008_s22 = sadd.s32 4294967294, %s2554_s20   ;;  %s2554_s20 = sphi %s2625_s20, %s3318_s20   ;;  %s2550_s19 = sphi %s2623_s19, %s3317_s19   ;;  %s2546_s18 = sphi %s2621_s18, %s3316_s18   ;;  %s2542_s17 = sphi %s2619_s17, %s3315_s17  }
   0x4   : > { %s2644_s23 = sadd.s32 1, %s2554_s20   ;;  %s267_s24 = sadd.s32 1, %s2550_s19 }
   0x5   : > { %s264_s25 = ssub.s32 %s2554_s20, %s2644_s23  ;;  %p277_p0 = scmp.ne.s32.totalorder %s2550_s19, %s2546_s18 }
   0x6   : > { %p265_p1 = scmp.eq.s32.totalorder %s264_s25, 0  ;;  %p278_p2 = scmp.eq.s32.totalorder %s2640_s21, 1 }
   0x7   : > { %p283_p3 = scmp.ne.s32.totalorder %s2546_s18, %s2542_s17  ;;  %p284_p4 = scmp.eq.s32.totalorder %s2008_s22, 1 }
   0x8   : > { %s2655_s26 = scalar_select %p265_p1, %s2550_s19, %s267_s24  }
   0x9   : > { %p2657_p5 = por %p278_p2, %p277_p0  ;;  %p2661_p6 = por %p284_p4, %p283_p3 }
   0xa   : > { %3311 = sst [smem:[#allocation5_spill]] %s2655_s26  ;;  %p2011_p7 = scmp.ge.s32.totalorder %s2554_s20, 1 }
   0xb   : > { %p342_p8 = scmp.lt.s32.totalorder %s2554_s20, 3 }
   0xd   : > { %p343_p9 = pnand %p2011_p7, %p342_p8 }
   0xe   : > { %v2406_v0 = vld [vmem:[%s3300_s1 + $0x40] sm:$0xff] (!%p343_p9)   ;;  %v2408_v2 = vld [vmem:[%s3300_s1 + $0x48] sm:$0xff] (!%p343_p9)   ;;  %s383_s29 = smul.u32 (!%p343_p9), 19, %s2640_s21  ;;  %v2411_v5 = vld [vmem:[%s3300_s1 + $0x50] sm:$0xff] (!%p343_p9)   ;;  %s380_s22 = sand.u32 (!%p343_p9), 1, %s2546_s18  }
   0xf   : > { %346 = sbr.rel (%p343_p9) target bundleno = 1200 (0x4b0), region = 64  ;;  %v2407_v1 = vld [vmem:[%s3300_s1] sm:$0xff] (!%p343_p9)   ;;  %2071 = vmatprep.subr.bf16.mxu0 (!%p343_p9), %v2406_v0  ;;  %v2410_v4 = vld [vmem:[%s3300_s1 + $0x8] sm:$0xff] (!%p343_p9)   ;;  %v2413_v7 = vld [vmem:[%s3300_s1 + $0x10] sm:$0xff] (!%p343_p9)  }
  0x10   : > { %2072 = vmatpush3.bf16.msra.mxu0 (!%p343_p9), %v2407_v1  ;;  %v2409_v3 = vld [vmem:[%s3300_s1 + $0x80] sm:$0xff] (!%p343_p9)   ;;  %v2412_v6 = vld [vmem:[%s3300_s1 + $0x88] sm:$0xff] (!%p343_p9)   ;;  %v2414_v8 = vld [vmem:[%s3300_s1 + $0x58] sm:$0xff] (!%p343_p9)   ;;  %p384_p10 = scmp.lt.s32.totalorder (!%p343_p9), %s383_s29, 37  ;;  %s3109_s26 = smul.u32 (!%p343_p9), 152, %s380_s22 }
  0x11   : > { %2073 = vmatprep.subr.bf16.mxu0 (!%p343_p9), %v2408_v2  ;;  %2219 = vmatprep.subr.bf16.mxu1 (!%p343_p9), %v2409_v3  ;;  %v2415_v9 = vld [vmem:[%s3300_s1 + $0x90] sm:$0xff] (!%p343_p9)   ;;  %v2416_v10 = vld [vmem:[%s3300_s1 + $0x18] sm:$0xff] (!%p343_p9)   ;;  %v2417_v11 = vld [vmem:[%s3300_s1 + $0x60] sm:$0xff] (!%p343_p9)   ;;  %s2070_s12 = smul.u32 (!%p343_p9), 2432, %s2640_s21  ;;  %s3258_s21 = scalar_lea.sflag (!%p343_p9), [#allocation3], %s380_s22 }
  0x12   : > { %2220 = vmatpush3.bf16.msra.mxu1 (!%p343_p9), %v2409_v3  ;;  %v2418_v12 = vld [vmem:[%s3300_s1 + $0x98] sm:$0xff] (!%p343_p9)   ;;  %v2419_v13 = vld [vmem:[%s3300_s1 + $0x20] sm:$0xff] (!%p343_p9)   ;;  %v2420_v15 = vld [vmem:[%s3300_s1 + $0x68] sm:$0xff] (!%p343_p9)   ;;  %s3133_s30 = scalar_lea.vmem (!%p343_p9), [#allocation2], %s3109_s26  ;;  %s2556_s26 = smov (!%p343_p9), [#allocation2]  }
  0x13   : > { %2221 = vmatprep.subr.bf16.mxu1 (!%p343_p9), %v2412_v6  ;;  %v2421_v14 = vld [vmem:[%s3300_s1 + $0xa0] sm:$0xff] (!%p343_p9)   ;;  %v2422_v16 = vld [vmem:[%s3300_s1 + $0x28] sm:$0xff] (!%p343_p9)   ;;  %v2423_v18 = vld [vmem:[%s3300_s1 + $0x70] sm:$0xff] (!%p343_p9)   ;;  %s1946_s13 = sshll.u32 (!%p343_p9), %s3133_s30, 4  ;;  %s3249_s24 = scalar_lea.hbm (!%p343_p9), %s3310_s11, %s2070_s12  ;;  %s3251_s13 = int_to_ptr.vmem [resolvable:$true] %s1946_s13 }
  0x14   : > { %2074 = vmatpush3.bf16.msra.mxu0 (!%p343_p9), %v2410_v4  ;;  %v2424_v17 = vld [vmem:[%s3300_s1 + $0xa8] sm:$0xff] (!%p343_p9)   ;;  %v2425_v19 = vld [vmem:[%s3300_s1 + $0x30] sm:$0xff] (!%p343_p9)   ;;  %v2426_v23 = vld [vmem:[%s3300_s1 + $0x78] sm:$0xff] (!%p343_p9)  }
  0x15   : > { %2075 = vmatprep.subr.bf16.mxu0 (!%p343_p9), %v2411_v5  ;;  %v2427_v20 = vld [vmem:[%s3300_s1 + $0xb0] sm:$0xff] (!%p343_p9)   ;;  %v2428_v27 = vld [vmem:[%s3300_s1 + $0x38] sm:$0xff] (!%p343_p9)   ;;  %v2430_v58 = vld [vmem:[%s3302_s3] sm:$0xff] (!%p343_p9)  }
  0x16   : > { %2222 = vmatpush3.bf16.msra.mxu1 %v2412_v6  ;;  %s3320_s29 = smov (!%p384_p10, %s383_s29), 37  ;;  %v2429_v31 = vld [vmem:[%s3300_s1 + $0xb8] sm:$0xff]   ;;  %v2431_v61 = vld [vmem:[%s3302_s3 + $0x8] sm:$0xff]   ;;  %v2432_v1 = vld [vmem:[%s3302_s3 + $0x10] sm:$0xff]  }
  0x17   : > { %2223 = vmatprep.subr.bf16.mxu1 %v2415_v9  ;;  %s2364_s15 = smul.u32 24, %s3320_s29  ;;  %v2433_v6 = vld [vmem:[%s3302_s3 + $0x18] sm:$0xff]  }
  0x18   : > { %2076 = vmatpush3.bf16.msra.mxu0 %v2413_v7 }
  0x19   : > { %2077 = vmatprep.subr.bf16.mxu0 %v2414_v8  ;;  %s2728_s29 = scalar_lea.vmem %s3299_s0, %s2364_s15  ;;  %s2496_s15 = sshll.u32 %s2556_s26, 4  ;;  %s2497_s15 = int_to_ptr.vmem [resolvable:$false] %s2496_s15 }
  0x1a   : > { %2224 = vmatpush3.bf16.msra.mxu1 %v2415_v9  ;;  %v393_v21 = vld [vmem:[%s2728_s29 + $0x8] sm:$0xff]  ;;  %v396_v22 = vld [vmem:[%s2728_s29 + $0x20] sm:$0xff]  ;;  %v394_v25 = vld [vmem:[%s2728_s29 + $0x10] sm:$0xff]  ;;  %s2498_s25 = scalar_lea.vmem %s2497_s15, 4864  ;;  %p2499_p0 = scmp.lt.s32.totalorder %s3251_s13, %s2497_s15 }
  0x1b   : > { %2225 = vmatprep.subr.bf16.mxu1 %v2418_v12  ;;  %v450_v24 = vpack.c.bf16 %v396_v22, %v393_v21  ;;  %v397_v26 = vld [vmem:[%s2728_s29 + $0x28] sm:$0xff]  ;;  %v392_v29 = vld [vmem:[%s2728_s29] sm:$0xff]  ;;  %v395_v30 = vld [vmem:[%s2728_s29 + $0x18] sm:$0xff] }
  0x1c   : > { %2078 = vmatpush3.bf16.msra.mxu0 %v2416_v10  ;;  %v451_v28 = vpack.c.bf16 %v397_v26, %v394_v25  ;;  %v399_v32 = vld [vmem:[%s2728_s29 + $0x38] sm:$0xff]  ;;  %v402_v33 = vld [vmem:[%s2728_s29 + $0x50] sm:$0xff]  ;;  %v449_v34 = vpack.c.bf16 %v395_v30, %v392_v29  ;;  %v400_v35 = vld [vmem:[%s2728_s29 + $0x40] sm:$0xff] }
  0x1d   : > { %2079 = vmatprep.subr.bf16.mxu0 %v2417_v11  ;;  %710 = vmatprep.mubr.bf16.mxu0 %v450_v24  ;;  %v403_v36 = vld [vmem:[%s2728_s29 + $0x58] sm:$0xff]  ;;  %v453_v37 = vpack.c.bf16 %v402_v33, %v399_v32  ;;  %v406_v38 = vld [vmem:[%s2728_s29 + $0x70] sm:$0xff]  ;;  %v409_v39 = vld [vmem:[%s2728_s29 + $0x88] sm:$0xff] }
  0x1e   : > { %2226 = vmatpush3.bf16.msra.mxu1 %v2418_v12  ;;  %2235 = vmatprep.mubr.bf16.mxu1 %v451_v28  ;;  %v454_v40 = vpack.c.bf16 %v403_v36, %v400_v35  ;;  %v457_v41 = vpack.c.bf16 %v409_v39, %v406_v38  ;;  %v398_v42 = vld [vmem:[%s2728_s29 + $0x30] sm:$0xff]  ;;  %v401_v43 = vld [vmem:[%s2728_s29 + $0x48] sm:$0xff]  ;;  %v408_v45 = vld [vmem:[%s2728_s29 + $0x80] sm:$0xff] }
  0x1f   : > { %2227 = vmatprep.subr.bf16.mxu1 %v2421_v14  ;;  %v405_v44 = vld [vmem:[%s2728_s29 + $0x68] sm:$0xff]  ;;  %v452_v46 = vpack.c.bf16 %v401_v43, %v398_v42  ;;  %v412_v47 = vld [vmem:[%s2728_s29 + $0xa0] sm:$0xff]  ;;  %v415_v48 = vld [vmem:[%s2728_s29 + $0xb8] sm:$0xff] }
  0x20   : > { %2080 = vmatpush3.bf16.msra.mxu0 %v2419_v13  ;;  %v456_v49 = vpack.c.bf16 %v408_v45, %v405_v44  ;;  %v418_v50 = vld [vmem:[%s2728_s29 + $0xd0] sm:$0xff]  ;;  %v421_v51 = vld [vmem:[%s2728_s29 + $0xe8] sm:$0xff]  ;;  %v404_v52 = vld [vmem:[%s2728_s29 + $0x60] sm:$0xff]  ;;  %v460_v53 = vpack.c.bf16 %v415_v48, %v412_v47 }
  0x21   : > { %2081 = vmatprep.subr.bf16.mxu0 %v2420_v15  ;;  %v407_v54 = vld [vmem:[%s2728_s29 + $0x78] sm:$0xff]  ;;  %v414_v56 = vld [vmem:[%s2728_s29 + $0xb0] sm:$0xff]  ;;  %v463_v57 = vpack.c.bf16 %v421_v51, %v418_v50  ;;  %v424_v59 = vld [vmem:[%s2728_s29 + $0x100] sm:$0xff] }
  0x22   : > { %2228 = vmatpush3.bf16.msra.mxu1 %v2421_v14  ;;  %v411_v55 = vld [vmem:[%s2728_s29 + $0x98] sm:$0xff]  ;;  %v430_v62 = vld [vmem:[%s2728_s29 + $0x130] sm:$0xff]  ;;  %v433_v63 = vld [vmem:[%s2728_s29 + $0x148] sm:$0xff]  ;;  %v455_v0 = vpack.c.bf16 %v407_v54, %v404_v52 }
  0x23   : > { %2229 = vmatprep.subr.bf16.mxu1 %v2424_v17  ;;  %v427_v60 = vld [vmem:[%s2728_s29 + $0x118] sm:$0xff]  ;;  %v459_v2 = vpack.c.bf16 %v414_v56, %v411_v55  ;;  %v410_v3 = vld [vmem:[%s2728_s29 + $0x90] sm:$0xff]  ;;  %v413_v4 = vld [vmem:[%s2728_s29 + $0xa8] sm:$0xff]  ;;  %v469_v9 = vpack.c.bf16 %v433_v63, %v430_v62 }
  0x24   : > { %2082 = vmatpush3.bf16.msra.mxu0 %v2422_v16  ;;  %v466_v5 = vpack.c.bf16 %v427_v60, %v424_v59  ;;  %v417_v7 = vld [vmem:[%s2728_s29 + $0xc8] sm:$0xff]  ;;  %v420_v8 = vld [vmem:[%s2728_s29 + $0xe0] sm:$0xff]  ;;  %v439_v11 = vld [vmem:[%s2728_s29 + $0x178] sm:$0xff]  ;;  %v458_v14 = vpack.c.bf16 %v413_v4, %v410_v3 }
  0x25   : > { %2083 = vmatprep.subr.bf16.mxu0 %v2423_v18  ;;  %v436_v10 = vld [vmem:[%s2728_s29 + $0x160] sm:$0xff]  ;;  %v442_v12 = vld [vmem:[%s2728_s29 + $0x190] sm:$0xff]  ;;  %v445_v13 = vld [vmem:[%s2728_s29 + $0x1a8] sm:$0xff]  ;;  %v462_v15 = vpack.c.bf16 %v420_v8, %v417_v7 }
  0x26   : > { %2230 = vmatpush3.bf16.msra.mxu1 %v2424_v17  ;;  %v416_v16 = vld [vmem:[%s2728_s29 + $0xc0] sm:$0xff]  ;;  %v419_v17 = vld [vmem:[%s2728_s29 + $0xd8] sm:$0xff]  ;;  %v472_v18 = vpack.c.bf16 %v439_v11, %v436_v10  ;;  %v426_v21 = vld [vmem:[%s2728_s29 + $0x110] sm:$0xff] }
  0x27   : > { %2231 = vmatprep.subr.bf16.mxu1 %v2427_v20  ;;  %v461_v22 = vpack.c.bf16 %v419_v17, %v416_v16  ;;  %v422_v26 = vld [vmem:[%s2728_s29 + $0xf0] sm:$0xff]  ;;  %v429_v28 = vld [vmem:[%s2728_s29 + $0x128] sm:$0xff]  ;;  %v432_v29 = vld [vmem:[%s2728_s29 + $0x140] sm:$0xff] }
  0x28   : > { %2084 = vmatpush3.bf16.msra.mxu0 %v2425_v19  ;;  %v475_v19 = vpack.c.bf16 %v445_v13, %v442_v12  ;;  %v428_v32 = vld [vmem:[%s2728_s29 + $0x120] sm:$0xff]  ;;  %v431_v33 = vld [vmem:[%s2728_s29 + $0x138] sm:$0xff]  ;;  %v438_v35 = vld [vmem:[%s2728_s29 + $0x170] sm:$0xff] }
  0x29   : > { %2085 = vmatprep.subr.bf16.mxu0 %v2426_v23  ;;  %v448_v23 = vld [vmem:[%s2728_s29 + $0x1c0] sm:$0xff]  ;;  %v467_v36 = vpack.c.bf16 %v431_v33, %v428_v32  ;;  %v434_v38 = vld [vmem:[%s2728_s29 + $0x150] sm:$0xff]  ;;  %v437_v39 = vld [vmem:[%s2728_s29 + $0x168] sm:$0xff] }
  0x2a   : > { %2232 = vmatpush3.bf16.msra.mxu1 %v2427_v20  ;;  %v423_v20 = vld [vmem:[%s2728_s29 + $0xf8] sm:$0xff]  ;;  %v478_v25 = vpack.c.bf16 %v448_v23, %v448_v23  ;;  %v470_v42 = vpack.c.bf16 %v437_v39, %v434_v38  ;;  %v440_v44 = vld [vmem:[%s2728_s29 + $0x180] sm:$0xff]  ;;  %v2435_v52 = vld [vmem:[%s3302_s3 + $0x28] sm:$0xff]  }
  0x2b   : > { %2233 = vmatprep.subr.bf16.mxu1 %v2429_v31  ;;  %v465_v24 = vpack.c.bf16 %v426_v21, %v423_v20  ;;  %v443_v45 = vld [vmem:[%s2728_s29 + $0x198] sm:$0xff]  ;;  %v2434_v51 = vld [vmem:[%s3302_s3 + $0x20] sm:$0xff]   ;;  %v2439_v56 = vld [vmem:[%s3304_s5 + $0x8] sm:$0xff]  }
  0x2c   : > { %2086 = vmatpush3.bf16.msra.mxu0 %v2428_v27  ;;  %v425_v27 = vld [vmem:[%s2728_s29 + $0x108] sm:$0xff]  ;;  %v473_v47 = vpack.c.bf16 %v443_v45, %v440_v44  ;;  %v2437_v54 = vld [vmem:[%s3302_s3 + $0x38] sm:$0xff]   ;;  %v2438_v55 = vld [vmem:[%s3304_s5] sm:$0xff]  }
  0x2d   : > { %v464_v30 = vpack.c.bf16 %v425_v27, %v422_v26  ;;  %2291 = vmatprep.subr.bf16.mxu0 %v2438_v55  ;;  %v2442_v59 = vld [vmem:[%s3304_s5 + $0x20] sm:$0xff]   ;;  %v2443_v60 = vld [vmem:[%s3304_s5 + $0x28] sm:$0xff]  }
  0x2e   : > { %2234 = vmatpush3.bf16.msra.mxu1 %v2429_v31  ;;  %v468_v31 = vpack.c.bf16 %v432_v29, %v429_v28 }
  0x2f   : > { %711 = vmatmul.mubr.bf16.vlgmr.msra.gmra.mrb[0].mxu0 %v449_v34  ;;  %2255 = vmatprep.subr.bf16.mxu1 %v2430_v58  ;;  %v435_v34 = vld [vmem:[%s2728_s29 + $0x158] sm:$0xff] }
  0x30   : > { %718 = vmatprep.mubr.bf16.mxu0 %v453_v37  ;;  %v471_v37 = vpack.c.bf16 %v438_v35, %v435_v34  ;;  %2292 = vmatpush3.bf16.msra.mxu0 %v2438_v55 }
  0x31   : > { %2236 = vmatmul.mubr.bf16.vlgmr.msra.gmra.mrb[0].mxu1 %v454_v40  ;;  %v441_v40 = vld [vmem:[%s2728_s29 + $0x188] sm:$0xff]  ;;  %2293 = vmatprep.subr.bf16.mxu0 %v2439_v56 }
  0x32   : > { %2239 = vmatprep.mubr.bf16.mxu1 %v457_v41  ;;  %2256 = vmatpush3.bf16.msra.mxu1 %v2430_v58  ;;  %v444_v41 = vld [vmem:[%s2728_s29 + $0x1a0] sm:$0xff]  ;;  %v2441_v58 = vld [vmem:[%s3304_s5 + $0x18] sm:$0xff]  }
  0x33   : > { %2257 = vmatprep.subr.bf16.mxu1 %v2431_v61  ;;  %v474_v43 = vpack.c.bf16 %v444_v41, %v441_v40 }
  0x34   : > { %2294 = vmatpush3.bf16.msra.mxu0 %v2439_v56 }
  0x36   : > { %2258 = vmatpush3.bf16.msra.mxu1 %v2431_v61  ;;  %v2444_v61 = vld [vmem:[%s3304_s5 + $0x30] sm:$0xff]  }
  0x37   : > { %719 = vmatmul.mubr.bf16.gmra.mrb[4].mxu0 %v452_v46  ;;  %2259 = vmatprep.subr.bf16.mxu1 %v2432_v1  ;;  %v447_v46 = vld [vmem:[%s2728_s29 + $0x1b8] sm:$0xff] }
  0x38   : > { %726 = vmatprep.mubr.bf16.mxu0 %v456_v49  ;;  %v477_v48 = vpack.c.bf16 %v447_v46, %v447_v46  ;;  %v446_v49 = vld [vmem:[%s2728_s29 + $0x1b0] sm:$0xff]  ;;  %s2492_s29 = scalar_lea.vmem %s3251_s13, 2432 }
  0x39   : > { %2240 = vmatmul.mubr.bf16.gmra.mrb[4].mxu1 %v460_v53  ;;  %v476_v50 = vpack.c.bf16 %v446_v49, %v446_v49  ;;  %v2436_v53 = vld [vmem:[%s3302_s3 + $0x30] sm:$0xff]   ;;  %p2493_p11 = scmp.ne.s32.totalorder %s3251_s13, %s2492_s29  ;;  %p2500_p1 = scmp.lt.s32.totalorder %s2498_s25, %s2492_s29 }
  0x3a   : > { %2243 = vmatprep.mubr.bf16.mxu1 %v463_v57  ;;  %2260 = vmatpush3.bf16.msra.mxu1 %v2432_v1  ;;  %v2440_v57 = vld [vmem:[%s3304_s5 + $0x10] sm:$0xff]  }
  0x3b   : > { %2261 = vmatprep.subr.bf16.mxu1 %v2433_v6  ;;  %2295 = vmatprep.subr.bf16.mxu0 %v2440_v57  ;;  %p2494_p12 = pnand %p2493_p11, %p2657_p5  ;;  %p2501_p2 = por %p2500_p1, %p2499_p0 }
  0x3c   : > { %2296 = vmatpush3.bf16.msra.mxu0 %v2440_v57 }
  0x3d   : > { %2297 = vmatprep.subr.bf16.mxu0 %v2441_v58  ;;  %p2495_p13 = pneg %p2494_p12 }
  0x3e   : > { %2262 = vmatpush3.bf16.msra.mxu1 %v2433_v6 }
  0x3f   : > { %727 = vmatmul.mubr.bf16.gmra.mrb[8].mxu0 %v455_v0  ;;  %2263 = vmatprep.subr.bf16.mxu1 %v2434_v51  ;;  %v2850_v0 = vld [vmem:[%s3301_s2] ss:$0 sm:$0xff]  ;;  %p2502_p3 = pnand %p2501_p2, %p2495_p13 }
  0x40   : > { %734 = vmatprep.mubr.bf16.mxu0 %v459_v2  ;;  %2298 = vmatpush3.bf16.msra.mxu0 %v2441_v58 }
  0x41   : > { %2244 = vmatmul.mubr.bf16.gmra.mrb[8].mxu1 %v466_v5  ;;  %2299 = vmatprep.subr.bf16.mxu0 %v2442_v59 }
  0x42   : > { %2247 = vmatprep.mubr.bf16.mxu1 %v469_v9  ;;  %2264 = vmatpush3.bf16.msra.mxu1 %v2434_v51 }
  0x43   : > { %2265 = vmatprep.subr.bf16.mxu1 %v2435_v52 }
  0x44   : > { %2300 = vmatpush3.bf16.msra.mxu0 %v2442_v59 }
  0x45   : > { %2301 = vmatprep.subr.bf16.mxu0 %v2443_v60 }
  0x46   : > { %2266 = vmatpush3.bf16.msra.mxu1 %v2435_v52 }
  0x47   : > { %735 = vmatmul.mubr.bf16.gmra.mrb[12].mxu0 %v458_v14  ;;  %2267 = vmatprep.subr.bf16.mxu1 %v2436_v53 }
  0x48   : > { %742 = vmatprep.mubr.bf16.mxu0 %v462_v15  ;;  %2302 = vmatpush3.bf16.msra.mxu0 %v2443_v60 }
  0x49   : > { %2248 = vmatmul.mubr.bf16.gmra.mrb[12].mxu1 %v472_v18  ;;  %2303 = vmatprep.subr.bf16.mxu0 %v2444_v61 }
  0x4a   : > { %2251 = vmatprep.mubr.bf16.mxu1 %v475_v19  ;;  %2268 = vmatpush3.bf16.msra.mxu1 %v2436_v53 }
  0x4b   : > { %2269 = vmatprep.subr.bf16.mxu1 %v2437_v54 }
  0x4c   : > { %2304 = vmatpush3.bf16.msra.mxu0 %v2444_v61 }
  0x4e   : > { %2270 = vmatpush3.bf16.msra.mxu1 %v2437_v54 }
  0x4f   : > { %743 = vmatmul.mubr.bf16.gmra.mrb[16].mxu0 %v461_v22 }
  0x50   : > { %750 = vmatprep.mubr.bf16.mxu0 %v465_v24 }
  0x51   : > { %2252 = vmatmul.mubr.bf16.gmra.mrb[16].mxu1 %v478_v25 }
  0x57   : > { %751 = vmatmul.mubr.bf16.gmra.mrb[20].mxu0 %v464_v30 }
  0x58   : > { %758 = vmatprep.mubr.bf16.mxu0 %v468_v31 }
  0x5f   : > { %759 = vmatmul.mubr.bf16.gmra.mrb[24].mxu0 %v467_v36 }
  0x60   : > { %766 = vmatprep.mubr.bf16.mxu0 %v471_v37 }
  0x67   : > { %767 = vmatmul.mubr.bf16.gmra.mrb[28].mxu0 %v470_v42 }
  0x68   : > { %774 = vmatprep.mubr.bf16.mxu0 %v474_v43 }
  0x6f   : > { %775 = vmatmul.mubr.bf16.gmra.mrb[32].mxu0 %v473_v47 }
  0x70   : > { %782 = vmatprep.mubr.bf16.mxu0 %v477_v48 }
  0x77   : > { %783 = vmatmul.mubr.bf16.gmra.mrb[36].mxu0 %v476_v50 }
 0x102   : > { %v2087_v62 = vpop.f32.mrb[0].mxu0 }
 0x103   : > { %v2088_v63 = vpop.f32.mrb[1].mxu0 }
 0x104   : > { %v2089_v1 = vadd.f32 %v2088_v63, %v2087_v62  ;;  %v2090_v2 = vpop.f32.mrb[2].mxu0  ;;  %v2237_v4 = vpop.f32.mrb[0].mxu1 }
 0x105   : > { %v2091_v3 = vpop.f32.mrb[3].mxu0  ;;  %v824_v7 = vpop.f32.mrb[1].mxu1 }
 0x106   : > { %v2092_v5 = vadd.f32 %v2091_v3, %v2090_v2  ;;  %v713_v6 = vadd.f32 %v2089_v1, %v2850_v0  ;;  %v2238_v8 = vpop.f32.mrb[2].mxu1 }
 0x107   : > { %v827_v11 = vpop.f32.mrb[3].mxu1 }
 0x108   : > { %v825_v9 = vadd.f32 %v824_v7, %v713_v6  ;;  %v716_v10 = vadd.f32 %v2092_v5, %v2850_v0 }
 0x10a   : > { %v902_v12 = vmul.f32 0.01, %v825_v9  ;;  %v828_v13 = vadd.f32 %v827_v11, %v716_v10  ;;  %v2093_v14 = vpop.f32.mrb[4].mxu0 }
 0x10b   : > { %v2094_v15 = vpop.f32.mrb[5].mxu0 }
 0x10c   : > { %v903_v16 = vmul.f32 0.01, %v828_v13  ;;  %v2095_v17 = vadd.f32 %v2094_v15, %v2093_v14  ;;  %v2096_v18 = vpop.f32.mrb[6].mxu0  ;;  %v2241_v20 = vpop.f32.mrb[4].mxu1  ;;  %v921_v21 = vmax.f32 %v825_v9, %v902_v12 }
 0x10d   : > { %v2097_v19 = vpop.f32.mrb[7].mxu0  ;;  %v840_v25 = vpop.f32.mrb[5].mxu1 }
 0x10e   : > { %v922_v22 = vmax.f32 %v828_v13, %v903_v16  ;;  %v721_v23 = vadd.f32 %v2095_v17, %v2850_v0  ;;  %v2098_v24 = vadd.f32 %v2097_v19, %v2096_v18  ;;  %v2242_v26 = vpop.f32.mrb[6].mxu1 }
 0x10f   : > { %v843_v30 = vpop.f32.mrb[7].mxu1 }
 0x110   : > { %v833_v27 = vadd.f32 %v2237_v4, %v721_v23  ;;  %v724_v28 = vadd.f32 %v2098_v24, %v2850_v0  ;;  %v940_v29 = vpack.c.bf16 %v922_v22, %v921_v21 }
 0x112   : > { %v904_v31 = vmul.f32 0.01, %v833_v27  ;;  %v836_v32 = vadd.f32 %v2238_v8, %v724_v28  ;;  %v2099_v33 = vpop.f32.mrb[8].mxu0  ;;  %2271 = vmatprep.mubr.bf16.mxu1 %v940_v29 }
 0x113   : > { %v2100_v34 = vpop.f32.mrb[9].mxu0 }
 0x114   : > { %v905_v35 = vmul.f32 0.01, %v836_v32  ;;  %v2101_v36 = vadd.f32 %v2100_v34, %v2099_v33  ;;  %v2102_v37 = vpop.f32.mrb[10].mxu0  ;;  %v2856_v39 = vpop.f32.mrb[8].mxu1  ;;  %v923_v40 = vmax.f32 %v833_v27, %v904_v31 }
 0x115   : > { %v2103_v38 = vpop.f32.mrb[11].mxu0  ;;  %v856_v44 = vpop.f32.mrb[9].mxu1 }
 0x116   : > { %v924_v41 = vmax.f32 %v836_v32, %v905_v35  ;;  %v2104_v42 = vadd.f32 %v2103_v38, %v2102_v37  ;;  %v729_v43 = vadd.f32 %v2101_v36, %v2850_v0  ;;  %v2246_v45 = vpop.f32.mrb[10].mxu1 }
 0x117   : > { %v859_v49 = vpop.f32.mrb[11].mxu1 }
 0x118   : > { %v941_v46 = vpack.c.bf16 %v924_v41, %v923_v40  ;;  %v841_v47 = vadd.f32 %v840_v25, %v729_v43  ;;  %v732_v48 = vadd.f32 %v2104_v42, %v2850_v0 }
 0x11a   : > { %v906_v50 = vmul.f32 0.01, %v841_v47  ;;  %v844_v51 = vadd.f32 %v843_v30, %v732_v48  ;;  %v2105_v52 = vpop.f32.mrb[12].mxu0  ;;  %2272 = vmatmul.mubr.bf16.vlgmr.msra.gmra.mrb[20].mxu1 %v941_v46 }
 0x11b   : > { %v2106_v53 = vpop.f32.mrb[13].mxu0 }
 0x11c   : > { %v907_v54 = vmul.f32 0.01, %v844_v51  ;;  %v2107_v55 = vadd.f32 %v2106_v53, %v2105_v52  ;;  %v2108_v56 = vpop.f32.mrb[14].mxu0  ;;  %v2860_v58 = vpop.f32.mrb[12].mxu1  ;;  %v925_v59 = vmax.f32 %v841_v47, %v906_v50 }
 0x11d   : > { %v2109_v57 = vpop.f32.mrb[15].mxu0  ;;  %v872_v63 = vpop.f32.mrb[13].mxu1 }
 0x11e   : > { %v926_v60 = vmax.f32 %v844_v51, %v907_v54  ;;  %v737_v61 = vadd.f32 %v2107_v55, %v2850_v0  ;;  %v2110_v62 = vadd.f32 %v2109_v57, %v2108_v56  ;;  %v2863_v1 = vpop.f32.mrb[14].mxu1 }
 0x11f   : > { %v875_v5 = vpop.f32.mrb[15].mxu1 }
 0x120   : > { %v849_v2 = vadd.f32 %v2241_v20, %v737_v61  ;;  %v740_v3 = vadd.f32 %v2110_v62, %v2850_v0  ;;  %v942_v4 = vpack.c.bf16 %v926_v60, %v925_v59 }
 0x122   : > { %v908_v6 = vmul.f32 0.01, %v849_v2  ;;  %v852_v7 = vadd.f32 %v2242_v26, %v740_v3  ;;  %v2111_v8 = vpop.f32.mrb[16].mxu0  ;;  %2275 = vmatprep.mubr.bf16.mxu1 %v942_v4 }
 0x123   : > { %v2112_v9 = vpop.f32.mrb[17].mxu0 }
 0x124   : > { %v909_v10 = vmul.f32 0.01, %v852_v7  ;;  %v2113_v11 = vadd.f32 %v2112_v9, %v2111_v8  ;;  %v2114_v12 = vpop.f32.mrb[18].mxu0  ;;  %v2866_v14 = vpop.f32.mrb[16].mxu1  ;;  %v927_v17 = vmax.f32 %v849_v2, %v908_v6 }
 0x125   : > { %v2115_v13 = vpop.f32.mrb[19].mxu0  ;;  %v2869_v19 = vpop.f32.mrb[17].mxu1 }
 0x126   : > { %v2116_v15 = vadd.f32 %v2115_v13, %v2114_v12  ;;  %v745_v16 = vadd.f32 %v2113_v11, %v2850_v0  ;;  %v928_v18 = vmax.f32 %v852_v7, %v909_v10  ;;  %v2254_v20 = vpop.f32.mrb[18].mxu1 }
 0x127   : > { %v2872_v24 = vpop.f32.mrb[19].mxu1 }
 0x128   : > { %v857_v21 = vadd.f32 %v856_v44, %v745_v16  ;;  %v748_v22 = vadd.f32 %v2116_v15, %v2850_v0  ;;  %v943_v23 = vpack.c.bf16 %v928_v18, %v927_v17 }
 0x12a   : > { %v910_v25 = vmul.f32 0.01, %v857_v21  ;;  %v860_v26 = vadd.f32 %v859_v49, %v748_v22  ;;  %v2117_v27 = vpop.f32.mrb[20].mxu0  ;;  %2276 = vmatmul.mubr.bf16.gmra.mrb[24].mxu1 %v943_v23 }
 0x12b   : > { %v2118_v28 = vpop.f32.mrb[21].mxu0 }
 0x12c   : > { %v911_v29 = vmul.f32 0.01, %v860_v26  ;;  %v2119_v30 = vadd.f32 %v2118_v28, %v2117_v27  ;;  %v2120_v31 = vpop.f32.mrb[22].mxu0  ;;  %v929_v33 = vmax.f32 %v857_v21, %v910_v25 }
 0x12d   : > { %v2121_v32 = vpop.f32.mrb[23].mxu0 }
 0x12e   : > { %v930_v34 = vmax.f32 %v860_v26, %v911_v29  ;;  %v753_v35 = vadd.f32 %v2119_v30, %v2850_v0  ;;  %v2122_v36 = vadd.f32 %v2121_v32, %v2120_v31 }
 0x130   : > { %v865_v37 = vadd.f32 %v2856_v39, %v753_v35  ;;  %v756_v38 = vadd.f32 %v2122_v36, %v2850_v0  ;;  %v944_v40 = vpack.c.bf16 %v930_v34, %v929_v33 }
 0x132   : > { %v912_v41 = vmul.f32 0.01, %v865_v37  ;;  %v868_v42 = vadd.f32 %v2246_v45, %v756_v38  ;;  %v2123_v43 = vpop.f32.mrb[24].mxu0  ;;  %2279 = vmatprep.mubr.bf16.mxu1 %v944_v40 }
 0x133   : > { %v2124_v44 = vpop.f32.mrb[25].mxu0 }
 0x134   : > { %v913_v46 = vmul.f32 0.01, %v868_v42  ;;  %v2125_v47 = vadd.f32 %v2124_v44, %v2123_v43  ;;  %v2126_v48 = vpop.f32.mrb[26].mxu0  ;;  %v931_v52 = vmax.f32 %v865_v37, %v912_v41  ;;  %v2446_v41 = vld [vmem:[%s3306_s7] sm:$0xff]   ;;  %v2451_v44 = vld [vmem:[%s3306_s7 + $0x28] sm:$0xff]  }
 0x135   : > { %v2127_v49 = vpop.f32.mrb[27].mxu0  ;;  %2327 = vmatprep.subr.bf16.mxu1 %v2446_v41  ;;  %v2450_v43 = vld [vmem:[%s3306_s7 + $0x20] sm:$0xff]  }
 0x136   : > { %v2128_v50 = vadd.f32 %v2127_v49, %v2126_v48  ;;  %v761_v51 = vadd.f32 %v2125_v47, %v2850_v0  ;;  %v932_v53 = vmax.f32 %v868_v42, %v913_v46  ;;  %2328 = vmatpush3.bf16.msra.mxu1 %v2446_v41  ;;  %v2449_v42 = vld [vmem:[%s3306_s7 + $0x18] sm:$0xff]   ;;  %v2913_v46 = vld [vmem:[%s3303_s4] ss:$0 sm:$0xff] }
 0x138   : > { %v873_v54 = vadd.f32 %v872_v63, %v761_v51  ;;  %v764_v39 = vadd.f32 %v2128_v50, %v2850_v0  ;;  %v945_v55 = vpack.c.bf16 %v932_v53, %v931_v52 }
 0x13a   : > { %v914_v56 = vmul.f32 0.01, %v873_v54  ;;  %v876_v57 = vadd.f32 %v875_v5, %v764_v39  ;;  %v2129_v59 = vpop.f32.mrb[28].mxu0  ;;  %2280 = vmatmul.mubr.bf16.gmra.mrb[28].mxu1 %v945_v55 }
 0x13b   : > { %v2130_v45 = vpop.f32.mrb[29].mxu0 }
 0x13c   : > { %v915_v60 = vmul.f32 0.01, %v876_v57  ;;  %v2131_v61 = vadd.f32 %v2130_v45, %v2129_v59  ;;  %v2132_v62 = vpop.f32.mrb[30].mxu0  ;;  %v933_v3 = vmax.f32 %v873_v54, %v914_v56 }
 0x13d   : > { %v2133_v2 = vpop.f32.mrb[31].mxu0 }
 0x13e   : > { %v934_v4 = vmax.f32 %v876_v57, %v915_v60  ;;  %v769_v6 = vadd.f32 %v2131_v61, %v2850_v0  ;;  %v2134_v7 = vadd.f32 %v2133_v2, %v2132_v62 }
 0x140   : > { %v881_v8 = vadd.f32 %v2860_v58, %v769_v6  ;;  %v772_v63 = vadd.f32 %v2134_v7, %v2850_v0  ;;  %v946_v9 = vpack.c.bf16 %v934_v4, %v933_v3 }
 0x142   : > { %v916_v10 = vmul.f32 0.01, %v881_v8  ;;  %v884_v5 = vadd.f32 %v2863_v1, %v772_v63  ;;  %v2135_v11 = vpop.f32.mrb[32].mxu0  ;;  %2283 = vmatprep.mubr.bf16.mxu1 %v946_v9 }
 0x143   : > { %v2136_v12 = vpop.f32.mrb[33].mxu0 }
 0x144   : > { %v917_v13 = vmul.f32 0.01, %v884_v5  ;;  %v2137_v15 = vadd.f32 %v2136_v12, %v2135_v11  ;;  %v2138_v16 = vpop.f32.mrb[34].mxu0  ;;  %v935_v21 = vmax.f32 %v881_v8, %v916_v10 }
 0x145   : > { %v2139_v17 = vpop.f32.mrb[35].mxu0 }
 0x146   : > { %v2140_v18 = vadd.f32 %v2139_v17, %v2138_v16  ;;  %v777_v20 = vadd.f32 %v2137_v15, %v2850_v0  ;;  %v936_v22 = vmax.f32 %v884_v5, %v917_v13 }
 0x148   : > { %v889_v58 = vadd.f32 %v2869_v19, %v777_v20  ;;  %v780_v23 = vadd.f32 %v2140_v18, %v2850_v0  ;;  %v947_v25 = vpack.c.bf16 %v936_v22, %v935_v21 }
 0x14a   : > { %v918_v26 = vmul.f32 0.01, %v889_v58  ;;  %v892_v1 = vadd.f32 %v2872_v24, %v780_v23  ;;  %v2141_v27 = vpop.f32.mrb[36].mxu0  ;;  %2284 = vmatmul.mubr.bf16.gmra.mrb[32].mxu1 %v947_v25  ;;  %v2445_v24 = vld [vmem:[%s3304_s5 + $0x38] sm:$0xff]  }
 0x14b   : > { %v2142_v28 = vpop.f32.mrb[37].mxu0  ;;  %2305 = vmatprep.subr.bf16.mxu0 %v2445_v24 }
 0x14c   : > { %v919_v29 = vmul.f32 0.01, %v892_v1  ;;  %v2143_v30 = vadd.f32 %v2142_v28, %v2141_v27  ;;  %v2144_v31 = vpop.f32.mrb[38].mxu0  ;;  %v937_v33 = vmax.f32 %v889_v58, %v918_v26  ;;  %2306 = vmatpush3.bf16.msra.mxu0 %v2445_v24 }
 0x14d   : > { %v2145_v32 = vpop.f32.mrb[39].mxu0 }
 0x14e   : > { %v938_v34 = vmax.f32 %v892_v1, %v919_v29  ;;  %v785_v35 = vadd.f32 %v2143_v30, %v2850_v0  ;;  %v2447_v0 = vld [vmem:[%s3306_s7 + $0x8] sm:$0xff]  }
 0x14f   : > { %2329 = vmatprep.subr.bf16.mxu1 %v2447_v0 }
 0x150   : > { %v897_v36 = vadd.f32 %v2866_v14, %v785_v35  ;;  %v948_v19 = vpack.c.bf16 %v938_v34, %v937_v33  ;;  %v2448_v14 = vld [vmem:[%s3306_s7 + $0x10] sm:$0xff]   ;;  %2330 = vmatpush3.bf16.msra.mxu1 %v2447_v0 }
 0x151   : > { %2331 = vmatprep.subr.bf16.mxu1 %v2448_v14 }
 0x152   : > { %2287 = vmatprep.mubr.bf16.mxu1 %v948_v19  ;;  %v920_v37 = vmul.f32 0.01, %v897_v36 }
 0x154   : > { %v939_v38 = vmax.f32 %v897_v36, %v920_v37  ;;  %2332 = vmatpush3.bf16.msra.mxu1 %v2448_v14 }
 0x155   : > { %2333 = vmatprep.subr.bf16.mxu1 %v2449_v42 }
 0x156   : > { %v949_v40 = vpack.c.bf16 %v939_v38, %v939_v38 }
 0x158   : > { %2288 = vmatmul.mubr.bf16.gmra.mrb[36].mxu1 %v949_v40 }
 0x159   : > { %2334 = vmatpush3.bf16.msra.mxu1 %v2449_v42 }
 0x15a   : > { %2335 = vmatprep.subr.bf16.mxu1 %v2450_v43 }
 0x15d   : > { %2336 = vmatpush3.bf16.msra.mxu1 %v2450_v43 }
 0x15e   : > { %2337 = vmatprep.subr.bf16.mxu1 %v2451_v44 }
 0x161   : > { %2338 = vmatpush3.bf16.msra.mxu1 %v2451_v44 }
 0x1ed   : > { %v2273_v47 = vpop.f32.mrb[20].mxu1 }
 0x1ee   : > { %v1064_v48 = vadd.f32 %v2273_v47, %v2913_v46  ;;  %v1055_v49 = vpop.f32.mrb[21].mxu1 }
 0x1ef   : > { %v1056_v50 = vadd.f32 %v2913_v46, %v1055_v49  ;;  %v2274_v51 = vpop.f32.mrb[22].mxu1 }
 0x1f0   : > { %v1135_v52 = vmul.f32 0.01, %v1064_v48  ;;  %v1067_v53 = vadd.f32 %v2274_v51, %v2913_v46  ;;  %v1058_v54 = vpop.f32.mrb[23].mxu1 }
 0x1f1   : > { %v1133_v39 = vmul.f32 0.01, %v1056_v50  ;;  %v1059_v55 = vadd.f32 %v2913_v46, %v1058_v54 }
 0x1f2   : > { %v1136_v56 = vmul.f32 0.01, %v1067_v53  ;;  %v1154_v59 = vmax.f32 %v1064_v48, %v1135_v52 }
 0x1f3   : > { %v1134_v57 = vmul.f32 0.01, %v1059_v55  ;;  %v1152_v60 = vmax.f32 %v1056_v50, %v1133_v39 }
 0x1f4   : > { %v1155_v45 = vmax.f32 %v1067_v53, %v1136_v56 }
 0x1f5   : > { %v1153_v61 = vmax.f32 %v1059_v55, %v1134_v57 }
 0x1f6   : > { %v1172_v62 = vpack.c.bf16 %v1155_v45, %v1154_v59 }
 0x1f7   : > { %v1171_v2 = vpack.c.bf16 %v1153_v61, %v1152_v60 }
 0x1f9   : > { %2307 = vmatprep.mubr.bf16.mxu0 %v1171_v2 }
 0x1fa   : > { %2308 = vmatmul.mubr.bf16.vlgmr.msra.gmra.mrb[40].mxu0 %v1172_v62 }
 0x1fd   : > { %v2277_v3 = vpop.f32.mrb[24].mxu1 }
 0x1fe   : > { %v1080_v4 = vadd.f32 %v2277_v3, %v2913_v46  ;;  %v1071_v6 = vpop.f32.mrb[25].mxu1 }
 0x1ff   : > { %v1072_v7 = vadd.f32 %v2913_v46, %v1071_v6  ;;  %v2278_v8 = vpop.f32.mrb[26].mxu1 }
 0x200   : > { %v1139_v63 = vmul.f32 0.01, %v1080_v4  ;;  %v1083_v9 = vadd.f32 %v2278_v8, %v2913_v46  ;;  %v1074_v10 = vpop.f32.mrb[27].mxu1 }
 0x201   : > { %v1137_v5 = vmul.f32 0.01, %v1072_v7  ;;  %v1075_v11 = vadd.f32 %v2913_v46, %v1074_v10  ;;  %v2453_v10 = vld [vmem:[%s3306_s7 + $0x38] sm:$0xff]  }
 0x202   : > { %v1140_v12 = vmul.f32 0.01, %v1083_v9  ;;  %v1158_v15 = vmax.f32 %v1080_v4, %v1139_v63 }
 0x203   : > { %v1138_v13 = vmul.f32 0.01, %v1075_v11  ;;  %v1156_v17 = vmax.f32 %v1072_v7, %v1137_v5 }
 0x204   : > { %v1159_v16 = vmax.f32 %v1083_v9, %v1140_v12  ;;  %v2452_v9 = vld [vmem:[%s3306_s7 + $0x30] sm:$0xff]  }
 0x205   : > { %v1157_v18 = vmax.f32 %v1075_v11, %v1138_v13  ;;  %2339 = vmatprep.subr.bf16.mxu1 %v2452_v9 }
 0x206   : > { %v1174_v20 = vpack.c.bf16 %v1159_v16, %v1158_v15  ;;  %2340 = vmatpush3.bf16.msra.mxu1 %v2452_v9 }
 0x207   : > { %v1173_v21 = vpack.c.bf16 %v1157_v18, %v1156_v17  ;;  %2341 = vmatprep.subr.bf16.mxu1 %v2453_v10 }
 0x209   : > { %2311 = vmatprep.mubr.bf16.mxu0 %v1173_v21 }
 0x20a   : > { %2312 = vmatmul.mubr.bf16.gmra.mrb[44].mxu0 %v1174_v20  ;;  %2342 = vmatpush3.bf16.msra.mxu1 %v2453_v10 }
 0x20d   : > { %v2281_v22 = vpop.f32.mrb[28].mxu1 }
 0x20e   : > { %v1096_v58 = vadd.f32 %v2281_v22, %v2913_v46  ;;  %v1087_v23 = vpop.f32.mrb[29].mxu1 }
 0x20f   : > { %v1088_v25 = vadd.f32 %v2913_v46, %v1087_v23  ;;  %v2282_v26 = vpop.f32.mrb[30].mxu1 }
 0x210   : > { %v1143_v1 = vmul.f32 0.01, %v1096_v58  ;;  %v1099_v27 = vadd.f32 %v2282_v26, %v2913_v46  ;;  %v1090_v28 = vpop.f32.mrb[31].mxu1 }
 0x211   : > { %v1141_v29 = vmul.f32 0.01, %v1088_v25  ;;  %v1091_v30 = vadd.f32 %v2913_v46, %v1090_v28 }
 0x212   : > { %v1144_v31 = vmul.f32 0.01, %v1099_v27  ;;  %v1162_v33 = vmax.f32 %v1096_v58, %v1143_v1 }
 0x213   : > { %v1142_v32 = vmul.f32 0.01, %v1091_v30  ;;  %v1160_v35 = vmax.f32 %v1088_v25, %v1141_v29 }
 0x214   : > { %v1163_v34 = vmax.f32 %v1099_v27, %v1144_v31 }
 0x215   : > { %v1161_v36 = vmax.f32 %v1091_v30, %v1142_v32 }
 0x216   : > { %v1176_v19 = vpack.c.bf16 %v1163_v34, %v1162_v33 }
 0x217   : > { %v1175_v37 = vpack.c.bf16 %v1161_v36, %v1160_v35 }
 0x219   : > { %2315 = vmatprep.mubr.bf16.mxu0 %v1175_v37 }
 0x21a   : > { %2316 = vmatmul.mubr.bf16.gmra.mrb[48].mxu0 %v1176_v19 }
 0x21d   : > { %v2285_v38 = vpop.f32.mrb[32].mxu1 }
 0x21e   : > { %v1112_v40 = vadd.f32 %v2285_v38, %v2913_v46  ;;  %v1103_v24 = vpop.f32.mrb[33].mxu1 }
 0x21f   : > { %v1104_v41 = vadd.f32 %v2913_v46, %v1103_v24  ;;  %v2286_v0 = vpop.f32.mrb[34].mxu1 }
 0x220   : > { %v1147_v14 = vmul.f32 0.01, %v1112_v40  ;;  %v1115_v42 = vadd.f32 %v2286_v0, %v2913_v46  ;;  %v1106_v43 = vpop.f32.mrb[35].mxu1 }
 0x221   : > { %v1145_v44 = vmul.f32 0.01, %v1104_v41  ;;  %v1107_v47 = vadd.f32 %v2913_v46, %v1106_v43 }
 0x222   : > { %v1148_v48 = vmul.f32 0.01, %v1115_v42  ;;  %v1166_v50 = vmax.f32 %v1112_v40, %v1147_v14 }
 0x223   : > { %v1146_v49 = vmul.f32 0.01, %v1107_v47  ;;  %v1164_v52 = vmax.f32 %v1104_v41, %v1145_v44 }
 0x224   : > { %v1167_v51 = vmax.f32 %v1115_v42, %v1148_v48 }
 0x225   : > { %v1165_v53 = vmax.f32 %v1107_v47, %v1146_v49 }
 0x226   : > { %v1178_v54 = vpack.c.bf16 %v1167_v51, %v1166_v50 }
 0x227   : > { %v1177_v39 = vpack.c.bf16 %v1165_v53, %v1164_v52 }
 0x229   : > { %2319 = vmatprep.mubr.bf16.mxu0 %v1177_v39 }
 0x22a   : > { %2320 = vmatmul.mubr.bf16.gmra.mrb[52].mxu0 %v1178_v54 }
 0x22b   : > { %v2289_v55 = vpop.f32.mrb[36].mxu1 }
 0x22c   : > { %v1128_v56 = vadd.f32 %v2289_v55, %v2913_v46  ;;  %v1119_v57 = vpop.f32.mrb[37].mxu1 }
 0x22d   : > { %v1120_v59 = vadd.f32 %v2913_v46, %v1119_v57  ;;  %v2290_v45 = vpop.f32.mrb[38].mxu1 }
 0x22e   : > { %v1151_v60 = vmul.f32 0.01, %v1128_v56  ;;  %v1122_v61 = vpop.f32.mrb[39].mxu1 }
 0x22f   : > { %v1149_v62 = vmul.f32 0.01, %v1120_v59  ;;  %v1123_v2 = vadd.f32 %v2913_v46, %v1122_v61  ;;  %v2943_v46 = vld [vmem:[%s3305_s6] ss:$0 sm:$0xff] }
 0x230   : > { %v1170_v4 = vmax.f32 %v1128_v56, %v1151_v60 }
 0x231   : > { %v1150_v3 = vmul.f32 0.01, %v1123_v2  ;;  %v1168_v6 = vmax.f32 %v1120_v59, %v1149_v62 }
 0x232   : > { %v1180_v63 = vpack.c.bf16 %v1170_v4, %v1170_v4 }
 0x233   : > { %v1169_v7 = vmax.f32 %v1123_v2, %v1150_v3 }
 0x235   : > { %v1179_v8 = vpack.c.bf16 %v1169_v7, %v1168_v6 }
 0x237   : > { %2323 = vmatprep.mubr.bf16.mxu0 %v1179_v8 }
 0x238   : > { %2324 = vmatmul.mubr.bf16.gmra.mrb[56].mxu0 %v1180_v63 }
 0x2cd   : > { %v2309_v5 = vpop.f32.mrb[40].mxu0 }
 0x2ce   : > { %v1295_v11 = vadd.f32 %v2309_v5, %v2943_v46  ;;  %v1286_v12 = vpop.f32.mrb[41].mxu0 }
 0x2cf   : > { %v1287_v13 = vadd.f32 %v2943_v46, %v1286_v12  ;;  %v2310_v15 = vpop.f32.mrb[42].mxu0 }
 0x2d0   : > { %v1366_v16 = vmul.f32 0.01, %v1295_v11  ;;  %v1298_v17 = vadd.f32 %v2310_v15, %v2943_v46  ;;  %v1289_v18 = vpop.f32.mrb[43].mxu0 }
 0x2d1   : > { %v1364_v20 = vmul.f32 0.01, %v1287_v13  ;;  %v1290_v21 = vadd.f32 %v2943_v46, %v1289_v18 }
 0x2d2   : > { %v1367_v22 = vmul.f32 0.01, %v1298_v17  ;;  %v1385_v23 = vmax.f32 %v1295_v11, %v1366_v16 }
 0x2d3   : > { %v1365_v58 = vmul.f32 0.01, %v1290_v21  ;;  %v1383_v26 = vmax.f32 %v1287_v13, %v1364_v20 }
 0x2d4   : > { %v1386_v25 = vmax.f32 %v1298_v17, %v1367_v22 }
 0x2d5   : > { %v1384_v1 = vmax.f32 %v1290_v21, %v1365_v58 }
 0x2d6   : > { %v1403_v27 = vpack.c.bf16 %v1386_v25, %v1385_v23 }
 0x2d7   : > { %v1402_v28 = vpack.c.bf16 %v1384_v1, %v1383_v26 }
 0x2d9   : > { %2343 = vmatprep.mubr.bf16.mxu1 %v1402_v28 }
 0x2da   : > { %2344 = vmatmul.mubr.bf16.vlgmr.msra.gmra.mrb[40].mxu1 %v1403_v27 }
 0x2dd   : > { %v2313_v29 = vpop.f32.mrb[44].mxu0 }
 0x2de   : > { %v1311_v30 = vadd.f32 %v2313_v29, %v2943_v46  ;;  %v1302_v31 = vpop.f32.mrb[45].mxu0 }
 0x2df   : > { %v1303_v32 = vadd.f32 %v2943_v46, %v1302_v31  ;;  %v2314_v33 = vpop.f32.mrb[46].mxu0 }
 0x2e0   : > { %v1370_v34 = vmul.f32 0.01, %v1311_v30  ;;  %v1314_v35 = vadd.f32 %v2314_v33, %v2943_v46  ;;  %v1305_v36 = vpop.f32.mrb[47].mxu0 }
 0x2e1   : > { %v1368_v19 = vmul.f32 0.01, %v1303_v32  ;;  %v1306_v37 = vadd.f32 %v2943_v46, %v1305_v36 }
 0x2e2   : > { %v1371_v38 = vmul.f32 0.01, %v1314_v35  ;;  %v1389_v24 = vmax.f32 %v1311_v30, %v1370_v34 }
 0x2e3   : > { %v1369_v40 = vmul.f32 0.01, %v1306_v37  ;;  %v1387_v0 = vmax.f32 %v1303_v32, %v1368_v19 }
 0x2e4   : > { %v1390_v41 = vmax.f32 %v1314_v35, %v1371_v38  ;;  %v2967_v35 = vld [vmem:[%s3307_s8] ss:$0 sm:$0xff] }
 0x2e5   : > { %v1388_v14 = vmax.f32 %v1306_v37, %v1369_v40 }
 0x2e6   : > { %v1405_v42 = vpack.c.bf16 %v1390_v41, %v1389_v24 }
 0x2e7   : > { %v1404_v43 = vpack.c.bf16 %v1388_v14, %v1387_v0 }
 0x2e9   : > { %2347 = vmatprep.mubr.bf16.mxu1 %v1404_v43 }
 0x2ea   : > { %2348 = vmatmul.mubr.bf16.gmra.mrb[44].mxu1 %v1405_v42 }
 0x2ed   : > { %v2317_v44 = vpop.f32.mrb[48].mxu0 }
 0x2ee   : > { %v1327_v47 = vadd.f32 %v2317_v44, %v2943_v46  ;;  %v1318_v48 = vpop.f32.mrb[49].mxu0 }
 0x2ef   : > { %v1319_v49 = vadd.f32 %v2943_v46, %v1318_v48  ;;  %v2318_v50 = vpop.f32.mrb[50].mxu0 }
 0x2f0   : > { %v1374_v51 = vmul.f32 0.01, %v1327_v47  ;;  %v1330_v52 = vadd.f32 %v2318_v50, %v2943_v46  ;;  %v1321_v53 = vpop.f32.mrb[51].mxu0 }
 0x2f1   : > { %v1372_v54 = vmul.f32 0.01, %v1319_v49  ;;  %v1322_v39 = vadd.f32 %v2943_v46, %v1321_v53 }
 0x2f2   : > { %v1375_v55 = vmul.f32 0.01, %v1330_v52  ;;  %v1393_v57 = vmax.f32 %v1327_v47, %v1374_v51 }
 0x2f3   : > { %v1373_v56 = vmul.f32 0.01, %v1322_v39  ;;  %v1391_v45 = vmax.f32 %v1319_v49, %v1372_v54 }
 0x2f4   : > { %v1394_v59 = vmax.f32 %v1330_v52, %v1375_v55 }
 0x2f5   : > { %v1392_v60 = vmax.f32 %v1322_v39, %v1373_v56 }
 0x2f6   : > { %v1407_v61 = vpack.c.bf16 %v1394_v59, %v1393_v57 }
 0x2f7   : > { %v1406_v62 = vpack.c.bf16 %v1392_v60, %v1391_v45 }
 0x2f9   : > { %2351 = vmatprep.mubr.bf16.mxu1 %v1406_v62 }
 0x2fa   : > { %2352 = vmatmul.mubr.bf16.gmra.mrb[48].mxu1 %v1407_v61 }
 0x2fd   : > { %v2321_v2 = vpop.f32.mrb[52].mxu0 }
 0x2fe   : > { %v1343_v3 = vadd.f32 %v2321_v2, %v2943_v46  ;;  %v1334_v4 = vpop.f32.mrb[53].mxu0 }
 0x2ff   : > { %v1335_v6 = vadd.f32 %v2943_v46, %v1334_v4  ;;  %v2322_v7 = vpop.f32.mrb[54].mxu0 }
 0x300   : > { %v1378_v8 = vmul.f32 0.01, %v1343_v3  ;;  %v1346_v63 = vadd.f32 %v2322_v7, %v2943_v46  ;;  %v1337_v9 = vpop.f32.mrb[55].mxu0 }
 0x301   : > { %v1376_v10 = vmul.f32 0.01, %v1335_v6  ;;  %v1338_v5 = vadd.f32 %v2943_v46, %v1337_v9 }
 0x302   : > { %v1379_v11 = vmul.f32 0.01, %v1346_v63  ;;  %v1397_v13 = vmax.f32 %v1343_v3, %v1378_v8 }
 0x303   : > { %v1377_v12 = vmul.f32 0.01, %v1338_v5  ;;  %v1395_v16 = vmax.f32 %v1335_v6, %v1376_v10 }
 0x304   : > { %v1398_v15 = vmax.f32 %v1346_v63, %v1379_v11 }
 0x305   : > { %v1396_v17 = vmax.f32 %v1338_v5, %v1377_v12 }
 0x306   : > { %v1409_v18 = vpack.c.bf16 %v1398_v15, %v1397_v13 }
 0x307   : > { %v1408_v20 = vpack.c.bf16 %v1396_v17, %v1395_v16 }
 0x309   : > { %2355 = vmatprep.mubr.bf16.mxu1 %v1408_v20 }
 0x30a   : > { %2356 = vmatmul.mubr.bf16.gmra.mrb[52].mxu1 %v1409_v18 }
 0x30b   : > { %v2325_v21 = vpop.f32.mrb[56].mxu0 }
 0x30c   : > { %v1359_v22 = vadd.f32 %v2325_v21, %v2943_v46  ;;  %v1350_v58 = vpop.f32.mrb[57].mxu0 }
 0x30d   : > { %v1351_v23 = vadd.f32 %v2943_v46, %v1350_v58  ;;  %v2326_v25 = vpop.f32.mrb[58].mxu0 }
 0x30e   : > { %v1382_v26 = vmul.f32 0.01, %v1359_v22  ;;  %v1353_v1 = vpop.f32.mrb[59].mxu0 }
 0x30f   : > { %v1380_v27 = vmul.f32 0.01, %v1351_v23  ;;  %v1354_v28 = vadd.f32 %v2943_v46, %v1353_v1 }
 0x310   : > { %v1401_v30 = vmax.f32 %v1359_v22, %v1382_v26 }
 0x311   : > { %v1381_v29 = vmul.f32 0.01, %v1354_v28  ;;  %v1399_v31 = vmax.f32 %v1351_v23, %v1380_v27 }
 0x312   : > { %v1411_v34 = vpack.c.bf16 %v1401_v30, %v1401_v30 }
 0x313   : > { %v1400_v32 = vmax.f32 %v1354_v28, %v1381_v29 }
 0x315   : > { %v1410_v33 = vpack.c.bf16 %v1400_v32, %v1399_v31 }
 0x317   : > { %2359 = vmatprep.mubr.bf16.mxu1 %v1410_v33 }
 0x318   : > { %2360 = vmatmul.mubr.bf16.gmra.mrb[56].mxu1 %v1411_v34 }
 0x3ad   : > { %v2345_v36 = vpop.f32.mrb[40].mxu1 }
 0x3ae   : > { %v2970_v19 = vadd.f32 %v2345_v36, %v2967_v35  ;;  %v1517_v37 = vpop.f32.mrb[41].mxu1 }
 0x3af   : > { %v2973_v46 = vadd.f32 %v2967_v35, %v1517_v37  ;;  %v2346_v38 = vpop.f32.mrb[42].mxu1 }
 0x3b0   : > { %1599 = vadd.xlane.f32.xlu1 %v2970_v19  ;;  %v1520_v40 = vpop.f32.mrb[43].mxu1  ;;  %v2978_v24 = vadd.f32 %v2346_v38, %v2967_v35  ;;  %v1635_v0 = vmul.f32 %v2970_v19, %v2970_v19 }
 0x3b1   : > { %1595 = vadd.xlane.f32.xlu0 %v2973_v46  ;;  %v2981_v41 = vadd.f32 %v2967_v35, %v1520_v40  ;;  %v1633_v42 = vmul.f32 %v2973_v46, %v2973_v46 }
 0x3b2   : > { %v1636_v14 = vmul.f32 %v2978_v24, %v2978_v24 }
 0x3b3   : > { %v1634_v43 = vmul.f32 %v2981_v41, %v2981_v41 }
 0x3b4   : > { %1601 = vadd.xlane.f32.xlu1 %v2978_v24 }
 0x3b5   : > { %1597 = vadd.xlane.f32.xlu0 %v2981_v41 }
 0x3b8   : > { %1656 = vadd.xlane.f32.xlu1 %v1635_v0 }
 0x3b9   : > { %1658 = vadd.xlane.f32.xlu0 %v1636_v14 }
 0x3bc   : > { %1652 = vadd.xlane.f32.xlu1 %v1633_v42 }
 0x3bd   : > { %v2349_v44 = vpop.f32.mrb[44].mxu1  ;;  %1654 = vadd.xlane.f32.xlu0 %v1634_v43 }
 0x3be   : > { %v2994_v47 = vadd.f32 %v2349_v44, %v2967_v35  ;;  %v1533_v48 = vpop.f32.mrb[45].mxu1 }
 0x3bf   : > { %v2350_v49 = vpop.f32.mrb[46].mxu1  ;;  %v3002_v52 = vadd.f32 %v2967_v35, %v1533_v48 }
 0x3c0   : > { %v2997_v50 = vadd.f32 %v2350_v49, %v2967_v35  ;;  %v1536_v51 = vpop.f32.mrb[47].mxu1  ;;  %v1639_v53 = vmul.f32 %v2994_v47, %v2994_v47 }
 0x3c1   : > { %1607 = vadd.xlane.f32.xlu0 %v2994_v47  ;;  %v3008_v54 = vadd.f32 %v2967_v35, %v1536_v51  ;;  %v1637_v56 = vmul.f32 %v3002_v52, %v3002_v52 }
 0x3c2   : > { %1609 = vadd.xlane.f32.xlu1 %v2997_v50  ;;  %v1640_v39 = vmul.f32 %v2997_v50, %v2997_v50 }
 0x3c3   : > { %v1638_v55 = vmul.f32 %v3008_v54, %v3008_v54 }
 0x3c5   : > { %1603 = vadd.xlane.f32.xlu0 %v3002_v52 }
 0x3c6   : > { %1664 = vadd.xlane.f32.xlu1 %v1639_v53 }
 0x3c9   : > { %1666 = vadd.xlane.f32.xlu0 %v1640_v39 }
 0x3ca   : > { %1605 = vadd.xlane.f32.xlu1 %v3008_v54 }
 0x3cd   : > { %v2353_v57 = vpop.f32.mrb[48].mxu1  ;;  %1662 = vadd.xlane.f32.xlu0 %v1638_v55 }
 0x3ce   : > { %v3018_v59 = vadd.f32 %v2353_v57, %v2967_v35  ;;  %v1549_v45 = vpop.f32.mrb[49].mxu1  ;;  %1660 = vadd.xlane.f32.xlu1 %v1637_v56 }
 0x3cf   : > { %v2354_v60 = vpop.f32.mrb[50].mxu1  ;;  %v3026_v2 = vadd.f32 %v2967_v35, %v1549_v45 }
 0x3d0   : > { %v3021_v61 = vadd.f32 %v2354_v60, %v2967_v35  ;;  %v1552_v62 = vpop.f32.mrb[51].mxu1  ;;  %v1643_v3 = vmul.f32 %v3018_v59, %v3018_v59 }
 0x3d1   : > { %1615 = vadd.xlane.f32.xlu0 %v3018_v59  ;;  %v3032_v4 = vadd.f32 %v2967_v35, %v1552_v62  ;;  %v1641_v8 = vmul.f32 %v3026_v2, %v3026_v2 }
 0x3d2   : > { %1617 = vadd.xlane.f32.xlu1 %v3021_v61  ;;  %v1644_v6 = vmul.f32 %v3021_v61, %v3021_v61 }
 0x3d3   : > { %v1642_v7 = vmul.f32 %v3032_v4, %v3032_v4 }
 0x3d5   : > { %1611 = vadd.xlane.f32.xlu0 %v3026_v2 }
 0x3d6   : > { %1672 = vadd.xlane.f32.xlu1 %v1643_v3 }
 0x3d9   : > { %1674 = vadd.xlane.f32.xlu0 %v1644_v6 }
 0x3da   : > { %1613 = vadd.xlane.f32.xlu1 %v3032_v4 }
 0x3dd   : > { %v2357_v63 = vpop.f32.mrb[52].mxu1  ;;  %1670 = vadd.xlane.f32.xlu0 %v1642_v7 }
 0x3de   : > { %v3042_v9 = vadd.f32 %v2357_v63, %v2967_v35  ;;  %v1565_v10 = vpop.f32.mrb[53].mxu1  ;;  %1668 = vadd.xlane.f32.xlu1 %v1641_v8 }
 0x3df   : > { %v2358_v5 = vpop.f32.mrb[54].mxu1  ;;  %v3050_v13 = vadd.f32 %v2967_v35, %v1565_v10 }
 0x3e0   : > { %v3045_v11 = vadd.f32 %v2358_v5, %v2967_v35  ;;  %v1568_v12 = vpop.f32.mrb[55].mxu1  ;;  %v1647_v15 = vmul.f32 %v3042_v9, %v3042_v9 }
 0x3e1   : > { %1623 = vadd.xlane.f32.xlu0 %v3042_v9  ;;  %v3056_v16 = vadd.f32 %v2967_v35, %v1568_v12  ;;  %v1645_v22 = vmul.f32 %v3050_v13, %v3050_v13 }
 0x3e2   : > { %1625 = vadd.xlane.f32.xlu1 %v3045_v11  ;;  %v1648_v17 = vmul.f32 %v3045_v11, %v3045_v11 }
 0x3e3   : > { %v1646_v20 = vmul.f32 %v3056_v16, %v3056_v16 }
 0x3e5   : > { %1619 = vadd.xlane.f32.xlu0 %v3050_v13 }
 0x3e6   : > { %1680 = vadd.xlane.f32.xlu1 %v1647_v15 }
 0x3e9   : > { %1682 = vadd.xlane.f32.xlu0 %v1648_v17 }
 0x3ea   : > { %1621 = vadd.xlane.f32.xlu1 %v3056_v16 }
 0x3eb   : > { %v2361_v18 = vpop.f32.mrb[56].mxu1 }
 0x3ec   : > { %v1581_v21 = vpop.f32.mrb[57].mxu1  ;;  %v3066_v25 = vadd.f32 %v2361_v18, %v2967_v35 }
 0x3ed   : > { %v2362_v58 = vpop.f32.mrb[58].mxu1  ;;  %1678 = vadd.xlane.f32.xlu0 %v1646_v20  ;;  %v3072_v1 = vadd.f32 %v2967_v35, %v1581_v21 }
 0x3ee   : > { %v1584_v23 = vpop.f32.mrb[59].mxu1  ;;  %1676 = vadd.xlane.f32.xlu1 %v1645_v22  ;;  %v1651_v29 = vmul.f32 %v3066_v25, %v3066_v25 }
 0x3ef   : > { %v3069_v26 = vadd.f32 %v2967_v35, %v1584_v23  ;;  %v1649_v27 = vmul.f32 %v3072_v1, %v3072_v1 }
 0x3f1   : > { %1631 = vadd.xlane.f32.xlu0 %v3066_v25  ;;  %v1650_v28 = vmul.f32 %v3069_v26, %v3069_v26 }
 0x3f2   : > { %1629 = vadd.xlane.f32.xlu1 %v3069_v26 }
 0x3f5   : > { %1627 = vadd.xlane.f32.xlu0 %v3072_v1 }
 0x3f6   : > { %1684 = vadd.xlane.f32.xlu1 %v1649_v27 }
 0x3f9   : > { %1686 = vadd.xlane.f32.xlu0 %v1650_v28 }
 0x3fa   : > { %1688 = vadd.xlane.f32.xlu1 %v1651_v29 }
 0x43d   : > { %v1600_v30 = vpop.xlane.xlu1 %1599 }
 0x43e   : > { %v1596_v31 = vpop.xlane.xlu0 %1595  ;;  %v1692_v33 = vmul.f32 0.0078125, %v1600_v30 }
 0x43f   : > { %v3083_v38 = vmul.f32 0.0078125, %v1596_v31 }
 0x440   : > { %v1730_v37 = vmul.f32 %v1692_v33, %v1692_v33  ;;  %v1825_v27 = vsub.f32 %v2970_v19, %v1692_v33 }
 0x441   : > { %v1602_v32 = vpop.xlane.xlu1 %1601  ;;  %v1728_v51 = vmul.f32 %v3083_v38, %v3083_v38 }
 0x442   : > { %v1598_v34 = vpop.xlane.xlu0 %1597  ;;  %v1693_v35 = vmul.f32 0.0078125, %v1602_v32 }
 0x443   : > { %v3085_v42 = vmul.f32 0.0078125, %v1598_v34  ;;  %v3105_v34 = vld [vmem:[%s3308_s9] ss:$0 sm:$0xff] }
 0x444   : > { %v1731_v14 = vmul.f32 %v1693_v35, %v1693_v35  ;;  %v1826_v32 = vsub.f32 %v2978_v24, %v1693_v35  ;;  %v3120_v24 = vld [vmem:[%s3309_s10] ss:$0 sm:$0xff] }
 0x445   : > { %v1657_v36 = vpop.xlane.xlu1 %1656  ;;  %v1729_v56 = vmul.f32 %v3085_v42, %v3085_v42 }
 0x446   : > { %v1711_v40 = vmul.f32 0.0078125, %v1657_v36  ;;  %v1659_v0 = vpop.xlane.xlu0 %1658 }
 0x447   : > { %v1712_v43 = vmul.f32 0.0078125, %v1659_v0 }
 0x448   : > { %v1749_v44 = vsub.f32 %v1711_v40, %v1730_v37 }
 0x449   : > { %v1750_v48 = vsub.f32 %v1712_v43, %v1731_v14  ;;  %v1653_v49 = vpop.xlane.xlu1 %1652  ;;  %v1823_v14 = vsub.f32 %v2973_v46, %v3083_v38 }
 0x44a   : > { %v1768_v53 = vmax.f32 %v1749_v44, 0.0  ;;  %v1709_v39 = vmul.f32 0.0078125, %v1653_v49  ;;  %v1655_v55 = vpop.xlane.xlu0 %1654  ;;  %v1824_v49 = vsub.f32 %v2981_v41, %v3085_v42 }
 0x44b   : > { %v1769_v57 = vmax.f32 %v1750_v48, 0.0  ;;  %v1710_v45 = vmul.f32 0.0078125, %v1655_v55 }
 0x44c   : > { %v1787_v60 = vadd.f32 1e-05, %v1768_v53  ;;  %v1747_v62 = vsub.f32 %v1709_v39, %v1728_v51 }
 0x44d   : > { %v1788_v3 = vadd.f32 1e-05, %v1769_v57  ;;  %v1748_v6 = vsub.f32 %v1710_v45, %v1729_v56 }
 0x44e   : > { %2454 = vrsqrt.f32 %v1787_v60  ;;  %v1766_v7 = vmax.f32 %v1747_v62, 0.0  ;;  %v1608_v8 = vpop.xlane.xlu0 %1607 }
 0x44f   : > { %2456 = vrsqrt.f32 %v1788_v3  ;;  %v1767_v63 = vmax.f32 %v1748_v6, 0.0  ;;  %v1610_v10 = vpop.xlane.xlu1 %1609  ;;  %v3091_v12 = vmul.f32 0.0078125, %v1608_v8 }
 0x450   : > { %v1785_v5 = vadd.f32 1e-05, %v1766_v7  ;;  %v3093_v18 = vmul.f32 0.0078125, %v1610_v10 }
 0x451   : > { %v1786_v15 = vadd.f32 1e-05, %v1767_v63  ;;  %v1734_v21 = vmul.f32 %v3091_v12, %v3091_v12 }
 0x452   : > { %2458 = vrsqrt.f32 %v1785_v5  ;;  %v1604_v17 = vpop.xlane.xlu0 %1603  ;;  %v1735_v28 = vmul.f32 %v3093_v18, %v3093_v18 }
 0x453   : > { %2460 = vrsqrt.f32 %v1786_v15  ;;  %v1665_v20 = vpop.xlane.xlu1 %1664  ;;  %v3111_v36 = vmul.f32 0.0078125, %v1604_v17 }
 0x454   : > { %v1715_v22 = vmul.f32 0.0078125, %v1665_v20 }
 0x455   : > { %v1732_v56 = vmul.f32 %v3111_v36, %v3111_v36 }
 0x456   : > { %v1753_v58 = vsub.f32 %v1715_v22, %v1734_v21  ;;  %v1667_v23 = vpop.xlane.xlu0 %1666 }
 0x457   : > { %v1716_v29 = vmul.f32 0.0078125, %v1667_v23  ;;  %v1606_v30 = vpop.xlane.xlu1 %1605 }
 0x458   : > { %v2455_v31 = vpop.eup %2454  ;;  %v1772_v37 = vmax.f32 %v1753_v58, 0.0  ;;  %v3113_v19 = vmul.f32 0.0078125, %v1606_v30 }
 0x459   : > { %v2457_v33 = vpop.eup %2456  ;;  %v1844_v40 = vmul.f32 %v2455_v31, %v1825_v27  ;;  %v1754_v0 = vsub.f32 %v1716_v29, %v1735_v28 }
 0x45a   : > { %v1845_v35 = vmul.f32 %v2457_v33, %v1826_v32  ;;  %v1791_v43 = vadd.f32 1e-05, %v1772_v37  ;;  %v1733_v44 = vmul.f32 %v3113_v19, %v3113_v19  ;;  %v1663_v48 = vpop.xlane.xlu0 %1662  ;;  %v1829_v32 = vsub.f32 %v2994_v47, %v3091_v12 }
 0x45b   : > { %v1870_v51 = vmul.f32 %v3105_v34, %v1844_v40  ;;  %v1773_v53 = vmax.f32 %v1754_v0, 0.0  ;;  %v1714_v39 = vmul.f32 0.0078125, %v1663_v48  ;;  %v1661_v46 = vpop.xlane.xlu1 %1660 }
 0x45c   : > { %v2459_v38 = vpop.eup %2458  ;;  %v1871_v55 = vmul.f32 %v3105_v34, %v1845_v35  ;;  %2462 = vrsqrt.f32 %v1791_v43  ;;  %v1713_v57 = vmul.f32 0.0078125, %v1661_v46 }
 0x45d   : > { %v2461_v45 = vpop.eup %2460  ;;  %v1896_v60 = vadd.f32 %v3120_v24, %v1870_v51  ;;  %v1842_v62 = vmul.f32 %v2459_v38, %v1823_v14  ;;  %v1792_v3 = vadd.f32 1e-05, %v1773_v53  ;;  %v1752_v41 = vsub.f32 %v1714_v39, %v1733_v44 }
 0x45e   : > { %v1897_v42 = vadd.f32 %v3120_v24, %v1871_v55  ;;  %v1843_v6 = vmul.f32 %v2461_v45, %v1824_v49  ;;  %v1751_v7 = vsub.f32 %v1713_v57, %v1732_v56  ;;  %v1616_v8 = vpop.xlane.xlu0 %1615  ;;  %v1830_v44 = vsub.f32 %v2997_v50, %v3093_v18 }
 0x45f   : > { %1915 = vst [vmem:[%s3133_s30 + $0x10] sm:$0xff] %v1896_v60  ;;  %v1868_v63 = vmul.f32 %v3105_v34, %v1842_v62  ;;  %2464 = vrsqrt.f32 %v1792_v3  ;;  %v1771_v10 = vmax.f32 %v1752_v41, 0.0  ;;  %v1618_v5 = vpop.xlane.xlu1 %1617  ;;  %v3139_v20 = vmul.f32 0.0078125, %v1616_v8 }
 0x460   : > { %1916 = vst [vmem:[%s3133_s30 + $0x18] sm:$0xff] %v1897_v42  ;;  %v1869_v15 = vmul.f32 %v3105_v34, %v1843_v6  ;;  %v1770_v17 = vmax.f32 %v1751_v7, 0.0  ;;  %v3144_v28 = vmul.f32 0.0078125, %v1618_v5  ;;  %v1828_v50 = vsub.f32 %v3008_v54, %v3113_v19 }
 0x461   : > { %v1894_v21 = vadd.f32 %v3120_v24, %v1868_v63  ;;  %v1790_v22 = vadd.f32 1e-05, %v1771_v10  ;;  %v1738_v30 = vmul.f32 %v3139_v20, %v3139_v20  ;;  %v1827_v42 = vsub.f32 %v3002_v52, %v3111_v36 }
 0x462   : > { %v1895_v58 = vadd.f32 %v3120_v24, %v1869_v15  ;;  %v1789_v23 = vadd.f32 1e-05, %v1770_v17  ;;  %v1612_v27 = vpop.xlane.xlu0 %1611  ;;  %v1739_v14 = vmul.f32 %v3144_v28, %v3144_v28 }
 0x463   : > { %1913 = vst [vmem:[%s3133_s30] sm:$0xff] %v1894_v21  ;;  %2466 = vrsqrt.f32 %v1790_v22  ;;  %v1673_v29 = vpop.xlane.xlu1 %1672  ;;  %v3155_v48 = vmul.f32 0.0078125, %v1612_v27 }
 0x464   : > { %1914 = vst [vmem:[%s3133_s30 + $0x8] sm:$0xff] %v1895_v58  ;;  %2468 = vrsqrt.f32 %v1789_v23  ;;  %v1719_v31 = vmul.f32 0.0078125, %v1673_v29 }
 0x465   : > { %v1736_v62 = vmul.f32 %v3155_v48, %v3155_v48 }
 0x466   : > { %v2463_v37 = vpop.eup %2462  ;;  %v1757_v33 = vsub.f32 %v1719_v31, %v1738_v30  ;;  %v1675_v40 = vpop.xlane.xlu0 %1674 }
 0x467   : > { %v1848_v0 = vmul.f32 %v2463_v37, %v1829_v32  ;;  %v1720_v35 = vmul.f32 0.0078125, %v1675_v40  ;;  %v1614_v43 = vpop.xlane.xlu1 %1613  ;;  %v1833_v40 = vsub.f32 %v3018_v59, %v3139_v20 }
 0x468   : > { %v1776_v49 = vmax.f32 %v1757_v33, 0.0  ;;  %v3157_v51 = vmul.f32 0.0078125, %v1614_v43 }
 0x469   : > { %v2465_v53 = vpop.eup %2464  ;;  %v1874_v47 = vmul.f32 %v3105_v34, %v1848_v0  ;;  %v1758_v12 = vsub.f32 %v1720_v35, %v1739_v14 }
 0x46a   : > { %v1849_v39 = vmul.f32 %v2465_v53, %v1830_v44  ;;  %v1795_v46 = vadd.f32 1e-05, %v1776_v49  ;;  %v1737_v38 = vmul.f32 %v3157_v51, %v3157_v51  ;;  %v1671_v55 = vpop.xlane.xlu0 %1670 }
 0x46b   : > { %v1900_v56 = vadd.f32 %v3120_v24, %v1874_v47  ;;  %v1777_v18 = vmax.f32 %v1758_v12, 0.0  ;;  %v1718_v57 = vmul.f32 0.0078125, %v1671_v55  ;;  %v1669_v45 = vpop.xlane.xlu1 %1668  ;;  %v1834_v47 = vsub.f32 %v3021_v61, %v3144_v28 }
 0x46c   : > { %v1875_v60 = vmul.f32 %v3105_v34, %v1849_v39  ;;  %2470 = vrsqrt.f32 %v1795_v46  ;;  %v1717_v3 = vmul.f32 0.0078125, %v1669_v45  ;;  %v1832_v61 = vsub.f32 %v3032_v4, %v3157_v51 }
 0x46d   : > { %v2467_v41 = vpop.eup %2466  ;;  %1919 = vst [vmem:[%s3133_s30 + $0x30] sm:$0xff] %v1900_v56  ;;  %v1796_v6 = vadd.f32 1e-05, %v1777_v18  ;;  %v1756_v7 = vsub.f32 %v1718_v57, %v1737_v38 }
 0x46e   : > { %v2469_v8 = vpop.eup %2468  ;;  %v1901_v54 = vadd.f32 %v3120_v24, %v1875_v60  ;;  %v1847_v19 = vmul.f32 %v2467_v41, %v1828_v50  ;;  %v1755_v63 = vsub.f32 %v1717_v3, %v1736_v62  ;;  %v1624_v10 = vpop.xlane.xlu0 %1623 }
 0x46f   : > { %v1846_v5 = vmul.f32 %v2469_v8, %v1827_v42  ;;  %2472 = vrsqrt.f32 %v1796_v6  ;;  %v1775_v15 = vmax.f32 %v1756_v7, 0.0  ;;  %v1626_v17 = vpop.xlane.xlu1 %1625  ;;  %v3174_v52 = vmul.f32 0.0078125, %v1624_v10 }
 0x470   : > { %1920 = vst [vmem:[%s3133_s30 + $0x38] sm:$0xff] %v1901_v54  ;;  %v1873_v21 = vmul.f32 %v3105_v34, %v1847_v19  ;;  %v1774_v22 = vmax.f32 %v1755_v63, 0.0  ;;  %v3179_v31 = vmul.f32 0.0078125, %v1626_v17  ;;  %v1831_v6 = vsub.f32 %v3026_v2, %v3155_v48 }
 0x471   : > { %v1872_v36 = vmul.f32 %v3105_v34, %v1846_v5  ;;  %v1794_v58 = vadd.f32 1e-05, %v1775_v15  ;;  %v1742_v37 = vmul.f32 %v3174_v52, %v3174_v52 }
 0x472   : > { %v1899_v23 = vadd.f32 %v3120_v24, %v1873_v21  ;;  %v1793_v27 = vadd.f32 1e-05, %v1774_v22  ;;  %v1620_v29 = vpop.xlane.xlu0 %1619  ;;  %v1743_v44 = vmul.f32 %v3179_v31, %v3179_v31 }
 0x473   : > { %v1898_v30 = vadd.f32 %v3120_v24, %v1872_v36  ;;  %2474 = vrsqrt.f32 %v1794_v58  ;;  %v1681_v32 = vpop.xlane.xlu1 %1680  ;;  %v3191_v12 = vmul.f32 0.0078125, %v1620_v29 }
 0x474   : > { %1918 = vst [vmem:[%s3133_s30 + $0x28] sm:$0xff] %v1899_v23  ;;  %2476 = vrsqrt.f32 %v1793_v27  ;;  %v1723_v33 = vmul.f32 0.0078125, %v1681_v32 }
 0x475   : > { %1917 = vst [vmem:[%s3133_s30 + $0x20] sm:$0xff] %v1898_v30  ;;  %v1740_v3 = vmul.f32 %v3191_v12, %v3191_v12 }
 0x476   : > { %v2471_v0 = vpop.eup %2470  ;;  %v1761_v14 = vsub.f32 %v1723_v33, %v1742_v37  ;;  %v1683_v35 = vpop.xlane.xlu0 %1682  ;;  %v1837_v33 = vsub.f32 %v3042_v9, %v3174_v52 }
 0x477   : > { %v1852_v43 = vmul.f32 %v2471_v0, %v1833_v40  ;;  %v1724_v49 = vmul.f32 0.0078125, %v1683_v35  ;;  %v1622_v53 = vpop.xlane.xlu1 %1621 }
 0x478   : > { %v1780_v39 = vmax.f32 %v1761_v14, 0.0  ;;  %v3193_v46 = vmul.f32 0.0078125, %v1622_v53 }
 0x479   : > { %v2473_v38 = vpop.eup %2472  ;;  %v1878_v59 = vmul.f32 %v3105_v34, %v1852_v43  ;;  %v1762_v20 = vsub.f32 %v1724_v49, %v1743_v44 }
 0x47a   : > { %v1853_v55 = vmul.f32 %v2473_v38, %v1834_v47  ;;  %v1799_v56 = vadd.f32 1e-05, %v1780_v39  ;;  %v1741_v50 = vmul.f32 %v3193_v46, %v3193_v46  ;;  %v1679_v18 = vpop.xlane.xlu0 %1678  ;;  %v1838_v47 = vsub.f32 %v3045_v11, %v3179_v31 }
 0x47b   : > { %v1904_v57 = vadd.f32 %v3120_v24, %v1878_v59  ;;  %v1781_v28 = vmax.f32 %v1762_v20, 0.0  ;;  %v1722_v45 = vmul.f32 0.0078125, %v1679_v18  ;;  %v1677_v60 = vpop.xlane.xlu1 %1676  ;;  %v1836_v11 = vsub.f32 %v3056_v16, %v3193_v46 }
 0x47c   : > { %v1879_v62 = vmul.f32 %v3105_v34, %v1853_v55  ;;  %2478 = vrsqrt.f32 %v1799_v56  ;;  %v1721_v41 = vmul.f32 0.0078125, %v1677_v60 }
 0x47d   : > { %v2475_v42 = vpop.eup %2474  ;;  %1923 = vst [vmem:[%s3133_s30 + $0x50] sm:$0xff] %v1904_v57  ;;  %v1800_v7 = vadd.f32 1e-05, %v1781_v28  ;;  %v1760_v8 = vsub.f32 %v1722_v45, %v1741_v50  ;;  %v1835_v45 = vsub.f32 %v3050_v13, %v3191_v12 }
 0x47e   : > { %v2477_v54 = vpop.eup %2476  ;;  %v1905_v4 = vadd.f32 %v3120_v24, %v1879_v62  ;;  %v1851_v51 = vmul.f32 %v2475_v42, %v1832_v61  ;;  %v1759_v19 = vsub.f32 %v1721_v41, %v1740_v3  ;;  %v1632_v63 = vpop.xlane.xlu0 %1631 }
 0x47f   : > { %v1850_v10 = vmul.f32 %v2477_v54, %v1831_v6  ;;  %2480 = vrsqrt.f32 %v1800_v7  ;;  %v1779_v5 = vmax.f32 %v1760_v8, 0.0  ;;  %v1630_v15 = vpop.xlane.xlu1 %1629  ;;  %v1708_v32 = vmul.f32 0.0078125, %v1632_v63 }
 0x480   : > { %1924 = vst [vmem:[%s3133_s30 + $0x58] sm:$0xff] %v1905_v4  ;;  %v1877_v17 = vmul.f32 %v3105_v34, %v1851_v51  ;;  %v1778_v21 = vmax.f32 %v1759_v19, 0.0  ;;  %v1707_v27 = vmul.f32 0.0078125, %v1630_v15 }
 0x481   : > { %v1876_v2 = vmul.f32 %v3105_v34, %v1850_v10  ;;  %v1798_v48 = vadd.f32 1e-05, %v1779_v5  ;;  %v1746_v39 = vmul.f32 %v1708_v32, %v1708_v32  ;;  %v1841_v19 = vsub.f32 %v3066_v25, %v1708_v32 }
 0x482   : > { %v1903_v22 = vadd.f32 %v3120_v24, %v1877_v17  ;;  %v1797_v36 = vadd.f32 1e-05, %v1778_v21  ;;  %v1628_v58 = vpop.xlane.xlu0 %1627  ;;  %v1745_v43 = vmul.f32 %v1707_v27, %v1707_v27  ;;  %v1840_v54 = vsub.f32 %v3069_v26, %v1707_v27 }
 0x483   : > { %v1902_v23 = vadd.f32 %v3120_v24, %v1876_v2  ;;  %2482 = vrsqrt.f32 %v1798_v48  ;;  %v1706_v29 = vmul.f32 0.0078125, %v1628_v58  ;;  %v1685_v30 = vpop.xlane.xlu1 %1684 }
 0x484   : > { %1922 = vst [vmem:[%s3133_s30 + $0x48] sm:$0xff] %v1903_v22  ;;  %2484 = vrsqrt.f32 %v1797_v36  ;;  %v1725_v37 = vmul.f32 0.0078125, %v1685_v30 }
 0x485   : > { %1921 = vst [vmem:[%s3133_s30 + $0x40] sm:$0xff] %v1902_v23  ;;  %v1744_v40 = vmul.f32 %v1706_v29, %v1706_v29  ;;  %v1839_v7 = vsub.f32 %v3072_v1, %v1706_v29 }
 0x486   : > { %v2479_v0 = vpop.eup %2478  ;;  %v1687_v14 = vpop.xlane.xlu0 %1686 }
 0x487   : > { %v1856_v35 = vmul.f32 %v2479_v0, %v1837_v33  ;;  %v1763_v44 = vsub.f32 %v1725_v37, %v1744_v40  ;;  %v1726_v49 = vmul.f32 0.0078125, %v1687_v14  ;;  %v1689_v53 = vpop.xlane.xlu1 %1688 }
 0x488   : > { %v1727_v38 = vmul.f32 0.0078125, %v1689_v53 }
 0x489   : > { %v2481_v59 = vpop.eup %2480  ;;  %v1882_v20 = vmul.f32 %v3105_v34, %v1856_v35  ;;  %v1782_v55 = vmax.f32 %v1763_v44, 0.0  ;;  %v1764_v56 = vsub.f32 %v1726_v49, %v1745_v43 }
 0x48a   : > { %v1857_v9 = vmul.f32 %v2481_v59, %v1838_v47  ;;  %v1765_v52 = vsub.f32 %v1727_v38, %v1746_v39 }
 0x48b   : > { %v1908_v50 = vadd.f32 %v3120_v24, %v1882_v20  ;;  %v1801_v18 = vadd.f32 1e-05, %v1782_v55  ;;  %v1783_v57 = vmax.f32 %v1764_v56, 0.0 }
 0x48c   : > { %v1883_v61 = vmul.f32 %v3105_v34, %v1857_v9  ;;  %v1784_v31 = vmax.f32 %v1765_v52, 0.0 }
 0x48d   : > { %v2483_v28 = vpop.eup %2482  ;;  %1927 = vst [vmem:[%s3133_s30 + $0x70] sm:$0xff] %v1908_v50  ;;  %2486 = vrsqrt.f32 %v1801_v18  ;;  %v1802_v60 = vadd.f32 1e-05, %v1783_v57 }
 0x48e   : > { %v2485_v62 = vpop.eup %2484  ;;  %v1909_v3 = vadd.f32 %v3120_v24, %v1883_v61  ;;  %v1855_v41 = vmul.f32 %v2483_v28, %v1836_v11  ;;  %v1803_v42 = vadd.f32 1e-05, %v1784_v31 }
 0x48f   : > { %v1854_v6 = vmul.f32 %v2485_v62, %v1835_v45  ;;  %2488 = vrsqrt.f32 %v1802_v60 }
 0x490   : > { %1928 = vst [vmem:[%s3133_s30 + $0x78] sm:$0xff] %v1909_v3  ;;  %v1881_v16 = vmul.f32 %v3105_v34, %v1855_v41  ;;  %2490 = vrsqrt.f32 %v1803_v42 }
 0x491   : > { %v1880_v46 = vmul.f32 %v3105_v34, %v1854_v6 }
 0x492   : > { %v1907_v13 = vadd.f32 %v3120_v24, %v1881_v16 }
 0x493   : > { %v1906_v12 = vadd.f32 %v3120_v24, %v1880_v46 }
 0x494   : > { %1926 = vst [vmem:[%s3133_s30 + $0x68] sm:$0xff] %v1907_v13 }
 0x495   : > { %1925 = vst [vmem:[%s3133_s30 + $0x60] sm:$0xff] %v1906_v12 }
 0x497   : > { %v2487_v8 = vpop.eup %2486 }
 0x498   : > { %v1858_v4 = vmul.f32 %v2487_v8, %v1839_v7 }
 0x499   : > { %v2489_v51 = vpop.eup %2488 }
 0x49a   : > { %v2491_v63 = vpop.eup %2490  ;;  %v1884_v10 = vmul.f32 %v3105_v34, %v1858_v4  ;;  %v1859_v5 = vmul.f32 %v2489_v51, %v1840_v54 }
 0x49b   : > { %v1860_v15 = vmul.f32 %v2491_v63, %v1841_v19 }
 0x49c   : > { %v1910_v1 = vadd.f32 %v3120_v24, %v1884_v10  ;;  %v1885_v17 = vmul.f32 %v3105_v34, %v1859_v5 }
 0x49d   : > { %v1886_v26 = vmul.f32 %v3105_v34, %v1860_v15 }
 0x49e   : > { %1929 = vst [vmem:[%s3133_s30 + $0x80] sm:$0xff] %v1910_v1  ;;  %v1911_v21 = vadd.f32 %v3120_v24, %v1885_v17 }
 0x49f   : > { %v1912_v25 = vadd.f32 %v3120_v24, %v1886_v26 }
 0x4a0   : > { %1930 = vst [vmem:[%s3133_s30 + $0x88] sm:$0xff] %v1911_v21 }
 0x4a1   : > { %1931 = vst [vmem:[%s3133_s30 + $0x90] sm:$0xff] %v1912_v25 }
 0x4a2   : > { %2505 = shalt.err (!%p2502_p3)
}
 0x4a3   : > { %s2506_s22 = scalar_lea.hbm %s3249_s24, 2432  ;;  %s2510_s14 = scalar_lea.hbm %s3310_s11, 4864 }
 0x4a4   : > { %p2507_p4 = scmp.ne.s32.totalorder %s3249_s24, %s2506_s22  ;;  %p2511_p9 = scmp.lt.u32.totalorder %s3249_s24, %s3310_s11 }
 0x4a5   : > { %p2512_p10 = scmp.lt.u32.totalorder %s2510_s14, %s2506_s22  ;;  %p2514_p12 = scmp.lt.u32.totalorder %s2506_s22, %s3249_s24 }
 0x4a6   : > { %p2508_p7 = pnand %p2507_p4, %p2657_p5 }
 0x4a7   : > { %p2513_p11 = por %p2512_p10, %p2511_p9 }
 0x4a8   : > { %p2509_p8 = pneg %p2508_p7 }
 0x4a9   : > { %p2515_p13 = por %p2514_p12, %p2513_p11 }
 0x4ab   : > { %p2516_p0 = pnand %p2515_p13, %p2509_p8 }
 0x4ad   : > { %2519 = shalt.err (!%p2516_p0)
}
 0x4ae   : > { %s2557_s29 = smov 128   ;;  %s2558_s15 = smov 8  }
 0x4af   : > { %2365 = dma.vmem_to_hbm [thread:$0]  (%p2657_p5), %s3251_s13, 2432, %s3249_s24, %s3258_s21, %s2557_s29, %s2557_s29, %s2558_s15  }
 0x4b0 PF: > { %p2371_p1 = scmp.ge.s32.totalorder %s2554_s20, 2  ;;  %s1961_s25 = sand.u32 1, %s2542_s17  }
 0x4b1   : > { %s1962_s22 = scalar_lea.sflag [#allocation3], %s1961_s25 }
 0x4b2   : > { %p2368_p2 = pnand %p2371_p1, %p2661_p6 }
 0x4b4   : > { %2537 = dma.done.wait (!%p2368_p2), %s1962_s22, 2432  }
 0x4b5   : > { %2539 = vsyncadd (!%p2368_p2), %s1962_s22, 4294964864  ;;  %s3314_s30 = sld [smem:[#allocation5_spill]]  ;;  %p21_p3 = scmp.ge.s32.totalorder %s2644_s23, 4  }
 0x4b6   : > { %s3315_s17 = smov %s2546_s18  ;;  %s3316_s18 = smov %s2550_s19 }
 0x4b7   : > { %s3318_s20 = smov %s2644_s23  ;;  %23 = sbr.rel (!%p21_p3) target bundleno = 3 (0x3), region = 99 }
 0x4bb   : > { %s3317_s19 = smov %s3314_s30 }
 0x4be   :  { %1967 = vsyncpa [#allocation3], 1 }
 0x4bf   :  { %1969 = vsyncpa [#allocation3 + $0x1], 1 }

// kernel: processor_edge_mlp.1
= control target key start
LH: loop header
LB: loop body
LE: loop exit
PB: predicated region body
PF: predicated region fallthrough
CT: control target
= control target key end

     0   :  { %16 = vsyncpa [#allocation3], 0  ;;  %s3299_s0 = inlined_call_operand.vmem [shape: f32[300,384], index: 0, kind: input, shape index: {}]   ;;  %s3300_s1 = inlined_call_operand.vmem [shape: bf16[384,128], index: 1, kind: input, shape index: {}]   ;;  %s3301_s2 = inlined_call_operand.vmem [shape: f32[1,128], index: 2, kind: input, shape index: {}]   ;;  %s3302_s3 = inlined_call_operand.vmem [shape: bf16[128,128], index: 3, kind: input, shape index: {}]   ;;  %s3303_s4 = inlined_call_operand.vmem [shape: f32[1,128], index: 4, kind: input, shape index: {}]   ;;  %s3304_s5 = inlined_call_operand.vmem [shape: bf16[128,128], index: 5, kind: input, shape index: {}]   ;;  %s3305_s6 = inlined_call_operand.vmem [shape: f32[1,128], index: 6, kind: input, shape index: {}]   ;;  %s3306_s7 = inlined_call_operand.vmem [shape: bf16[128,128], index: 7, kind: input, shape index: {}]   ;;  %s3307_s8 = inlined_call_operand.vmem [shape: f32[1,128], index: 8, kind: input, shape index: {}]   ;;  %s3308_s9 = inlined_call_operand.vmem [shape: f32[1,128], index: 9, kind: input, shape index: {}]   ;;  %s3309_s10 = inlined_call_operand.vmem [shape: f32[1,128], index: 10, kind: input, shape index: {}]   ;;  %s3310_s11 = inlined_call_operand.hbm [shape: f32[300,128], index: 11, kind: output, shape index: {}]  }
   0x1   :  { %18 = vsyncpa [#allocation3 + $0x1], 0  ;;  %s2619_s17 = smov 0   ;;  %s2621_s18 = smov 0  }
   0x2   :  { %s2623_s19 = smov 0   ;;  %s2625_s20 = smov 0  }
   0x3 LB: > { %s2640_s21 = sadd.s32 4294967295, %s2554_s20   ;;  %s2008_s22 = sadd.s32 4294967294, %s2554_s20   ;;  %s2554_s20 = sphi %s2625_s20, %s3318_s20   ;;  %s2550_s19 = sphi %s2623_s19, %s3317_s19   ;;  %s2546_s18 = sphi %s2621_s18, %s3316_s18   ;;  %s2542_s17 = sphi %s2619_s17, %s3315_s17  }
   0x4   : > { %s2644_s23 = sadd.s32 1, %s2554_s20   ;;  %s267_s24 = sadd.s32 1, %s2550_s19 }
   0x5   : > { %s264_s25 = ssub.s32 %s2554_s20, %s2644_s23  ;;  %p277_p0 = scmp.ne.s32.totalorder %s2550_s19, %s2546_s18 }
   0x6   : > { %p265_p1 = scmp.eq.s32.totalorder %s264_s25, 0  ;;  %p278_p2 = scmp.eq.s32.totalorder %s2640_s21, 1 }
   0x7   : > { %p283_p3 = scmp.ne.s32.totalorder %s2546_s18, %s2542_s17  ;;  %p284_p4 = scmp.eq.s32.totalorder %s2008_s22, 1 }
   0x8   : > { %s2655_s26 = scalar_select %p265_p1, %s2550_s19, %s267_s24  }
   0x9   : > { %p2657_p5 = por %p278_p2, %p277_p0  ;;  %p2661_p6 = por %p284_p4, %p283_p3 }
   0xa   : > { %3311 = sst [smem:[#allocation5_spill]] %s2655_s26  ;;  %p2011_p7 = scmp.ge.s32.totalorder %s2554_s20, 1 }
   0xb   : > { %p342_p8 = scmp.lt.s32.totalorder %s2554_s20, 3 }
   0xd   : > { %p343_p9 = pnand %p2011_p7, %p342_p8 }
   0xe   : > { %v2406_v0 = vld [vmem:[%s3300_s1 + $0x40] sm:$0xff] (!%p343_p9)   ;;  %v2408_v2 = vld [vmem:[%s3300_s1 + $0x48] sm:$0xff] (!%p343_p9)   ;;  %s383_s29 = smul.u32 (!%p343_p9), 19, %s2640_s21  ;;  %v2411_v5 = vld [vmem:[%s3300_s1 + $0x50] sm:$0xff] (!%p343_p9)   ;;  %s380_s22 = sand.u32 (!%p343_p9), 1, %s2546_s18  }
   0xf   : > { %346 = sbr.rel (%p343_p9) target bundleno = 1200 (0x4b0), region = 64  ;;  %v2407_v1 = vld [vmem:[%s3300_s1] sm:$0xff] (!%p343_p9)   ;;  %2071 = vmatprep.subr.bf16.mxu0 (!%p343_p9), %v2406_v0  ;;  %v2410_v4 = vld [vmem:[%s3300_s1 + $0x8] sm:$0xff] (!%p343_p9)   ;;  %v2413_v7 = vld [vmem:[%s3300_s1 + $0x10] sm:$0xff] (!%p343_p9)  }
  0x10   : > { %2072 = vmatpush3.bf16.msra.mxu0 (!%p343_p9), %v2407_v1  ;;  %v2409_v3 = vld [vmem:[%s3300_s1 + $0x80] sm:$0xff] (!%p343_p9)   ;;  %v2412_v6 = vld [vmem:[%s3300_s1 + $0x88] sm:$0xff] (!%p343_p9)   ;;  %v2414_v8 = vld [vmem:[%s3300_s1 + $0x58] sm:$0xff] (!%p343_p9)   ;;  %p384_p10 = scmp.lt.s32.totalorder (!%p343_p9), %s383_s29, 37  ;;  %s3109_s26 = smul.u32 (!%p343_p9), 152, %s380_s22 }
  0x11   : > { %2073 = vmatprep.subr.bf16.mxu0 (!%p343_p9), %v2408_v2  ;;  %2219 = vmatprep.subr.bf16.mxu1 (!%p343_p9), %v2409_v3  ;;  %v2415_v9 = vld [vmem:[%s3300_s1 + $0x90] sm:$0xff] (!%p343_p9)   ;;  %v2416_v10 = vld [vmem:[%s3300_s1 + $0x18] sm:$0xff] (!%p343_p9)   ;;  %v2417_v11 = vld [vmem:[%s3300_s1 + $0x60] sm:$0xff] (!%p343_p9)   ;;  %s2070_s12 = smul.u32 (!%p343_p9), 2432, %s2640_s21  ;;  %s3258_s21 = scalar_lea.sflag (!%p343_p9), [#allocation3], %s380_s22 }
  0x12   : > { %2220 = vmatpush3.bf16.msra.mxu1 (!%p343_p9), %v2409_v3  ;;  %v2418_v12 = vld [vmem:[%s3300_s1 + $0x98] sm:$0xff] (!%p343_p9)   ;;  %v2419_v13 = vld [vmem:[%s3300_s1 + $0x20] sm:$0xff] (!%p343_p9)   ;;  %v2420_v15 = vld [vmem:[%s3300_s1 + $0x68] sm:$0xff] (!%p343_p9)   ;;  %s3133_s30 = scalar_lea.vmem (!%p343_p9), [#allocation2], %s3109_s26  ;;  %s2556_s26 = smov (!%p343_p9), [#allocation2]  }
  0x13   : > { %2221 = vmatprep.subr.bf16.mxu1 (!%p343_p9), %v2412_v6  ;;  %v2421_v14 = vld [vmem:[%s3300_s1 + $0xa0] sm:$0xff] (!%p343_p9)   ;;  %v2422_v16 = vld [vmem:[%s3300_s1 + $0x28] sm:$0xff] (!%p343_p9)   ;;  %v2423_v18 = vld [vmem:[%s3300_s1 + $0x70] sm:$0xff] (!%p343_p9)   ;;  %s1946_s13 = sshll.u32 (!%p343_p9), %s3133_s30, 4  ;;  %s3249_s24 = scalar_lea.hbm (!%p343_p9), %s3310_s11, %s2070_s12  ;;  %s3251_s13 = int_to_ptr.vmem [resolvable:$true] %s1946_s13 }
  0x14   : > { %2074 = vmatpush3.bf16.msra.mxu0 (!%p343_p9), %v2410_v4  ;;  %v2424_v17 = vld [vmem:[%s3300_s1 + $0xa8] sm:$0xff] (!%p343_p9)   ;;  %v2425_v19 = vld [vmem:[%s3300_s1 + $0x30] sm:$0xff] (!%p343_p9)   ;;  %v2426_v23 = vld [vmem:[%s3300_s1 + $0x78] sm:$0xff] (!%p343_p9)  }
  0x15   : > { %2075 = vmatprep.subr.bf16.mxu0 (!%p343_p9), %v2411_v5  ;;  %v2427_v20 = vld [vmem:[%s3300_s1 + $0xb0] sm:$0xff] (!%p343_p9)   ;;  %v2428_v27 = vld [vmem:[%s3300_s1 + $0x38] sm:$0xff] (!%p343_p9)   ;;  %v2430_v58 = vld [vmem:[%s3302_s3] sm:$0xff] (!%p343_p9)  }
  0x16   : > { %2222 = vmatpush3.bf16.msra.mxu1 %v2412_v6  ;;  %s3320_s29 = smov (!%p384_p10, %s383_s29), 37  ;;  %v2429_v31 = vld [vmem:[%s3300_s1 + $0xb8] sm:$0xff]   ;;  %v2431_v61 = vld [vmem:[%s3302_s3 + $0x8] sm:$0xff]   ;;  %v2432_v1 = vld [vmem:[%s3302_s3 + $0x10] sm:$0xff]  }
  0x17   : > { %2223 = vmatprep.subr.bf16.mxu1 %v2415_v9  ;;  %s2364_s15 = smul.u32 24, %s3320_s29  ;;  %v2433_v6 = vld [vmem:[%s3302_s3 + $0x18] sm:$0xff]  }
  0x18   : > { %2076 = vmatpush3.bf16.msra.mxu0 %v2413_v7 }
  0x19   : > { %2077 = vmatprep.subr.bf16.mxu0 %v2414_v8  ;;  %s2728_s29 = scalar_lea.vmem %s3299_s0, %s2364_s15  ;;  %s2496_s15 = sshll.u32 %s2556_s26, 4  ;;  %s2497_s15 = int_to_ptr.vmem [resolvable:$false] %s2496_s15 }
  0x1a   : > { %2224 = vmatpush3.bf16.msra.mxu1 %v2415_v9  ;;  %v393_v21 = vld [vmem:[%s2728_s29 + $0x8] sm:$0xff]  ;;  %v396_v22 = vld [vmem:[%s2728_s29 + $0x20] sm:$0xff]  ;;  %v394_v25 = vld [vmem:[%s2728_s29 + $0x10] sm:$0xff]  ;;  %s2498_s25 = scalar_lea.vmem %s2497_s15, 4864  ;;  %p2499_p0 = scmp.lt.s32.totalorder %s3251_s13, %s2497_s15 }
  0x1b   : > { %2225 = vmatprep.subr.bf16.mxu1 %v2418_v12  ;;  %v450_v24 = vpack.c.bf16 %v396_v22, %v393_v21  ;;  %v397_v26 = vld [vmem:[%s2728_s29 + $0x28] sm:$0xff]  ;;  %v392_v29 = vld [vmem:[%s2728_s29] sm:$0xff]  ;;  %v395_v30 = vld [vmem:[%s2728_s29 + $0x18] sm:$0xff] }
  0x1c   : > { %2078 = vmatpush3.bf16.msra.mxu0 %v2416_v10  ;;  %v451_v28 = vpack.c.bf16 %v397_v26, %v394_v25  ;;  %v399_v32 = vld [vmem:[%s2728_s29 + $0x38] sm:$0xff]  ;;  %v402_v33 = vld [vmem:[%s2728_s29 + $0x50] sm:$0xff]  ;;  %v449_v34 = vpack.c.bf16 %v395_v30, %v392_v29  ;;  %v400_v35 = vld [vmem:[%s2728_s29 + $0x40] sm:$0xff] }
  0x1d   : > { %2079 = vmatprep.subr.bf16.mxu0 %v2417_v11  ;;  %710 = vmatprep.mubr.bf16.mxu0 %v450_v24  ;;  %v403_v36 = vld [vmem:[%s2728_s29 + $0x58] sm:$0xff]  ;;  %v453_v37 = vpack.c.bf16 %v402_v33, %v399_v32  ;;  %v406_v38 = vld [vmem:[%s2728_s29 + $0x70] sm:$0xff]  ;;  %v409_v39 = vld [vmem:[%s2728_s29 + $0x88] sm:$0xff] }
  0x1e   : > { %2226 = vmatpush3.bf16.msra.mxu1 %v2418_v12  ;;  %2235 = vmatprep.mubr.bf16.mxu1 %v451_v28  ;;  %v454_v40 = vpack.c.bf16 %v403_v36, %v400_v35  ;;  %v457_v41 = vpack.c.bf16 %v409_v39, %v406_v38  ;;  %v398_v42 = vld [vmem:[%s2728_s29 + $0x30] sm:$0xff]  ;;  %v401_v43 = vld [vmem:[%s2728_s29 + $0x48] sm:$0xff]  ;;  %v408_v45 = vld [vmem:[%s2728_s29 + $0x80] sm:$0xff] }
  0x1f   : > { %2227 = vmatprep.subr.bf16.mxu1 %v2421_v14  ;;  %v405_v44 = vld [vmem:[%s2728_s29 + $0x68] sm:$0xff]  ;;  %v452_v46 = vpack.c.bf16 %v401_v43, %v398_v42  ;;  %v412_v47 = vld [vmem:[%s2728_s29 + $0xa0] sm:$0xff]  ;;  %v415_v48 = vld [vmem:[%s2728_s29 + $0xb8] sm:$0xff] }
  0x20   : > { %2080 = vmatpush3.bf16.msra.mxu0 %v2419_v13  ;;  %v456_v49 = vpack.c.bf16 %v408_v45, %v405_v44  ;;  %v418_v50 = vld [vmem:[%s2728_s29 + $0xd0] sm:$0xff]  ;;  %v421_v51 = vld [vmem:[%s2728_s29 + $0xe8] sm:$0xff]  ;;  %v404_v52 = vld [vmem:[%s2728_s29 + $0x60] sm:$0xff]  ;;  %v460_v53 = vpack.c.bf16 %v415_v48, %v412_v47 }
  0x21   : > { %2081 = vmatprep.subr.bf16.mxu0 %v2420_v15  ;;  %v407_v54 = vld [vmem:[%s2728_s29 + $0x78] sm:$0xff]  ;;  %v414_v56 = vld [vmem:[%s2728_s29 + $0xb0] sm:$0xff]  ;;  %v463_v57 = vpack.c.bf16 %v421_v51, %v418_v50  ;;  %v424_v59 = vld [vmem:[%s2728_s29 + $0x100] sm:$0xff] }
  0x22   : > { %2228 = vmatpush3.bf16.msra.mxu1 %v2421_v14  ;;  %v411_v55 = vld [vmem:[%s2728_s29 + $0x98] sm:$0xff]  ;;  %v430_v62 = vld [vmem:[%s2728_s29 + $0x130] sm:$0xff]  ;;  %v433_v63 = vld [vmem:[%s2728_s29 + $0x148] sm:$0xff]  ;;  %v455_v0 = vpack.c.bf16 %v407_v54, %v404_v52 }
  0x23   : > { %2229 = vmatprep.subr.bf16.mxu1 %v2424_v17  ;;  %v427_v60 = vld [vmem:[%s2728_s29 + $0x118] sm:$0xff]  ;;  %v459_v2 = vpack.c.bf16 %v414_v56, %v411_v55  ;;  %v410_v3 = vld [vmem:[%s2728_s29 + $0x90] sm:$0xff]  ;;  %v413_v4 = vld [vmem:[%s2728_s29 + $0xa8] sm:$0xff]  ;;  %v469_v9 = vpack.c.bf16 %v433_v63, %v430_v62 }
  0x24   : > { %2082 = vmatpush3.bf16.msra.mxu0 %v2422_v16  ;;  %v466_v5 = vpack.c.bf16 %v427_v60, %v424_v59  ;;  %v417_v7 = vld [vmem:[%s2728_s29 + $0xc8] sm:$0xff]  ;;  %v420_v8 = vld [vmem:[%s2728_s29 + $0xe0] sm:$0xff]  ;;  %v439_v11 = vld [vmem:[%s2728_s29 + $0x178] sm:$0xff]  ;;  %v458_v14 = vpack.c.bf16 %v413_v4, %v410_v3 }
  0x25   : > { %2083 = vmatprep.subr.bf16.mxu0 %v2423_v18  ;;  %v436_v10 = vld [vmem:[%s2728_s29 + $0x160] sm:$0xff]  ;;  %v442_v12 = vld [vmem:[%s2728_s29 + $0x190] sm:$0xff]  ;;  %v445_v13 = vld [vmem:[%s2728_s29 + $0x1a8] sm:$0xff]  ;;  %v462_v15 = vpack.c.bf16 %v420_v8, %v417_v7 }
  0x26   : > { %2230 = vmatpush3.bf16.msra.mxu1 %v2424_v17  ;;  %v416_v16 = vld [vmem:[%s2728_s29 + $0xc0] sm:$0xff]  ;;  %v419_v17 = vld [vmem:[%s2728_s29 + $0xd8] sm:$0xff]  ;;  %v472_v18 = vpack.c.bf16 %v439_v11, %v436_v10  ;;  %v426_v21 = vld [vmem:[%s2728_s29 + $0x110] sm:$0xff] }
  0x27   : > { %2231 = vmatprep.subr.bf16.mxu1 %v2427_v20  ;;  %v461_v22 = vpack.c.bf16 %v419_v17, %v416_v16  ;;  %v422_v26 = vld [vmem:[%s2728_s29 + $0xf0] sm:$0xff]  ;;  %v429_v28 = vld [vmem:[%s2728_s29 + $0x128] sm:$0xff]  ;;  %v432_v29 = vld [vmem:[%s2728_s29 + $0x140] sm:$0xff] }
  0x28   : > { %2084 = vmatpush3.bf16.msra.mxu0 %v2425_v19  ;;  %v475_v19 = vpack.c.bf16 %v445_v13, %v442_v12  ;;  %v428_v32 = vld [vmem:[%s2728_s29 + $0x120] sm:$0xff]  ;;  %v431_v33 = vld [vmem:[%s2728_s29 + $0x138] sm:$0xff]  ;;  %v438_v35 = vld [vmem:[%s2728_s29 + $0x170] sm:$0xff] }
  0x29   : > { %2085 = vmatprep.subr.bf16.mxu0 %v2426_v23  ;;  %v448_v23 = vld [vmem:[%s2728_s29 + $0x1c0] sm:$0xff]  ;;  %v467_v36 = vpack.c.bf16 %v431_v33, %v428_v32  ;;  %v434_v38 = vld [vmem:[%s2728_s29 + $0x150] sm:$0xff]  ;;  %v437_v39 = vld [vmem:[%s2728_s29 + $0x168] sm:$0xff] }
  0x2a   : > { %2232 = vmatpush3.bf16.msra.mxu1 %v2427_v20  ;;  %v423_v20 = vld [vmem:[%s2728_s29 + $0xf8] sm:$0xff]  ;;  %v478_v25 = vpack.c.bf16 %v448_v23, %v448_v23  ;;  %v470_v42 = vpack.c.bf16 %v437_v39, %v434_v38  ;;  %v440_v44 = vld [vmem:[%s2728_s29 + $0x180] sm:$0xff]  ;;  %v2435_v52 = vld [vmem:[%s3302_s3 + $0x28] sm:$0xff]  }
  0x2b   : > { %2233 = vmatprep.subr.bf16.mxu1 %v2429_v31  ;;  %v465_v24 = vpack.c.bf16 %v426_v21, %v423_v20  ;;  %v443_v45 = vld [vmem:[%s2728_s29 + $0x198] sm:$0xff]  ;;  %v2434_v51 = vld [vmem:[%s3302_s3 + $0x20] sm:$0xff]   ;;  %v2439_v56 = vld [vmem:[%s3304_s5 + $0x8] sm:$0xff]  }
  0x2c   : > { %2086 = vmatpush3.bf16.msra.mxu0 %v2428_v27  ;;  %v425_v27 = vld [vmem:[%s2728_s29 + $0x108] sm:$0xff]  ;;  %v473_v47 = vpack.c.bf16 %v443_v45, %v440_v44  ;;  %v2437_v54 = vld [vmem:[%s3302_s3 + $0x38] sm:$0xff]   ;;  %v2438_v55 = vld [vmem:[%s3304_s5] sm:$0xff]  }
  0x2d   : > { %v464_v30 = vpack.c.bf16 %v425_v27, %v422_v26  ;;  %2291 = vmatprep.subr.bf16.mxu0 %v2438_v55  ;;  %v2442_v59 = vld [vmem:[%s3304_s5 + $0x20] sm:$0xff]   ;;  %v2443_v60 = vld [vmem:[%s3304_s5 + $0x28] sm:$0xff]  }
  0x2e   : > { %2234 = vmatpush3.bf16.msra.mxu1 %v2429_v31  ;;  %v468_v31 = vpack.c.bf16 %v432_v29, %v429_v28 }
  0x2f   : > { %711 = vmatmul.mubr.bf16.vlgmr.msra.gmra.mrb[0].mxu0 %v449_v34  ;;  %2255 = vmatprep.subr.bf16.mxu1 %v2430_v58  ;;  %v435_v34 = vld [vmem:[%s2728_s29 + $0x158] sm:$0xff] }
  0x30   : > { %718 = vmatprep.mubr.bf16.mxu0 %v453_v37  ;;  %v471_v37 = vpack.c.bf16 %v438_v35, %v435_v34  ;;  %2292 = vmatpush3.bf16.msra.mxu0 %v2438_v55 }
  0x31   : > { %2236 = vmatmul.mubr.bf16.vlgmr.msra.gmra.mrb[0].mxu1 %v454_v40  ;;  %v441_v40 = vld [vmem:[%s2728_s29 + $0x188] sm:$0xff]  ;;  %2293 = vmatprep.subr.bf16.mxu0 %v2439_v56 }
  0x32   : > { %2239 = vmatprep.mubr.bf16.mxu1 %v457_v41  ;;  %2256 = vmatpush3.bf16.msra.mxu1 %v2430_v58  ;;  %v444_v41 = vld [vmem:[%s2728_s29 + $0x1a0] sm:$0xff]  ;;  %v2441_v58 = vld [vmem:[%s3304_s5 + $0x18] sm:$0xff]  }
  0x33   : > { %2257 = vmatprep.subr.bf16.mxu1 %v2431_v61  ;;  %v474_v43 = vpack.c.bf16 %v444_v41, %v441_v40 }
  0x34   : > { %2294 = vmatpush3.bf16.msra.mxu0 %v2439_v56 }
  0x36   : > { %2258 = vmatpush3.bf16.msra.mxu1 %v2431_v61  ;;  %v2444_v61 = vld [vmem:[%s3304_s5 + $0x30] sm:$0xff]  }
  0x37   : > { %719 = vmatmul.mubr.bf16.gmra.mrb[4].mxu0 %v452_v46  ;;  %2259 = vmatprep.subr.bf16.mxu1 %v2432_v1  ;;  %v447_v46 = vld [vmem:[%s2728_s29 + $0x1b8] sm:$0xff] }
  0x38   : > { %726 = vmatprep.mubr.bf16.mxu0 %v456_v49  ;;  %v477_v48 = vpack.c.bf16 %v447_v46, %v447_v46  ;;  %v446_v49 = vld [vmem:[%s2728_s29 + $0x1b0] sm:$0xff]  ;;  %s2492_s29 = scalar_lea.vmem %s3251_s13, 2432 }
  0x39   : > { %2240 = vmatmul.mubr.bf16.gmra.mrb[4].mxu1 %v460_v53  ;;  %v476_v50 = vpack.c.bf16 %v446_v49, %v446_v49  ;;  %v2436_v53 = vld [vmem:[%s3302_s3 + $0x30] sm:$0xff]   ;;  %p2493_p11 = scmp.ne.s32.totalorder %s3251_s13, %s2492_s29  ;;  %p2500_p1 = scmp.lt.s32.totalorder %s2498_s25, %s2492_s29 }
  0x3a   : > { %2243 = vmatprep.mubr.bf16.mxu1 %v463_v57  ;;  %2260 = vmatpush3.bf16.msra.mxu1 %v2432_v1  ;;  %v2440_v57 = vld [vmem:[%s3304_s5 + $0x10] sm:$0xff]  }
  0x3b   : > { %2261 = vmatprep.subr.bf16.mxu1 %v2433_v6  ;;  %2295 = vmatprep.subr.bf16.mxu0 %v2440_v57  ;;  %p2494_p12 = pnand %p2493_p11, %p2657_p5  ;;  %p2501_p2 = por %p2500_p1, %p2499_p0 }
  0x3c   : > { %2296 = vmatpush3.bf16.msra.mxu0 %v2440_v57 }
  0x3d   : > { %2297 = vmatprep.subr.bf16.mxu0 %v2441_v58  ;;  %p2495_p13 = pneg %p2494_p12 }
  0x3e   : > { %2262 = vmatpush3.bf16.msra.mxu1 %v2433_v6 }
  0x3f   : > { %727 = vmatmul.mubr.bf16.gmra.mrb[8].mxu0 %v455_v0  ;;  %2263 = vmatprep.subr.bf16.mxu1 %v2434_v51  ;;  %v2850_v0 = vld [vmem:[%s3301_s2] ss:$0 sm:$0xff]  ;;  %p2502_p3 = pnand %p2501_p2, %p2495_p13 }
  0x40   : > { %734 = vmatprep.mubr.bf16.mxu0 %v459_v2  ;;  %2298 = vmatpush3.bf16.msra.mxu0 %v2441_v58 }
  0x41   : > { %2244 = vmatmul.mubr.bf16.gmra.mrb[8].mxu1 %v466_v5  ;;  %2299 = vmatprep.subr.bf16.mxu0 %v2442_v59 }
  0x42   : > { %2247 = vmatprep.mubr.bf16.mxu1 %v469_v9  ;;  %2264 = vmatpush3.bf16.msra.mxu1 %v2434_v51 }
  0x43   : > { %2265 = vmatprep.subr.bf16.mxu1 %v2435_v52 }
  0x44   : > { %2300 = vmatpush3.bf16.msra.mxu0 %v2442_v59 }
  0x45   : > { %2301 = vmatprep.subr.bf16.mxu0 %v2443_v60 }
  0x46   : > { %2266 = vmatpush3.bf16.msra.mxu1 %v2435_v52 }
  0x47   : > { %735 = vmatmul.mubr.bf16.gmra.mrb[12].mxu0 %v458_v14  ;;  %2267 = vmatprep.subr.bf16.mxu1 %v2436_v53 }
  0x48   : > { %742 = vmatprep.mubr.bf16.mxu0 %v462_v15  ;;  %2302 = vmatpush3.bf16.msra.mxu0 %v2443_v60 }
  0x49   : > { %2248 = vmatmul.mubr.bf16.gmra.mrb[12].mxu1 %v472_v18  ;;  %2303 = vmatprep.subr.bf16.mxu0 %v2444_v61 }
  0x4a   : > { %2251 = vmatprep.mubr.bf16.mxu1 %v475_v19  ;;  %2268 = vmatpush3.bf16.msra.mxu1 %v2436_v53 }
  0x4b   : > { %2269 = vmatprep.subr.bf16.mxu1 %v2437_v54 }
  0x4c   : > { %2304 = vmatpush3.bf16.msra.mxu0 %v2444_v61 }
  0x4e   : > { %2270 = vmatpush3.bf16.msra.mxu1 %v2437_v54 }
  0x4f   : > { %743 = vmatmul.mubr.bf16.gmra.mrb[16].mxu0 %v461_v22 }
  0x50   : > { %750 = vmatprep.mubr.bf16.mxu0 %v465_v24 }
  0x51   : > { %2252 = vmatmul.mubr.bf16.gmra.mrb[16].mxu1 %v478_v25 }
  0x57   : > { %751 = vmatmul.mubr.bf16.gmra.mrb[20].mxu0 %v464_v30 }
  0x58   : > { %758 = vmatprep.mubr.bf16.mxu0 %v468_v31 }
  0x5f   : > { %759 = vmatmul.mubr.bf16.gmra.mrb[24].mxu0 %v467_v36 }
  0x60   : > { %766 = vmatprep.mubr.bf16.mxu0 %v471_v37 }
  0x67   : > { %767 = vmatmul.mubr.bf16.gmra.mrb[28].mxu0 %v470_v42 }
  0x68   : > { %774 = vmatprep.mubr.bf16.mxu0 %v474_v43 }
  0x6f   : > { %775 = vmatmul.mubr.bf16.gmra.mrb[32].mxu0 %v473_v47 }
  0x70   : > { %782 = vmatprep.mubr.bf16.mxu0 %v477_v48 }
  0x77   : > { %783 = vmatmul.mubr.bf16.gmra.mrb[36].mxu0 %v476_v50 }
 0x102   : > { %v2087_v62 = vpop.f32.mrb[0].mxu0 }
 0x103   : > { %v2088_v63 = vpop.f32.mrb[1].mxu0 }
 0x104   : > { %v2089_v1 = vadd.f32 %v2088_v63, %v2087_v62  ;;  %v2090_v2 = vpop.f32.mrb[2].mxu0  ;;  %v2237_v4 = vpop.f32.mrb[0].mxu1 }
 0x105   : > { %v2091_v3 = vpop.f32.mrb[3].mxu0  ;;  %v824_v7 = vpop.f32.mrb[1].mxu1 }
 0x106   : > { %v2092_v5 = vadd.f32 %v2091_v3, %v2090_v2  ;;  %v713_v6 = vadd.f32 %v2089_v1, %v2850_v0  ;;  %v2238_v8 = vpop.f32.mrb[2].mxu1 }
 0x107   : > { %v827_v11 = vpop.f32.mrb[3].mxu1 }
 0x108   : > { %v825_v9 = vadd.f32 %v824_v7, %v713_v6  ;;  %v716_v10 = vadd.f32 %v2092_v5, %v2850_v0 }
 0x10a   : > { %v902_v12 = vmul.f32 0.01, %v825_v9  ;;  %v828_v13 = vadd.f32 %v827_v11, %v716_v10  ;;  %v2093_v14 = vpop.f32.mrb[4].mxu0 }
 0x10b   : > { %v2094_v15 = vpop.f32.mrb[5].mxu0 }
 0x10c   : > { %v903_v16 = vmul.f32 0.01, %v828_v13  ;;  %v2095_v17 = vadd.f32 %v2094_v15, %v2093_v14  ;;  %v2096_v18 = vpop.f32.mrb[6].mxu0  ;;  %v2241_v20 = vpop.f32.mrb[4].mxu1  ;;  %v921_v21 = vmax.f32 %v825_v9, %v902_v12 }
 0x10d   : > { %v2097_v19 = vpop.f32.mrb[7].mxu0  ;;  %v840_v25 = vpop.f32.mrb[5].mxu1 }
 0x10e   : > { %v922_v22 = vmax.f32 %v828_v13, %v903_v16  ;;  %v721_v23 = vadd.f32 %v2095_v17, %v2850_v0  ;;  %v2098_v24 = vadd.f32 %v2097_v19, %v2096_v18  ;;  %v2242_v26 = vpop.f32.mrb[6].mxu1 }
 0x10f   : > { %v843_v30 = vpop.f32.mrb[7].mxu1 }
 0x110   : > { %v833_v27 = vadd.f32 %v2237_v4, %v721_v23  ;;  %v724_v28 = vadd.f32 %v2098_v24, %v2850_v0  ;;  %v940_v29 = vpack.c.bf16 %v922_v22, %v921_v21 }
 0x112   : > { %v904_v31 = vmul.f32 0.01, %v833_v27  ;;  %v836_v32 = vadd.f32 %v2238_v8, %v724_v28  ;;  %v2099_v33 = vpop.f32.mrb[8].mxu0  ;;  %2271 = vmatprep.mubr.bf16.mxu1 %v940_v29 }
 0x113   : > { %v2100_v34 = vpop.f32.mrb[9].mxu0 }
 0x114   : > { %v905_v35 = vmul.f32 0.01, %v836_v32  ;;  %v2101_v36 = vadd.f32 %v2100_v34, %v2099_v33  ;;  %v2102_v37 = vpop.f32.mrb[10].mxu0  ;;  %v2856_v39 = vpop.f32.mrb[8].mxu1  ;;  %v923_v40 = vmax.f32 %v833_v27, %v904_v31 }
 0x115   : > { %v2103_v38 = vpop.f32.mrb[11].mxu0  ;;  %v856_v44 = vpop.f32.mrb[9].mxu1 }
 0x116   : > { %v924_v41 = vmax.f32 %v836_v32, %v905_v35  ;;  %v2104_v42 = vadd.f32 %v2103_v38, %v2102_v37  ;;  %v729_v43 = vadd.f32 %v2101_v36, %v2850_v0  ;;  %v2246_v45 = vpop.f32.mrb[10].mxu1 }
 0x117   : > { %v859_v49 = vpop.f32.mrb[11].mxu1 }
 0x118   : > { %v941_v46 = vpack.c.bf16 %v924_v41, %v923_v40  ;;  %v841_v47 = vadd.f32 %v840_v25, %v729_v43  ;;  %v732_v48 = vadd.f32 %v2104_v42, %v2850_v0 }
 0x11a   : > { %v906_v50 = vmul.f32 0.01, %v841_v47  ;;  %v844_v51 = vadd.f32 %v843_v30, %v732_v48  ;;  %v2105_v52 = vpop.f32.mrb[12].mxu0  ;;  %2272 = vmatmul.mubr.bf16.vlgmr.msra.gmra.mrb[20].mxu1 %v941_v46 }
 0x11b   : > { %v2106_v53 = vpop.f32.mrb[13].mxu0 }
 0x11c   : > { %v907_v54 = vmul.f32 0.01, %v844_v51  ;;  %v2107_v55 = vadd.f32 %v2106_v53, %v2105_v52  ;;  %v2108_v56 = vpop.f32.mrb[14].mxu0  ;;  %v2860_v58 = vpop.f32.mrb[12].mxu1  ;;  %v925_v59 = vmax.f32 %v841_v47, %v906_v50 }
 0x11d   : > { %v2109_v57 = vpop.f32.mrb[15].mxu0  ;;  %v872_v63 = vpop.f32.mrb[13].mxu1 }
 0x11e   : > { %v926_v60 = vmax.f32 %v844_v51, %v907_v54  ;;  %v737_v61 = vadd.f32 %v2107_v55, %v2850_v0  ;;  %v2110_v62 = vadd.f32 %v2109_v57, %v2108_v56  ;;  %v2863_v1 = vpop.f32.mrb[14].mxu1 }
 0x11f   : > { %v875_v5 = vpop.f32.mrb[15].mxu1 }
 0x120   : > { %v849_v2 = vadd.f32 %v2241_v20, %v737_v61  ;;  %v740_v3 = vadd.f32 %v2110_v62, %v2850_v0  ;;  %v942_v4 = vpack.c.bf16 %v926_v60, %v925_v59 }
 0x122   : > { %v908_v6 = vmul.f32 0.01, %v849_v2  ;;  %v852_v7 = vadd.f32 %v2242_v26, %v740_v3  ;;  %v2111_v8 = vpop.f32.mrb[16].mxu0  ;;  %2275 = vmatprep.mubr.bf16.mxu1 %v942_v4 }
 0x123   : > { %v2112_v9 = vpop.f32.mrb[17].mxu0 }
 0x124   : > { %v909_v10 = vmul.f32 0.01, %v852_v7  ;;  %v2113_v11 = vadd.f32 %v2112_v9, %v2111_v8  ;;  %v2114_v12 = vpop.f32.mrb[18].mxu0  ;;  %v2866_v14 = vpop.f32.mrb[16].mxu1  ;;  %v927_v17 = vmax.f32 %v849_v2, %v908_v6 }
 0x125   : > { %v2115_v13 = vpop.f32.mrb[19].mxu0  ;;  %v2869_v19 = vpop.f32.mrb[17].mxu1 }
 0x126   : > { %v2116_v15 = vadd.f32 %v2115_v13, %v2114_v12  ;;  %v745_v16 = vadd.f32 %v2113_v11, %v2850_v0  ;;  %v928_v18 = vmax.f32 %v852_v7, %v909_v10  ;;  %v2254_v20 = vpop.f32.mrb[18].mxu1 }
 0x127   : > { %v2872_v24 = vpop.f32.mrb[19].mxu1 }
 0x128   : > { %v857_v21 = vadd.f32 %v856_v44, %v745_v16  ;;  %v748_v22 = vadd.f32 %v2116_v15, %v2850_v0  ;;  %v943_v23 = vpack.c.bf16 %v928_v18, %v927_v17 }
 0x12a   : > { %v910_v25 = vmul.f32 0.01, %v857_v21  ;;  %v860_v26 = vadd.f32 %v859_v49, %v748_v22  ;;  %v2117_v27 = vpop.f32.mrb[20].mxu0  ;;  %2276 = vmatmul.mubr.bf16.gmra.mrb[24].mxu1 %v943_v23 }
 0x12b   : > { %v2118_v28 = vpop.f32.mrb[21].mxu0 }
 0x12c   : > { %v911_v29 = vmul.f32 0.01, %v860_v26  ;;  %v2119_v30 = vadd.f32 %v2118_v28, %v2117_v27  ;;  %v2120_v31 = vpop.f32.mrb[22].mxu0  ;;  %v929_v33 = vmax.f32 %v857_v21, %v910_v25 }
 0x12d   : > { %v2121_v32 = vpop.f32.mrb[23].mxu0 }
 0x12e   : > { %v930_v34 = vmax.f32 %v860_v26, %v911_v29  ;;  %v753_v35 = vadd.f32 %v2119_v30, %v2850_v0  ;;  %v2122_v36 = vadd.f32 %v2121_v32, %v2120_v31 }
 0x130   : > { %v865_v37 = vadd.f32 %v2856_v39, %v753_v35  ;;  %v756_v38 = vadd.f32 %v2122_v36, %v2850_v0  ;;  %v944_v40 = vpack.c.bf16 %v930_v34, %v929_v33 }
 0x132   : > { %v912_v41 = vmul.f32 0.01, %v865_v37  ;;  %v868_v42 = vadd.f32 %v2246_v45, %v756_v38  ;;  %v2123_v43 = vpop.f32.mrb[24].mxu0  ;;  %2279 = vmatprep.mubr.bf16.mxu1 %v944_v40 }
 0x133   : > { %v2124_v44 = vpop.f32.mrb[25].mxu0 }
 0x134   : > { %v913_v46 = vmul.f32 0.01, %v868_v42  ;;  %v2125_v47 = vadd.f32 %v2124_v44, %v2123_v43  ;;  %v2126_v48 = vpop.f32.mrb[26].mxu0  ;;  %v931_v52 = vmax.f32 %v865_v37, %v912_v41  ;;  %v2446_v41 = vld [vmem:[%s3306_s7] sm:$0xff]   ;;  %v2451_v44 = vld [vmem:[%s3306_s7 + $0x28] sm:$0xff]  }
 0x135   : > { %v2127_v49 = vpop.f32.mrb[27].mxu0  ;;  %2327 = vmatprep.subr.bf16.mxu1 %v2446_v41  ;;  %v2450_v43 = vld [vmem:[%s3306_s7 + $0x20] sm:$0xff]  }
 0x136   : > { %v2128_v50 = vadd.f32 %v2127_v49, %v2126_v48  ;;  %v761_v51 = vadd.f32 %v2125_v47, %v2850_v0  ;;  %v932_v53 = vmax.f32 %v868_v42, %v913_v46  ;;  %2328 = vmatpush3.bf16.msra.mxu1 %v2446_v41  ;;  %v2449_v42 = vld [vmem:[%s3306_s7 + $0x18] sm:$0xff]   ;;  %v2913_v46 = vld [vmem:[%s3303_s4] ss:$0 sm:$0xff] }
 0x138   : > { %v873_v54 = vadd.f32 %v872_v63, %v761_v51  ;;  %v764_v39 = vadd.f32 %v2128_v50, %v2850_v0  ;;  %v945_v55 = vpack.c.bf16 %v932_v53, %v931_v52 }
 0x13a   : > { %v914_v56 = vmul.f32 0.01, %v873_v54  ;;  %v876_v57 = vadd.f32 %v875_v5, %v764_v39  ;;  %v2129_v59 = vpop.f32.mrb[28].mxu0  ;;  %2280 = vmatmul.mubr.bf16.gmra.mrb[28].mxu1 %v945_v55 }
 0x13b   : > { %v2130_v45 = vpop.f32.mrb[29].mxu0 }
 0x13c   : > { %v915_v60 = vmul.f32 0.01, %v876_v57  ;;  %v2131_v61 = vadd.f32 %v2130_v45, %v2129_v59  ;;  %v2132_v62 = vpop.f32.mrb[30].mxu0  ;;  %v933_v3 = vmax.f32 %v873_v54, %v914_v56 }
 0x13d   : > { %v2133_v2 = vpop.f32.mrb[31].mxu0 }
 0x13e   : > { %v934_v4 = vmax.f32 %v876_v57, %v915_v60  ;;  %v769_v6 = vadd.f32 %v2131_v61, %v2850_v0  ;;  %v2134_v7 = vadd.f32 %v2133_v2, %v2132_v62 }
 0x140   : > { %v881_v8 = vadd.f32 %v2860_v58, %v769_v6  ;;  %v772_v63 = vadd.f32 %v2134_v7, %v2850_v0  ;;  %v946_v9 = vpack.c.bf16 %v934_v4, %v933_v3 }
 0x142   : > { %v916_v10 = vmul.f32 0.01, %v881_v8  ;;  %v884_v5 = vadd.f32 %v2863_v1, %v772_v63  ;;  %v2135_v11 = vpop.f32.mrb[32].mxu0  ;;  %2283 = vmatprep.mubr.bf16.mxu1 %v946_v9 }
 0x143   : > { %v2136_v12 = vpop.f32.mrb[33].mxu0 }
 0x144   : > { %v917_v13 = vmul.f32 0.01, %v884_v5  ;;  %v2137_v15 = vadd.f32 %v2136_v12, %v2135_v11  ;;  %v2138_v16 = vpop.f32.mrb[34].mxu0  ;;  %v935_v21 = vmax.f32 %v881_v8, %v916_v10 }
 0x145   : > { %v2139_v17 = vpop.f32.mrb[35].mxu0 }
 0x146   : > { %v2140_v18 = vadd.f32 %v2139_v17, %v2138_v16  ;;  %v777_v20 = vadd.f32 %v2137_v15, %v2850_v0  ;;  %v936_v22 = vmax.f32 %v884_v5, %v917_v13 }
 0x148   : > { %v889_v58 = vadd.f32 %v2869_v19, %v777_v20  ;;  %v780_v23 = vadd.f32 %v2140_v18, %v2850_v0  ;;  %v947_v25 = vpack.c.bf16 %v936_v22, %v935_v21 }
 0x14a   : > { %v918_v26 = vmul.f32 0.01, %v889_v58  ;;  %v892_v1 = vadd.f32 %v2872_v24, %v780_v23  ;;  %v2141_v27 = vpop.f32.mrb[36].mxu0  ;;  %2284 = vmatmul.mubr.bf16.gmra.mrb[32].mxu1 %v947_v25  ;;  %v2445_v24 = vld [vmem:[%s3304_s5 + $0x38] sm:$0xff]  }
 0x14b   : > { %v2142_v28 = vpop.f32.mrb[37].mxu0  ;;  %2305 = vmatprep.subr.bf16.mxu0 %v2445_v24 }
 0x14c   : > { %v919_v29 = vmul.f32 0.01, %v892_v1  ;;  %v2143_v30 = vadd.f32 %v2142_v28, %v2141_v27  ;;  %v2144_v31 = vpop.f32.mrb[38].mxu0  ;;  %v937_v33 = vmax.f32 %v889_v58, %v918_v26  ;;  %2306 = vmatpush3.bf16.msra.mxu0 %v2445_v24 }
 0x14d   : > { %v2145_v32 = vpop.f32.mrb[39].mxu0 }
 0x14e   : > { %v938_v34 = vmax.f32 %v892_v1, %v919_v29  ;;  %v785_v35 = vadd.f32 %v2143_v30, %v2850_v0  ;;  %v2447_v0 = vld [vmem:[%s3306_s7 + $0x8] sm:$0xff]  }
 0x14f   : > { %2329 = vmatprep.subr.bf16.mxu1 %v2447_v0 }
 0x150   : > { %v897_v36 = vadd.f32 %v2866_v14, %v785_v35  ;;  %v948_v19 = vpack.c.bf16 %v938_v34, %v937_v33  ;;  %v2448_v14 = vld [vmem:[%s3306_s7 + $0x10] sm:$0xff]   ;;  %2330 = vmatpush3.bf16.msra.mxu1 %v2447_v0 }
 0x151   : > { %2331 = vmatprep.subr.bf16.mxu1 %v2448_v14 }
 0x152   : > { %2287 = vmatprep.mubr.bf16.mxu1 %v948_v19  ;;  %v920_v37 = vmul.f32 0.01, %v897_v36 }
 0x154   : > { %v939_v38 = vmax.f32 %v897_v36, %v920_v37  ;;  %2332 = vmatpush3.bf16.msra.mxu1 %v2448_v14 }
 0x155   : > { %2333 = vmatprep.subr.bf16.mxu1 %v2449_v42 }
 0x156   : > { %v949_v40 = vpack.c.bf16 %v939_v38, %v939_v38 }
 0x158   : > { %2288 = vmatmul.mubr.bf16.gmra.mrb[36].mxu1 %v949_v40 }
 0x159   : > { %2334 = vmatpush3.bf16.msra.mxu1 %v2449_v42 }
 0x15a   : > { %2335 = vmatprep.subr.bf16.mxu1 %v2450_v43 }
 0x15d   : > { %2336 = vmatpush3.bf16.msra.mxu1 %v2450_v43 }
 0x15e   : > { %2337 = vmatprep.subr.bf16.mxu1 %v2451_v44 }
 0x161   : > { %2338 = vmatpush3.bf16.msra.mxu1 %v2451_v44 }
 0x1ed   : > { %v2273_v47 = vpop.f32.mrb[20].mxu1 }
 0x1ee   : > { %v1064_v48 = vadd.f32 %v2273_v47, %v2913_v46  ;;  %v1055_v49 = vpop.f32.mrb[21].mxu1 }
 0x1ef   : > { %v1056_v50 = vadd.f32 %v2913_v46, %v1055_v49  ;;  %v2274_v51 = vpop.f32.mrb[22].mxu1 }
 0x1f0   : > { %v1135_v52 = vmul.f32 0.01, %v1064_v48  ;;  %v1067_v53 = vadd.f32 %v2274_v51, %v2913_v46  ;;  %v1058_v54 = vpop.f32.mrb[23].mxu1 }
 0x1f1   : > { %v1133_v39 = vmul.f32 0.01, %v1056_v50  ;;  %v1059_v55 = vadd.f32 %v2913_v46, %v1058_v54 }
 0x1f2   : > { %v1136_v56 = vmul.f32 0.01, %v1067_v53  ;;  %v1154_v59 = vmax.f32 %v1064_v48, %v1135_v52 }
 0x1f3   : > { %v1134_v57 = vmul.f32 0.01, %v1059_v55  ;;  %v1152_v60 = vmax.f32 %v1056_v50, %v1133_v39 }
 0x1f4   : > { %v1155_v45 = vmax.f32 %v1067_v53, %v1136_v56 }
 0x1f5   : > { %v1153_v61 = vmax.f32 %v1059_v55, %v1134_v57 }
 0x1f6   : > { %v1172_v62 = vpack.c.bf16 %v1155_v45, %v1154_v59 }
 0x1f7   : > { %v1171_v2 = vpack.c.bf16 %v1153_v61, %v1152_v60 }
 0x1f9   : > { %2307 = vmatprep.mubr.bf16.mxu0 %v1171_v2 }
 0x1fa   : > { %2308 = vmatmul.mubr.bf16.vlgmr.msra.gmra.mrb[40].mxu0 %v1172_v62 }
 0x1fd   : > { %v2277_v3 = vpop.f32.mrb[24].mxu1 }
 0x1fe   : > { %v1080_v4 = vadd.f32 %v2277_v3, %v2913_v46  ;;  %v1071_v6 = vpop.f32.mrb[25].mxu1 }
 0x1ff   : > { %v1072_v7 = vadd.f32 %v2913_v46, %v1071_v6  ;;  %v2278_v8 = vpop.f32.mrb[26].mxu1 }
 0x200   : > { %v1139_v63 = vmul.f32 0.01, %v1080_v4  ;;  %v1083_v9 = vadd.f32 %v2278_v8, %v2913_v46  ;;  %v1074_v10 = vpop.f32.mrb[27].mxu1 }
 0x201   : > { %v1137_v5 = vmul.f32 0.01, %v1072_v7  ;;  %v1075_v11 = vadd.f32 %v2913_v46, %v1074_v10  ;;  %v2453_v10 = vld [vmem:[%s3306_s7 + $0x38] sm:$0xff]  }
 0x202   : > { %v1140_v12 = vmul.f32 0.01, %v1083_v9  ;;  %v1158_v15 = vmax.f32 %v1080_v4, %v1139_v63 }
 0x203   : > { %v1138_v13 = vmul.f32 0.01, %v1075_v11  ;;  %v1156_v17 = vmax.f32 %v1072_v7, %v1137_v5 }
 0x204   : > { %v1159_v16 = vmax.f32 %v1083_v9, %v1140_v12  ;;  %v2452_v9 = vld [vmem:[%s3306_s7 + $0x30] sm:$0xff]  }
 0x205   : > { %v1157_v18 = vmax.f32 %v1075_v11, %v1138_v13  ;;  %2339 = vmatprep.subr.bf16.mxu1 %v2452_v9 }
 0x206   : > { %v1174_v20 = vpack.c.bf16 %v1159_v16, %v1158_v15  ;;  %2340 = vmatpush3.bf16.msra.mxu1 %v2452_v9 }
 0x207   : > { %v1173_v21 = vpack.c.bf16 %v1157_v18, %v1156_v17  ;;  %2341 = vmatprep.subr.bf16.mxu1 %v2453_v10 }
 0x209   : > { %2311 = vmatprep.mubr.bf16.mxu0 %v1173_v21 }
 0x20a   : > { %2312 = vmatmul.mubr.bf16.gmra.mrb[44].mxu0 %v1174_v20  ;;  %2342 = vmatpush3.bf16.msra.mxu1 %v2453_v10 }
 0x20d   : > { %v2281_v22 = vpop.f32.mrb[28].mxu1 }
 0x20e   : > { %v1096_v58 = vadd.f32 %v2281_v22, %v2913_v46  ;;  %v1087_v23 = vpop.f32.mrb[29].mxu1 }
 0x20f   : > { %v1088_v25 = vadd.f32 %v2913_v46, %v1087_v23  ;;  %v2282_v26 = vpop.f32.mrb[30].mxu1 }
 0x210   : > { %v1143_v1 = vmul.f32 0.01, %v1096_v58  ;;  %v1099_v27 = vadd.f32 %v2282_v26, %v2913_v46  ;;  %v1090_v28 = vpop.f32.mrb[31].mxu1 }
 0x211   : > { %v1141_v29 = vmul.f32 0.01, %v1088_v25  ;;  %v1091_v30 = vadd.f32 %v2913_v46, %v1090_v28 }
 0x212   : > { %v1144_v31 = vmul.f32 0.01, %v1099_v27  ;;  %v1162_v33 = vmax.f32 %v1096_v58, %v1143_v1 }
 0x213   : > { %v1142_v32 = vmul.f32 0.01, %v1091_v30  ;;  %v1160_v35 = vmax.f32 %v1088_v25, %v1141_v29 }
 0x214   : > { %v1163_v34 = vmax.f32 %v1099_v27, %v1144_v31 }
 0x215   : > { %v1161_v36 = vmax.f32 %v1091_v30, %v1142_v32 }
 0x216   : > { %v1176_v19 = vpack.c.bf16 %v1163_v34, %v1162_v33 }
 0x217   : > { %v1175_v37 = vpack.c.bf16 %v1161_v36, %v1160_v35 }
 0x219   : > { %2315 = vmatprep.mubr.bf16.mxu0 %v1175_v37 }
 0x21a   : > { %2316 = vmatmul.mubr.bf16.gmra.mrb[48].mxu0 %v1176_v19 }
 0x21d   : > { %v2285_v38 = vpop.f32.mrb[32].mxu1 }
 0x21e   : > { %v1112_v40 = vadd.f32 %v2285_v38, %v2913_v46  ;;  %v1103_v24 = vpop.f32.mrb[33].mxu1 }
 0x21f   : > { %v1104_v41 = vadd.f32 %v2913_v46, %v1103_v24  ;;  %v2286_v0 = vpop.f32.mrb[34].mxu1 }
 0x220   : > { %v1147_v14 = vmul.f32 0.01, %v1112_v40  ;;  %v1115_v42 = vadd.f32 %v2286_v0, %v2913_v46  ;;  %v1106_v43 = vpop.f32.mrb[35].mxu1 }
 0x221   : > { %v1145_v44 = vmul.f32 0.01, %v1104_v41  ;;  %v1107_v47 = vadd.f32 %v2913_v46, %v1106_v43 }
 0x222   : > { %v1148_v48 = vmul.f32 0.01, %v1115_v42  ;;  %v1166_v50 = vmax.f32 %v1112_v40, %v1147_v14 }
 0x223   : > { %v1146_v49 = vmul.f32 0.01, %v1107_v47  ;;  %v1164_v52 = vmax.f32 %v1104_v41, %v1145_v44 }
 0x224   : > { %v1167_v51 = vmax.f32 %v1115_v42, %v1148_v48 }
 0x225   : > { %v1165_v53 = vmax.f32 %v1107_v47, %v1146_v49 }
 0x226   : > { %v1178_v54 = vpack.c.bf16 %v1167_v51, %v1166_v50 }
 0x227   : > { %v1177_v39 = vpack.c.bf16 %v1165_v53, %v1164_v52 }
 0x229   : > { %2319 = vmatprep.mubr.bf16.mxu0 %v1177_v39 }
 0x22a   : > { %2320 = vmatmul.mubr.bf16.gmra.mrb[52].mxu0 %v1178_v54 }
 0x22b   : > { %v2289_v55 = vpop.f32.mrb[36].mxu1 }
 0x22c   : > { %v1128_v56 = vadd.f32 %v2289_v55, %v2913_v46  ;;  %v1119_v57 = vpop.f32.mrb[37].mxu1 }
 0x22d   : > { %v1120_v59 = vadd.f32 %v2913_v46, %v1119_v57  ;;  %v2290_v45 = vpop.f32.mrb[38].mxu1 }
 0x22e   : > { %v1151_v60 = vmul.f32 0.01, %v1128_v56  ;;  %v1122_v61 = vpop.f32.mrb[39].mxu1 }
 0x22f   : > { %v1149_v62 = vmul.f32 0.01, %v1120_v59  ;;  %v1123_v2 = vadd.f32 %v2913_v46, %v1122_v61  ;;  %v2943_v46 = vld [vmem:[%s3305_s6] ss:$0 sm:$0xff] }
 0x230   : > { %v1170_v4 = vmax.f32 %v1128_v56, %v1151_v60 }
 0x231   : > { %v1150_v3 = vmul.f32 0.01, %v1123_v2  ;;  %v1168_v6 = vmax.f32 %v1120_v59, %v1149_v62 }
 0x232   : > { %v1180_v63 = vpack.c.bf16 %v1170_v4, %v1170_v4 }
 0x233   : > { %v1169_v7 = vmax.f32 %v1123_v2, %v1150_v3 }
 0x235   : > { %v1179_v8 = vpack.c.bf16 %v1169_v7, %v1168_v6 }
 0x237   : > { %2323 = vmatprep.mubr.bf16.mxu0 %v1179_v8 }
 0x238   : > { %2324 = vmatmul.mubr.bf16.gmra.mrb[56].mxu0 %v1180_v63 }
 0x2cd   : > { %v2309_v5 = vpop.f32.mrb[40].mxu0 }
 0x2ce   : > { %v1295_v11 = vadd.f32 %v2309_v5, %v2943_v46  ;;  %v1286_v12 = vpop.f32.mrb[41].mxu0 }
 0x2cf   : > { %v1287_v13 = vadd.f32 %v2943_v46, %v1286_v12  ;;  %v2310_v15 = vpop.f32.mrb[42].mxu0 }
 0x2d0   : > { %v1366_v16 = vmul.f32 0.01, %v1295_v11  ;;  %v1298_v17 = vadd.f32 %v2310_v15, %v2943_v46  ;;  %v1289_v18 = vpop.f32.mrb[43].mxu0 }
 0x2d1   : > { %v1364_v20 = vmul.f32 0.01, %v1287_v13  ;;  %v1290_v21 = vadd.f32 %v2943_v46, %v1289_v18 }
 0x2d2   : > { %v1367_v22 = vmul.f32 0.01, %v1298_v17  ;;  %v1385_v23 = vmax.f32 %v1295_v11, %v1366_v16 }
 0x2d3   : > { %v1365_v58 = vmul.f32 0.01, %v1290_v21  ;;  %v1383_v26 = vmax.f32 %v1287_v13, %v1364_v20 }
 0x2d4   : > { %v1386_v25 = vmax.f32 %v1298_v17, %v1367_v22 }
 0x2d5   : > { %v1384_v1 = vmax.f32 %v1290_v21, %v1365_v58 }
 0x2d6   : > { %v1403_v27 = vpack.c.bf16 %v1386_v25, %v1385_v23 }
 0x2d7   : > { %v1402_v28 = vpack.c.bf16 %v1384_v1, %v1383_v26 }
 0x2d9   : > { %2343 = vmatprep.mubr.bf16.mxu1 %v1402_v28 }
 0x2da   : > { %2344 = vmatmul.mubr.bf16.vlgmr.msra.gmra.mrb[40].mxu1 %v1403_v27 }
 0x2dd   : > { %v2313_v29 = vpop.f32.mrb[44].mxu0 }
 0x2de   : > { %v1311_v30 = vadd.f32 %v2313_v29, %v2943_v46  ;;  %v1302_v31 = vpop.f32.mrb[45].mxu0 }
 0x2df   : > { %v1303_v32 = vadd.f32 %v2943_v46, %v1302_v31  ;;  %v2314_v33 = vpop.f32.mrb[46].mxu0 }
 0x2e0   : > { %v1370_v34 = vmul.f32 0.01, %v1311_v30  ;;  %v1314_v35 = vadd.f32 %v2314_v33, %v2943_v46  ;;  %v1305_v36 = vpop.f32.mrb[47].mxu0 }
 0x2e1   : > { %v1368_v19 = vmul.f32 0.01, %v1303_v32  ;;  %v1306_v37 = vadd.f32 %v2943_v46, %v1305_v36 }
 0x2e2   : > { %v1371_v38 = vmul.f32 0.01, %v1314_v35  ;;  %v1389_v24 = vmax.f32 %v1311_v30, %v1370_v34 }
 0x2e3   : > { %v1369_v40 = vmul.f32 0.01, %v1306_v37  ;;  %v1387_v0 = vmax.f32 %v1303_v32, %v1368_v19 }
 0x2e4   : > { %v1390_v41 = vmax.f32 %v1314_v35, %v1371_v38  ;;  %v2967_v35 = vld [vmem:[%s3307_s8] ss:$0 sm:$0xff] }
 0x2e5   : > { %v1388_v14 = vmax.f32 %v1306_v37, %v1369_v40 }
 0x2e6   : > { %v1405_v42 = vpack.c.bf16 %v1390_v41, %v1389_v24 }
 0x2e7   : > { %v1404_v43 = vpack.c.bf16 %v1388_v14, %v1387_v0 }
 0x2e9   : > { %2347 = vmatprep.mubr.bf16.mxu1 %v1404_v43 }
 0x2ea   : > { %2348 = vmatmul.mubr.bf16.gmra.mrb[44].mxu1 %v1405_v42 }
 0x2ed   : > { %v2317_v44 = vpop.f32.mrb[48].mxu0 }
 0x2ee   : > { %v1327_v47 = vadd.f32 %v2317_v44, %v2943_v46  ;;  %v1318_v48 = vpop.f32.mrb[49].mxu0 }
 0x2ef   : > { %v1319_v49 = vadd.f32 %v2943_v46, %v1318_v48  ;;  %v2318_v50 = vpop.f32.mrb[50].mxu0 }
 0x2f0   : > { %v1374_v51 = vmul.f32 0.01, %v1327_v47  ;;  %v1330_v52 = vadd.f32 %v2318_v50, %v2943_v46  ;;  %v1321_v53 = vpop.f32.mrb[51].mxu0 }
 0x2f1   : > { %v1372_v54 = vmul.f32 0.01, %v1319_v49  ;;  %v1322_v39 = vadd.f32 %v2943_v46, %v1321_v53 }
 0x2f2   : > { %v1375_v55 = vmul.f32 0.01, %v1330_v52  ;;  %v1393_v57 = vmax.f32 %v1327_v47, %v1374_v51 }
 0x2f3   : > { %v1373_v56 = vmul.f32 0.01, %v1322_v39  ;;  %v1391_v45 = vmax.f32 %v1319_v49, %v1372_v54 }
 0x2f4   : > { %v1394_v59 = vmax.f32 %v1330_v52, %v1375_v55 }
 0x2f5   : > { %v1392_v60 = vmax.f32 %v1322_v39, %v1373_v56 }
 0x2f6   : > { %v1407_v61 = vpack.c.bf16 %v1394_v59, %v1393_v57 }
 0x2f7   : > { %v1406_v62 = vpack.c.bf16 %v1392_v60, %v1391_v45 }
 0x2f9   : > { %2351 = vmatprep.mubr.bf16.mxu1 %v1406_v62 }
 0x2fa   : > { %2352 = vmatmul.mubr.bf16.gmra.mrb[48].mxu1 %v1407_v61 }
 0x2fd   : > { %v2321_v2 = vpop.f32.mrb[52].mxu0 }
 0x2fe   : > { %v1343_v3 = vadd.f32 %v2321_v2, %v2943_v46  ;;  %v1334_v4 = vpop.f32.mrb[53].mxu0 }
 0x2ff   : > { %v1335_v6 = vadd.f32 %v2943_v46, %v1334_v4  ;;  %v2322_v7 = vpop.f32.mrb[54].mxu0 }
 0x300   : > { %v1378_v8 = vmul.f32 0.01, %v1343_v3  ;;  %v1346_v63 = vadd.f32 %v2322_v7, %v2943_v46  ;;  %v1337_v9 = vpop.f32.mrb[55].mxu0 }
 0x301   : > { %v1376_v10 = vmul.f32 0.01, %v1335_v6  ;;  %v1338_v5 = vadd.f32 %v2943_v46, %v1337_v9 }
 0x302   : > { %v1379_v11 = vmul.f32 0.01, %v1346_v63  ;;  %v1397_v13 = vmax.f32 %v1343_v3, %v1378_v8 }
 0x303   : > { %v1377_v12 = vmul.f32 0.01, %v1338_v5  ;;  %v1395_v16 = vmax.f32 %v1335_v6, %v1376_v10 }
 0x304   : > { %v1398_v15 = vmax.f32 %v1346_v63, %v1379_v11 }
 0x305   : > { %v1396_v17 = vmax.f32 %v1338_v5, %v1377_v12 }
 0x306   : > { %v1409_v18 = vpack.c.bf16 %v1398_v15, %v1397_v13 }
 0x307   : > { %v1408_v20 = vpack.c.bf16 %v1396_v17, %v1395_v16 }
 0x309   : > { %2355 = vmatprep.mubr.bf16.mxu1 %v1408_v20 }
 0x30a   : > { %2356 = vmatmul.mubr.bf16.gmra.mrb[52].mxu1 %v1409_v18 }
 0x30b   : > { %v2325_v21 = vpop.f32.mrb[56].mxu0 }
 0x30c   : > { %v1359_v22 = vadd.f32 %v2325_v21, %v2943_v46  ;;  %v1350_v58 = vpop.f32.mrb[57].mxu0 }
 0x30d   : > { %v1351_v23 = vadd.f32 %v2943_v46, %v1350_v58  ;;  %v2326_v25 = vpop.f32.mrb[58].mxu0 }
 0x30e   : > { %v1382_v26 = vmul.f32 0.01, %v1359_v22  ;;  %v1353_v1 = vpop.f32.mrb[59].mxu0 }
 0x30f   : > { %v1380_v27 = vmul.f32 0.01, %v1351_v23  ;;  %v1354_v28 = vadd.f32 %v2943_v46, %v1353_v1 }
 0x310   : > { %v1401_v30 = vmax.f32 %v1359_v22, %v1382_v26 }
 0x311   : > { %v1381_v29 = vmul.f32 0.01, %v1354_v28  ;;  %v1399_v31 = vmax.f32 %v1351_v23, %v1380_v27 }
 0x312   : > { %v1411_v34 = vpack.c.bf16 %v1401_v30, %v1401_v30 }
 0x313   : > { %v1400_v32 = vmax.f32 %v1354_v28, %v1381_v29 }
 0x315   : > { %v1410_v33 = vpack.c.bf16 %v1400_v32, %v1399_v31 }
 0x317   : > { %2359 = vmatprep.mubr.bf16.mxu1 %v1410_v33 }
 0x318   : > { %2360 = vmatmul.mubr.bf16.gmra.mrb[56].mxu1 %v1411_v34 }
 0x3ad   : > { %v2345_v36 = vpop.f32.mrb[40].mxu1 }
 0x3ae   : > { %v2970_v19 = vadd.f32 %v2345_v36, %v2967_v35  ;;  %v1517_v37 = vpop.f32.mrb[41].mxu1 }
 0x3af   : > { %v2973_v46 = vadd.f32 %v2967_v35, %v1517_v37  ;;  %v2346_v38 = vpop.f32.mrb[42].mxu1 }
 0x3b0   : > { %1599 = vadd.xlane.f32.xlu1 %v2970_v19  ;;  %v1520_v40 = vpop.f32.mrb[43].mxu1  ;;  %v2978_v24 = vadd.f32 %v2346_v38, %v2967_v35  ;;  %v1635_v0 = vmul.f32 %v2970_v19, %v2970_v19 }
 0x3b1   : > { %1595 = vadd.xlane.f32.xlu0 %v2973_v46  ;;  %v2981_v41 = vadd.f32 %v2967_v35, %v1520_v40  ;;  %v1633_v42 = vmul.f32 %v2973_v46, %v2973_v46 }
 0x3b2   : > { %v1636_v14 = vmul.f32 %v2978_v24, %v2978_v24 }
 0x3b3   : > { %v1634_v43 = vmul.f32 %v2981_v41, %v2981_v41 }
 0x3b4   : > { %1601 = vadd.xlane.f32.xlu1 %v2978_v24 }
 0x3b5   : > { %1597 = vadd.xlane.f32.xlu0 %v2981_v41 }
 0x3b8   : > { %1656 = vadd.xlane.f32.xlu1 %v1635_v0 }
 0x3b9   : > { %1658 = vadd.xlane.f32.xlu0 %v1636_v14 }
 0x3bc   : > { %1652 = vadd.xlane.f32.xlu1 %v1633_v42 }
 0x3bd   : > { %v2349_v44 = vpop.f32.mrb[44].mxu1  ;;  %1654 = vadd.xlane.f32.xlu0 %v1634_v43 }
 0x3be   : > { %v2994_v47 = vadd.f32 %v2349_v44, %v2967_v35  ;;  %v1533_v48 = vpop.f32.mrb[45].mxu1 }
 0x3bf   : > { %v2350_v49 = vpop.f32.mrb[46].mxu1  ;;  %v3002_v52 = vadd.f32 %v2967_v35, %v1533_v48 }
 0x3c0   : > { %v2997_v50 = vadd.f32 %v2350_v49, %v2967_v35  ;;  %v1536_v51 = vpop.f32.mrb[47].mxu1  ;;  %v1639_v53 = vmul.f32 %v2994_v47, %v2994_v47 }
 0x3c1   : > { %1607 = vadd.xlane.f32.xlu0 %v2994_v47  ;;  %v3008_v54 = vadd.f32 %v2967_v35, %v1536_v51  ;;  %v1637_v56 = vmul.f32 %v3002_v52, %v3002_v52 }
 0x3c2   : > { %1609 = vadd.xlane.f32.xlu1 %v2997_v50  ;;  %v1640_v39 = vmul.f32 %v2997_v50, %v2997_v50 }
 0x3c3   : > { %v1638_v55 = vmul.f32 %v3008_v54, %v3008_v54 }
 0x3c5   : > { %1603 = vadd.xlane.f32.xlu0 %v3002_v52 }
 0x3c6   : > { %1664 = vadd.xlane.f32.xlu1 %v1639_v53 }
 0x3c9   : > { %1666 = vadd.xlane.f32.xlu0 %v1640_v39 }
 0x3ca   : > { %1605 = vadd.xlane.f32.xlu1 %v3008_v54 }
 0x3cd   : > { %v2353_v57 = vpop.f32.mrb[48].mxu1  ;;  %1662 = vadd.xlane.f32.xlu0 %v1638_v55 }
 0x3ce   : > { %v3018_v59 = vadd.f32 %v2353_v57, %v2967_v35  ;;  %v1549_v45 = vpop.f32.mrb[49].mxu1  ;;  %1660 = vadd.xlane.f32.xlu1 %v1637_v56 }
 0x3cf   : > { %v2354_v60 = vpop.f32.mrb[50].mxu1  ;;  %v3026_v2 = vadd.f32 %v2967_v35, %v1549_v45 }
 0x3d0   : > { %v3021_v61 = vadd.f32 %v2354_v60, %v2967_v35  ;;  %v1552_v62 = vpop.f32.mrb[51].mxu1  ;;  %v1643_v3 = vmul.f32 %v3018_v59, %v3018_v59 }
 0x3d1   : > { %1615 = vadd.xlane.f32.xlu0 %v3018_v59  ;;  %v3032_v4 = vadd.f32 %v2967_v35, %v1552_v62  ;;  %v1641_v8 = vmul.f32 %v3026_v2, %v3026_v2 }
 0x3d2   : > { %1617 = vadd.xlane.f32.xlu1 %v3021_v61  ;;  %v1644_v6 = vmul.f32 %v3021_v61, %v3021_v61 }
 0x3d3   : > { %v1642_v7 = vmul.f32 %v3032_v4, %v3032_v4 }
 0x3d5   : > { %1611 = vadd.xlane.f32.xlu0 %v3026_v2 }
 0x3d6   : > { %1672 = vadd.xlane.f32.xlu1 %v1643_v3 }
 0x3d9   : > { %1674 = vadd.xlane.f32.xlu0 %v1644_v6 }
 0x3da   : > { %1613 = vadd.xlane.f32.xlu1 %v3032_v4 }
 0x3dd   : > { %v2357_v63 = vpop.f32.mrb[52].mxu1  ;;  %1670 = vadd.xlane.f32.xlu0 %v1642_v7 }
 0x3de   : > { %v3042_v9 = vadd.f32 %v2357_v63, %v2967_v35  ;;  %v1565_v10 = vpop.f32.mrb[53].mxu1  ;;  %1668 = vadd.xlane.f32.xlu1 %v1641_v8 }
 0x3df   : > { %v2358_v5 = vpop.f32.mrb[54].mxu1  ;;  %v3050_v13 = vadd.f32 %v2967_v35, %v1565_v10 }
 0x3e0   : > { %v3045_v11 = vadd.f32 %v2358_v5, %v2967_v35  ;;  %v1568_v12 = vpop.f32.mrb[55].mxu1  ;;  %v1647_v15 = vmul.f32 %v3042_v9, %v3042_v9 }
 0x3e1   : > { %1623 = vadd.xlane.f32.xlu0 %v3042_v9  ;;  %v3056_v16 = vadd.f32 %v2967_v35, %v1568_v12  ;;  %v1645_v22 = vmul.f32 %v3050_v13, %v3050_v13 }
 0x3e2   : > { %1625 = vadd.xlane.f32.xlu1 %v3045_v11  ;;  %v1648_v17 = vmul.f32 %v3045_v11, %v3045_v11 }
 0x3e3   : > { %v1646_v20 = vmul.f32 %v3056_v16, %v3056_v16 }
 0x3e5   : > { %1619 = vadd.xlane.f32.xlu0 %v3050_v13 }
 0x3e6   : > { %1680 = vadd.xlane.f32.xlu1 %v1647_v15 }
 0x3e9   : > { %1682 = vadd.xlane.f32.xlu0 %v1648_v17 }
 0x3ea   : > { %1621 = vadd.xlane.f32.xlu1 %v3056_v16 }
 0x3eb   : > { %v2361_v18 = vpop.f32.mrb[56].mxu1 }
 0x3ec   : > { %v1581_v21 = vpop.f32.mrb[57].mxu1  ;;  %v3066_v25 = vadd.f32 %v2361_v18, %v2967_v35 }
 0x3ed   : > { %v2362_v58 = vpop.f32.mrb[58].mxu1  ;;  %1678 = vadd.xlane.f32.xlu0 %v1646_v20  ;;  %v3072_v1 = vadd.f32 %v2967_v35, %v1581_v21 }
 0x3ee   : > { %v1584_v23 = vpop.f32.mrb[59].mxu1  ;;  %1676 = vadd.xlane.f32.xlu1 %v1645_v22  ;;  %v1651_v29 = vmul.f32 %v3066_v25, %v3066_v25 }
 0x3ef   : > { %v3069_v26 = vadd.f32 %v2967_v35, %v1584_v23  ;;  %v1649_v27 = vmul.f32 %v3072_v1, %v3072_v1 }
 0x3f1   : > { %1631 = vadd.xlane.f32.xlu0 %v3066_v25  ;;  %v1650_v28 = vmul.f32 %v3069_v26, %v3069_v26 }
 0x3f2   : > { %1629 = vadd.xlane.f32.xlu1 %v3069_v26 }
 0x3f5   : > { %1627 = vadd.xlane.f32.xlu0 %v3072_v1 }
 0x3f6   : > { %1684 = vadd.xlane.f32.xlu1 %v1649_v27 }
 0x3f9   : > { %1686 = vadd.xlane.f32.xlu0 %v1650_v28 }
 0x3fa   : > { %1688 = vadd.xlane.f32.xlu1 %v1651_v29 }
 0x43d   : > { %v1600_v30 = vpop.xlane.xlu1 %1599 }
 0x43e   : > { %v1596_v31 = vpop.xlane.xlu0 %1595  ;;  %v1692_v33 = vmul.f32 0.0078125, %v1600_v30 }
 0x43f   : > { %v3083_v38 = vmul.f32 0.0078125, %v1596_v31 }
 0x440   : > { %v1730_v37 = vmul.f32 %v1692_v33, %v1692_v33  ;;  %v1825_v27 = vsub.f32 %v2970_v19, %v1692_v33 }
 0x441   : > { %v1602_v32 = vpop.xlane.xlu1 %1601  ;;  %v1728_v51 = vmul.f32 %v3083_v38, %v3083_v38 }
 0x442   : > { %v1598_v34 = vpop.xlane.xlu0 %1597  ;;  %v1693_v35 = vmul.f32 0.0078125, %v1602_v32 }
 0x443   : > { %v3085_v42 = vmul.f32 0.0078125, %v1598_v34  ;;  %v3105_v34 = vld [vmem:[%s3308_s9] ss:$0 sm:$0xff] }
 0x444   : > { %v1731_v14 = vmul.f32 %v1693_v35, %v1693_v35  ;;  %v1826_v32 = vsub.f32 %v2978_v24, %v1693_v35  ;;  %v3120_v24 = vld [vmem:[%s3309_s10] ss:$0 sm:$0xff] }
 0x445   : > { %v1657_v36 = vpop.xlane.xlu1 %1656  ;;  %v1729_v56 = vmul.f32 %v3085_v42, %v3085_v42 }
 0x446   : > { %v1711_v40 = vmul.f32 0.0078125, %v1657_v36  ;;  %v1659_v0 = vpop.xlane.xlu0 %1658 }
 0x447   : > { %v1712_v43 = vmul.f32 0.0078125, %v1659_v0 }
 0x448   : > { %v1749_v44 = vsub.f32 %v1711_v40, %v1730_v37 }
 0x449   : > { %v1750_v48 = vsub.f32 %v1712_v43, %v1731_v14  ;;  %v1653_v49 = vpop.xlane.xlu1 %1652  ;;  %v1823_v14 = vsub.f32 %v2973_v46, %v3083_v38 }
 0x44a   : > { %v1768_v53 = vmax.f32 %v1749_v44, 0.0  ;;  %v1709_v39 = vmul.f32 0.0078125, %v1653_v49  ;;  %v1655_v55 = vpop.xlane.xlu0 %1654  ;;  %v1824_v49 = vsub.f32 %v2981_v41, %v3085_v42 }
 0x44b   : > { %v1769_v57 = vmax.f32 %v1750_v48, 0.0  ;;  %v1710_v45 = vmul.f32 0.0078125, %v1655_v55 }
 0x44c   : > { %v1787_v60 = vadd.f32 1e-05, %v1768_v53  ;;  %v1747_v62 = vsub.f32 %v1709_v39, %v1728_v51 }
 0x44d   : > { %v1788_v3 = vadd.f32 1e-05, %v1769_v57  ;;  %v1748_v6 = vsub.f32 %v1710_v45, %v1729_v56 }
 0x44e   : > { %2454 = vrsqrt.f32 %v1787_v60  ;;  %v1766_v7 = vmax.f32 %v1747_v62, 0.0  ;;  %v1608_v8 = vpop.xlane.xlu0 %1607 }
 0x44f   : > { %2456 = vrsqrt.f32 %v1788_v3  ;;  %v1767_v63 = vmax.f32 %v1748_v6, 0.0  ;;  %v1610_v10 = vpop.xlane.xlu1 %1609  ;;  %v3091_v12 = vmul.f32 0.0078125, %v1608_v8 }
 0x450   : > { %v1785_v5 = vadd.f32 1e-05, %v1766_v7  ;;  %v3093_v18 = vmul.f32 0.0078125, %v1610_v10 }
 0x451   : > { %v1786_v15 = vadd.f32 1e-05, %v1767_v63  ;;  %v1734_v21 = vmul.f32 %v3091_v12, %v3091_v12 }
 0x452   : > { %2458 = vrsqrt.f32 %v1785_v5  ;;  %v1604_v17 = vpop.xlane.xlu0 %1603  ;;  %v1735_v28 = vmul.f32 %v3093_v18, %v3093_v18 }
 0x453   : > { %2460 = vrsqrt.f32 %v1786_v15  ;;  %v1665_v20 = vpop.xlane.xlu1 %1664  ;;  %v3111_v36 = vmul.f32 0.0078125, %v1604_v17 }
 0x454   : > { %v1715_v22 = vmul.f32 0.0078125, %v1665_v20 }
 0x455   : > { %v1732_v56 = vmul.f32 %v3111_v36, %v3111_v36 }
 0x456   : > { %v1753_v58 = vsub.f32 %v1715_v22, %v1734_v21  ;;  %v1667_v23 = vpop.xlane.xlu0 %1666 }
 0x457   : > { %v1716_v29 = vmul.f32 0.0078125, %v1667_v23  ;;  %v1606_v30 = vpop.xlane.xlu1 %1605 }
 0x458   : > { %v2455_v31 = vpop.eup %2454  ;;  %v1772_v37 = vmax.f32 %v1753_v58, 0.0  ;;  %v3113_v19 = vmul.f32 0.0078125, %v1606_v30 }
 0x459   : > { %v2457_v33 = vpop.eup %2456  ;;  %v1844_v40 = vmul.f32 %v2455_v31, %v1825_v27  ;;  %v1754_v0 = vsub.f32 %v1716_v29, %v1735_v28 }
 0x45a   : > { %v1845_v35 = vmul.f32 %v2457_v33, %v1826_v32  ;;  %v1791_v43 = vadd.f32 1e-05, %v1772_v37  ;;  %v1733_v44 = vmul.f32 %v3113_v19, %v3113_v19  ;;  %v1663_v48 = vpop.xlane.xlu0 %1662  ;;  %v1829_v32 = vsub.f32 %v2994_v47, %v3091_v12 }
 0x45b   : > { %v1870_v51 = vmul.f32 %v3105_v34, %v1844_v40  ;;  %v1773_v53 = vmax.f32 %v1754_v0, 0.0  ;;  %v1714_v39 = vmul.f32 0.0078125, %v1663_v48  ;;  %v1661_v46 = vpop.xlane.xlu1 %1660 }
 0x45c   : > { %v2459_v38 = vpop.eup %2458  ;;  %v1871_v55 = vmul.f32 %v3105_v34, %v1845_v35  ;;  %2462 = vrsqrt.f32 %v1791_v43  ;;  %v1713_v57 = vmul.f32 0.0078125, %v1661_v46 }
 0x45d   : > { %v2461_v45 = vpop.eup %2460  ;;  %v1896_v60 = vadd.f32 %v3120_v24, %v1870_v51  ;;  %v1842_v62 = vmul.f32 %v2459_v38, %v1823_v14  ;;  %v1792_v3 = vadd.f32 1e-05, %v1773_v53  ;;  %v1752_v41 = vsub.f32 %v1714_v39, %v1733_v44 }
 0x45e   : > { %v1897_v42 = vadd.f32 %v3120_v24, %v1871_v55  ;;  %v1843_v6 = vmul.f32 %v2461_v45, %v1824_v49  ;;  %v1751_v7 = vsub.f32 %v1713_v57, %v1732_v56  ;;  %v1616_v8 = vpop.xlane.xlu0 %1615  ;;  %v1830_v44 = vsub.f32 %v2997_v50, %v3093_v18 }
 0x45f   : > { %1915 = vst [vmem:[%s3133_s30 + $0x10] sm:$0xff] %v1896_v60  ;;  %v1868_v63 = vmul.f32 %v3105_v34, %v1842_v62  ;;  %2464 = vrsqrt.f32 %v1792_v3  ;;  %v1771_v10 = vmax.f32 %v1752_v41, 0.0  ;;  %v1618_v5 = vpop.xlane.xlu1 %1617  ;;  %v3139_v20 = vmul.f32 0.0078125, %v1616_v8 }
 0x460   : > { %1916 = vst [vmem:[%s3133_s30 + $0x18] sm:$0xff] %v1897_v42  ;;  %v1869_v15 = vmul.f32 %v3105_v34, %v1843_v6  ;;  %v1770_v17 = vmax.f32 %v1751_v7, 0.0  ;;  %v3144_v28 = vmul.f32 0.0078125, %v1618_v5  ;;  %v1828_v50 = vsub.f32 %v3008_v54, %v3113_v19 }
 0x461   : > { %v1894_v21 = vadd.f32 %v3120_v24, %v1868_v63  ;;  %v1790_v22 = vadd.f32 1e-05, %v1771_v10  ;;  %v1738_v30 = vmul.f32 %v3139_v20, %v3139_v20  ;;  %v1827_v42 = vsub.f32 %v3002_v52, %v3111_v36 }
 0x462   : > { %v1895_v58 = vadd.f32 %v3120_v24, %v1869_v15  ;;  %v1789_v23 = vadd.f32 1e-05, %v1770_v17  ;;  %v1612_v27 = vpop.xlane.xlu0 %1611  ;;  %v1739_v14 = vmul.f32 %v3144_v28, %v3144_v28 }
 0x463   : > { %1913 = vst [vmem:[%s3133_s30] sm:$0xff] %v1894_v21  ;;  %2466 = vrsqrt.f32 %v1790_v22  ;;  %v1673_v29 = vpop.xlane.xlu1 %1672  ;;  %v3155_v48 = vmul.f32 0.0078125, %v1612_v27 }
 0x464   : > { %1914 = vst [vmem:[%s3133_s30 + $0x8] sm:$0xff] %v1895_v58  ;;  %2468 = vrsqrt.f32 %v1789_v23  ;;  %v1719_v31 = vmul.f32 0.0078125, %v1673_v29 }
 0x465   : > { %v1736_v62 = vmul.f32 %v3155_v48, %v3155_v48 }
 0x466   : > { %v2463_v37 = vpop.eup %2462  ;;  %v1757_v33 = vsub.f32 %v1719_v31, %v1738_v30  ;;  %v1675_v40 = vpop.xlane.xlu0 %1674 }
 0x467   : > { %v1848_v0 = vmul.f32 %v2463_v37, %v1829_v32  ;;  %v1720_v35 = vmul.f32 0.0078125, %v1675_v40  ;;  %v1614_v43 = vpop.xlane.xlu1 %1613  ;;  %v1833_v40 = vsub.f32 %v3018_v59, %v3139_v20 }
 0x468   : > { %v1776_v49 = vmax.f32 %v1757_v33, 0.0  ;;  %v3157_v51 = vmul.f32 0.0078125, %v1614_v43 }
 0x469   : > { %v2465_v53 = vpop.eup %2464  ;;  %v1874_v47 = vmul.f32 %v3105_v34, %v1848_v0  ;;  %v1758_v12 = vsub.f32 %v1720_v35, %v1739_v14 }
 0x46a   : > { %v1849_v39 = vmul.f32 %v2465_v53, %v1830_v44  ;;  %v1795_v46 = vadd.f32 1e-05, %v1776_v49  ;;  %v1737_v38 = vmul.f32 %v3157_v51, %v3157_v51  ;;  %v1671_v55 = vpop.xlane.xlu0 %1670 }
 0x46b   : > { %v1900_v56 = vadd.f32 %v3120_v24, %v1874_v47  ;;  %v1777_v18 = vmax.f32 %v1758_v12, 0.0  ;;  %v1718_v57 = vmul.f32 0.0078125, %v1671_v55  ;;  %v1669_v45 = vpop.xlane.xlu1 %1668  ;;  %v1834_v47 = vsub.f32 %v3021_v61, %v3144_v28 }
 0x46c   : > { %v1875_v60 = vmul.f32 %v3105_v34, %v1849_v39  ;;  %2470 = vrsqrt.f32 %v1795_v46  ;;  %v1717_v3 = vmul.f32 0.0078125, %v1669_v45  ;;  %v1832_v61 = vsub.f32 %v3032_v4, %v3157_v51 }
 0x46d   : > { %v2467_v41 = vpop.eup %2466  ;;  %1919 = vst [vmem:[%s3133_s30 + $0x30] sm:$0xff] %v1900_v56  ;;  %v1796_v6 = vadd.f32 1e-05, %v1777_v18  ;;  %v1756_v7 = vsub.f32 %v1718_v57, %v1737_v38 }
 0x46e   : > { %v2469_v8 = vpop.eup %2468  ;;  %v1901_v54 = vadd.f32 %v3120_v24, %v1875_v60  ;;  %v1847_v19 = vmul.f32 %v2467_v41, %v1828_v50  ;;  %v1755_v63 = vsub.f32 %v1717_v3, %v1736_v62  ;;  %v1624_v10 = vpop.xlane.xlu0 %1623 }
 0x46f   : > { %v1846_v5 = vmul.f32 %v2469_v8, %v1827_v42  ;;  %2472 = vrsqrt.f32 %v1796_v6  ;;  %v1775_v15 = vmax.f32 %v1756_v7, 0.0  ;;  %v1626_v17 = vpop.xlane.xlu1 %1625  ;;  %v3174_v52 = vmul.f32 0.0078125, %v1624_v10 }
 0x470   : > { %1920 = vst [vmem:[%s3133_s30 + $0x38] sm:$0xff] %v1901_v54  ;;  %v1873_v21 = vmul.f32 %v3105_v34, %v1847_v19  ;;  %v1774_v22 = vmax.f32 %v1755_v63, 0.0  ;;  %v3179_v31 = vmul.f32 0.0078125, %v1626_v17  ;;  %v1831_v6 = vsub.f32 %v3026_v2, %v3155_v48 }
 0x471   : > { %v1872_v36 = vmul.f32 %v3105_v34, %v1846_v5  ;;  %v1794_v58 = vadd.f32 1e-05, %v1775_v15  ;;  %v1742_v37 = vmul.f32 %v3174_v52, %v3174_v52 }
 0x472   : > { %v1899_v23 = vadd.f32 %v3120_v24, %v1873_v21  ;;  %v1793_v27 = vadd.f32 1e-05, %v1774_v22  ;;  %v1620_v29 = vpop.xlane.xlu0 %1619  ;;  %v1743_v44 = vmul.f32 %v3179_v31, %v3179_v31 }
 0x473   : > { %v1898_v30 = vadd.f32 %v3120_v24, %v1872_v36  ;;  %2474 = vrsqrt.f32 %v1794_v58  ;;  %v1681_v32 = vpop.xlane.xlu1 %1680  ;;  %v3191_v12 = vmul.f32 0.0078125, %v1620_v29 }
 0x474   : > { %1918 = vst [vmem:[%s3133_s30 + $0x28] sm:$0xff] %v1899_v23  ;;  %2476 = vrsqrt.f32 %v1793_v27  ;;  %v1723_v33 = vmul.f32 0.0078125, %v1681_v32 }
 0x475   : > { %1917 = vst [vmem:[%s3133_s30 + $0x20] sm:$0xff] %v1898_v30  ;;  %v1740_v3 = vmul.f32 %v3191_v12, %v3191_v12 }
 0x476   : > { %v2471_v0 = vpop.eup %2470  ;;  %v1761_v14 = vsub.f32 %v1723_v33, %v1742_v37  ;;  %v1683_v35 = vpop.xlane.xlu0 %1682  ;;  %v1837_v33 = vsub.f32 %v3042_v9, %v3174_v52 }
 0x477   : > { %v1852_v43 = vmul.f32 %v2471_v0, %v1833_v40  ;;  %v1724_v49 = vmul.f32 0.0078125, %v1683_v35  ;;  %v1622_v53 = vpop.xlane.xlu1 %1621 }
 0x478   : > { %v1780_v39 = vmax.f32 %v1761_v14, 0.0  ;;  %v3193_v46 = vmul.f32 0.0078125, %v1622_v53 }
 0x479   : > { %v2473_v38 = vpop.eup %2472  ;;  %v1878_v59 = vmul.f32 %v3105_v34, %v1852_v43  ;;  %v1762_v20 = vsub.f32 %v1724_v49, %v1743_v44 }
 0x47a   : > { %v1853_v55 = vmul.f32 %v2473_v38, %v1834_v47  ;;  %v1799_v56 = vadd.f32 1e-05, %v1780_v39  ;;  %v1741_v50 = vmul.f32 %v3193_v46, %v3193_v46  ;;  %v1679_v18 = vpop.xlane.xlu0 %1678  ;;  %v1838_v47 = vsub.f32 %v3045_v11, %v3179_v31 }
 0x47b   : > { %v1904_v57 = vadd.f32 %v3120_v24, %v1878_v59  ;;  %v1781_v28 = vmax.f32 %v1762_v20, 0.0  ;;  %v1722_v45 = vmul.f32 0.0078125, %v1679_v18  ;;  %v1677_v60 = vpop.xlane.xlu1 %1676  ;;  %v1836_v11 = vsub.f32 %v3056_v16, %v3193_v46 }
 0x47c   : > { %v1879_v62 = vmul.f32 %v3105_v34, %v1853_v55  ;;  %2478 = vrsqrt.f32 %v1799_v56  ;;  %v1721_v41 = vmul.f32 0.0078125, %v1677_v60 }
 0x47d   : > { %v2475_v42 = vpop.eup %2474  ;;  %1923 = vst [vmem:[%s3133_s30 + $0x50] sm:$0xff] %v1904_v57  ;;  %v1800_v7 = vadd.f32 1e-05, %v1781_v28  ;;  %v1760_v8 = vsub.f32 %v1722_v45, %v1741_v50  ;;  %v1835_v45 = vsub.f32 %v3050_v13, %v3191_v12 }
 0x47e   : > { %v2477_v54 = vpop.eup %2476  ;;  %v1905_v4 = vadd.f32 %v3120_v24, %v1879_v62  ;;  %v1851_v51 = vmul.f32 %v2475_v42, %v1832_v61  ;;  %v1759_v19 = vsub.f32 %v1721_v41, %v1740_v3  ;;  %v1632_v63 = vpop.xlane.xlu0 %1631 }
 0x47f   : > { %v1850_v10 = vmul.f32 %v2477_v54, %v1831_v6  ;;  %2480 = vrsqrt.f32 %v1800_v7  ;;  %v1779_v5 = vmax.f32 %v1760_v8, 0.0  ;;  %v1630_v15 = vpop.xlane.xlu1 %1629  ;;  %v1708_v32 = vmul.f32 0.0078125, %v1632_v63 }
 0x480   : > { %1924 = vst [vmem:[%s3133_s30 + $0x58] sm:$0xff] %v1905_v4  ;;  %v1877_v17 = vmul.f32 %v3105_v34, %v1851_v51  ;;  %v1778_v21 = vmax.f32 %v1759_v19, 0.0  ;;  %v1707_v27 = vmul.f32 0.0078125, %v1630_v15 }
 0x481   : > { %v1876_v2 = vmul.f32 %v3105_v34, %v1850_v10  ;;  %v1798_v48 = vadd.f32 1e-05, %v1779_v5  ;;  %v1746_v39 = vmul.f32 %v1708_v32, %v1708_v32  ;;  %v1841_v19 = vsub.f32 %v3066_v25, %v1708_v32 }
 0x482   : > { %v1903_v22 = vadd.f32 %v3120_v24, %v1877_v17  ;;  %v1797_v36 = vadd.f32 1e-05, %v1778_v21  ;;  %v1628_v58 = vpop.xlane.xlu0 %1627  ;;  %v1745_v43 = vmul.f32 %v1707_v27, %v1707_v27  ;;  %v1840_v54 = vsub.f32 %v3069_v26, %v1707_v27 }
 0x483   : > { %v1902_v23 = vadd.f32 %v3120_v24, %v1876_v2  ;;  %2482 = vrsqrt.f32 %v1798_v48  ;;  %v1706_v29 = vmul.f32 0.0078125, %v1628_v58  ;;  %v1685_v30 = vpop.xlane.xlu1 %1684 }
 0x484   : > { %1922 = vst [vmem:[%s3133_s30 + $0x48] sm:$0xff] %v1903_v22  ;;  %2484 = vrsqrt.f32 %v1797_v36  ;;  %v1725_v37 = vmul.f32 0.0078125, %v1685_v30 }
 0x485   : > { %1921 = vst [vmem:[%s3133_s30 + $0x40] sm:$0xff] %v1902_v23  ;;  %v1744_v40 = vmul.f32 %v1706_v29, %v1706_v29  ;;  %v1839_v7 = vsub.f32 %v3072_v1, %v1706_v29 }
 0x486   : > { %v2479_v0 = vpop.eup %2478  ;;  %v1687_v14 = vpop.xlane.xlu0 %1686 }
 0x487   : > { %v1856_v35 = vmul.f32 %v2479_v0, %v1837_v33  ;;  %v1763_v44 = vsub.f32 %v1725_v37, %v1744_v40  ;;  %v1726_v49 = vmul.f32 0.0078125, %v1687_v14  ;;  %v1689_v53 = vpop.xlane.xlu1 %1688 }
 0x488   : > { %v1727_v38 = vmul.f32 0.0078125, %v1689_v53 }
 0x489   : > { %v2481_v59 = vpop.eup %2480  ;;  %v1882_v20 = vmul.f32 %v3105_v34, %v1856_v35  ;;  %v1782_v55 = vmax.f32 %v1763_v44, 0.0  ;;  %v1764_v56 = vsub.f32 %v1726_v49, %v1745_v43 }
 0x48a   : > { %v1857_v9 = vmul.f32 %v2481_v59, %v1838_v47  ;;  %v1765_v52 = vsub.f32 %v1727_v38, %v1746_v39 }
 0x48b   : > { %v1908_v50 = vadd.f32 %v3120_v24, %v1882_v20  ;;  %v1801_v18 = vadd.f32 1e-05, %v1782_v55  ;;  %v1783_v57 = vmax.f32 %v1764_v56, 0.0 }
 0x48c   : > { %v1883_v61 = vmul.f32 %v3105_v34, %v1857_v9  ;;  %v1784_v31 = vmax.f32 %v1765_v52, 0.0 }
 0x48d   : > { %v2483_v28 = vpop.eup %2482  ;;  %1927 = vst [vmem:[%s3133_s30 + $0x70] sm:$0xff] %v1908_v50  ;;  %2486 = vrsqrt.f32 %v1801_v18  ;;  %v1802_v60 = vadd.f32 1e-05, %v1783_v57 }
 0x48e   : > { %v2485_v62 = vpop.eup %2484  ;;  %v1909_v3 = vadd.f32 %v3120_v24, %v1883_v61  ;;  %v1855_v41 = vmul.f32 %v2483_v28, %v1836_v11  ;;  %v1803_v42 = vadd.f32 1e-05, %v1784_v31 }
 0x48f   : > { %v1854_v6 = vmul.f32 %v2485_v62, %v1835_v45  ;;  %2488 = vrsqrt.f32 %v1802_v60 }
 0x490   : > { %1928 = vst [vmem:[%s3133_s30 + $0x78] sm:$0xff] %v1909_v3  ;;  %v1881_v16 = vmul.f32 %v3105_v34, %v1855_v41  ;;  %2490 = vrsqrt.f32 %v1803_v42 }
 0x491   : > { %v1880_v46 = vmul.f32 %v3105_v34, %v1854_v6 }
 0x492   : > { %v1907_v13 = vadd.f32 %v3120_v24, %v1881_v16 }
 0x493   : > { %v1906_v12 = vadd.f32 %v3120_v24, %v1880_v46 }
 0x494   : > { %1926 = vst [vmem:[%s3133_s30 + $0x68] sm:$0xff] %v1907_v13 }
 0x495   : > { %1925 = vst [vmem:[%s3133_s30 + $0x60] sm:$0xff] %v1906_v12 }
 0x497   : > { %v2487_v8 = vpop.eup %2486 }
 0x498   : > { %v1858_v4 = vmul.f32 %v2487_v8, %v1839_v7 }
 0x499   : > { %v2489_v51 = vpop.eup %2488 }
 0x49a   : > { %v2491_v63 = vpop.eup %2490  ;;  %v1884_v10 = vmul.f32 %v3105_v34, %v1858_v4  ;;  %v1859_v5 = vmul.f32 %v2489_v51, %v1840_v54 }
 0x49b   : > { %v1860_v15 = vmul.f32 %v2491_v63, %v1841_v19 }
 0x49c   : > { %v1910_v1 = vadd.f32 %v3120_v24, %v1884_v10  ;;  %v1885_v17 = vmul.f32 %v3105_v34, %v1859_v5 }
 0x49d   : > { %v1886_v26 = vmul.f32 %v3105_v34, %v1860_v15 }
 0x49e   : > { %1929 = vst [vmem:[%s3133_s30 + $0x80] sm:$0xff] %v1910_v1  ;;  %v1911_v21 = vadd.f32 %v3120_v24, %v1885_v17 }
 0x49f   : > { %v1912_v25 = vadd.f32 %v3120_v24, %v1886_v26 }
 0x4a0   : > { %1930 = vst [vmem:[%s3133_s30 + $0x88] sm:$0xff] %v1911_v21 }
 0x4a1   : > { %1931 = vst [vmem:[%s3133_s30 + $0x90] sm:$0xff] %v1912_v25 }
 0x4a2   : > { %2505 = shalt.err (!%p2502_p3)
}
 0x4a3   : > { %s2506_s22 = scalar_lea.hbm %s3249_s24, 2432  ;;  %s2510_s14 = scalar_lea.hbm %s3310_s11, 4864 }
 0x4a4   : > { %p2507_p4 = scmp.ne.s32.totalorder %s3249_s24, %s2506_s22  ;;  %p2511_p9 = scmp.lt.u32.totalorder %s3249_s24, %s3310_s11 }
 0x4a5   : > { %p2512_p10 = scmp.lt.u32.totalorder %s2510_s14, %s2506_s22  ;;  %p2514_p12 = scmp.lt.u32.totalorder %s2506_s22, %s3249_s24 }
 0x4a6   : > { %p2508_p7 = pnand %p2507_p4, %p2657_p5 }
 0x4a7   : > { %p2513_p11 = por %p2512_p10, %p2511_p9 }
 0x4a8   : > { %p2509_p8 = pneg %p2508_p7 }
 0x4a9   : > { %p2515_p13 = por %p2514_p12, %p2513_p11 }
 0x4ab   : > { %p2516_p0 = pnand %p2515_p13, %p2509_p8 }
 0x4ad   : > { %2519 = shalt.err (!%p2516_p0)
}
 0x4ae   : > { %s2557_s29 = smov 128   ;;  %s2558_s15 = smov 8  }
 0x4af   : > { %2365 = dma.vmem_to_hbm [thread:$0]  (%p2657_p5), %s3251_s13, 2432, %s3249_s24, %s3258_s21, %s2557_s29, %s2557_s29, %s2558_s15  }
 0x4b0 PF: > { %p2371_p1 = scmp.ge.s32.totalorder %s2554_s20, 2  ;;  %s1961_s25 = sand.u32 1, %s2542_s17  }
 0x4b1   : > { %s1962_s22 = scalar_lea.sflag [#allocation3], %s1961_s25 }
 0x4b2   : > { %p2368_p2 = pnand %p2371_p1, %p2661_p6 }
 0x4b4   : > { %2537 = dma.done.wait (!%p2368_p2), %s1962_s22, 2432  }
 0x4b5   : > { %2539 = vsyncadd (!%p2368_p2), %s1962_s22, 4294964864  ;;  %s3314_s30 = sld [smem:[#allocation5_spill]]  ;;  %p21_p3 = scmp.ge.s32.totalorder %s2644_s23, 4  }
 0x4b6   : > { %s3315_s17 = smov %s2546_s18  ;;  %s3316_s18 = smov %s2550_s19 }
 0x4b7   : > { %s3318_s20 = smov %s2644_s23  ;;  %23 = sbr.rel (!%p21_p3) target bundleno = 3 (0x3), region = 99 }
 0x4bb   : > { %s3317_s19 = smov %s3314_s30 }
 0x4be   :  { %1967 = vsyncpa [#allocation3], 1 }
 0x4bf   :  { %1969 = vsyncpa [#allocation3 + $0x1], 1 }

</bundles_post_ra>
